<compile_context>
chip_gen: v5e
topology: v5e:2x2
jax: 0.10.0
libtpu: 0.0.40
codegen_flags: <defaults>
</compile_context>

<pallas_src>
import jax
import jax.numpy as jnp
from jax import lax
from jax.experimental import pallas as pl
from jax.experimental.pallas import tpu as pltpu

# ----------------------------- config (small shapes) -----------------------------
B = 2          # batch
S = 8          # number of input (context) words
T = 6          # number of target words
H = 16         # encoder hidden size (per direction)
H2 = 2 * H     # bi-directional hidden size == decoder hidden size
EMB = 13       # GLoVE embedding dim
BIO_EMB = 3    # bio tag embedding dim
ENC_IN = EMB + BIO_EMB   # encoder GRU input size  (= input_sizes[0])
DEC_IN = EMB             # decoder GRU input size  (= input_sizes[1])
VOCAB = 32
START_TOKEN_IDX = 1

F32 = jnp.float32
BF16 = jnp.bfloat16
_VMEM = pl.BlockSpec(memory_space=pltpu.MemorySpace.VMEM)

# ---- packed weight-slab layout (bf16, width 96; all row starts 16-aligned) ------
ENC_OH_W   = 80             # padded width of fused encoder one-hot (2*(VOCAB+4)=72 -> 80)
W_ENC_GI   = 0              # (80, 96)  fwd/bwd embedding-folded layer-1 input weight
W_ENC_WHH1 = 80             # (32, 96)  fused layer-1 W_hh
W_ENC_WIH2 = 112            # (32, 96)  fused layer-2 W_ih
W_ENC_WHH2 = 144            # (32, 96)  fused layer-2 W_hh
W_DEC_GI   = 176            # (32, 96)  glove-folded decoder W_ih
W_DEC_WHH  = 208            # (32, 96)  decoder W_hh^T
W_PACK_A   = 240            # (32, 96)  [enc att_w^T | enc g_top | enc g_bot]
W_PACK_B   = 272            # (32, 96)  [enc f_top   | enc f_bot | dec att_w^T]
W_PACK_C   = 304            # (32, 96)  [dec ctx_top | dec ctx_bot | dec pred_w^T]
W_ROWS     = 336

# ---- packed bias-slab layout (f32, (8, 96)) --------------------------------------
B_ENC_BIH1, B_ENC_BHH1, B_ENC_BIH2, B_ENC_BHH2 = 0, 1, 2, 3
B_DEC_BIH, B_DEC_BHH = 4, 5
B_ENC_ATT = 6               # [enc att_b | enc g_b | enc f_b]
B_DEC_ATT = 7               # [dec att_b | dec ctx_b | dec pred_b]


# ----------------------------- GRU / softmax helpers ------------------------------
def _gru_gates(gi, gh, h):
    """PyTorch GRUCell gate math.  gi/gh: (B, 3*H2) with gate blocks [r | z | n]
    each H2 wide (for the fused encoder each block is [fwd | bwd]); h: (B, H2)."""
    r = jax.nn.sigmoid(gi[:, 0:H2] + gh[:, 0:H2])
    z = jax.nn.sigmoid(gi[:, H2:2 * H2] + gh[:, H2:2 * H2])
    n = jnp.tanh(gi[:, 2 * H2:3 * H2] + r * gh[:, 2 * H2:3 * H2])
    return (1.0 - z) * n + z * h


def _softmax_masked(scores, valid):
    """Row softmax with invalid (cross-batch) columns forced to prob 0."""
    scores = jnp.where(valid, scores, -1e30)
    scores = scores - jnp.max(scores, axis=-1, keepdims=True)
    e = jnp.exp(scores)
    return e * pl.reciprocal(jnp.sum(e, axis=-1, keepdims=True), approx=True)


# ----------------------------- the single fused kernel ----------------------------
def fused_kernel(ids_ref, w_ref, b_ref, preds_ref, enc_st_ref, dec_st_ref):
    ids = ids_ref[...]                       # (S*B, 8) int32
    b_all = b_ref[...]                       # (8, 96) f32 — all biases in one vreg

    # ---- one-hot embeddings + hoisted non-recurrent input projections -----------
    cid_f = ids[:, 0:1]                      # ctx ids, time-major (row = s*B + b)
    tid_f = ids[:, 1:2]                      # bio tag ids, time-major
    cid_b = ids[:, 2:3]                      # ctx ids, time-reversed time-major
    tid_b = ids[:, 3:4]                      # bio tag ids, time-reversed
    col = lax.broadcasted_iota(jnp.int32, (S * B, ENC_OH_W), 1)
    enc_oh = (((col < VOCAB) & (cid_f == col)) |
              ((col >= VOCAB) & (col < VOCAB + 4) & (tid_f == col - VOCAB)) |
              ((col >= VOCAB + 4) & (col < 2 * VOCAB + 4) &
               (cid_b == col - (VOCAB + 4))) |
              ((col >= 2 * VOCAB + 4) & (tid_b == col - (2 * VOCAB + 4)))
              ).astype(F32).astype(BF16)                                 # (S*B, 80)

    dcol = lax.broadcasted_iota(jnp.int32, (T * B, VOCAB), 1)
    prev_oh = (ids[0:T * B, 4:5] == dcol).astype(F32).astype(BF16)       # (T*B, 32)

    # layer-1 (both directions, all steps) and decoder (all steps) input gi's
    gi1_all = (jnp.dot(enc_oh, w_ref[W_ENC_GI:W_ENC_GI + ENC_OH_W, :],
                       preferred_element_type=F32)
               + b_all[B_ENC_BIH1:B_ENC_BIH1 + 1, :])                    # (S*B, 96)
    gi_dec = (jnp.dot(prev_oh, w_ref[W_DEC_GI:W_DEC_GI + VOCAB, :],
                      preferred_element_type=F32)
              + b_all[B_DEC_BIH:B_DEC_BIH + 1, :])                       # (T*B, 96)

    # ---- fused bidirectional 2-layer GRU encoder (unrolled, both dirs per dot) --
    whh1 = w_ref[W_ENC_WHH1:W_ENC_WHH1 + H2, :]                          # bf16 (32,96)
    wih2 = w_ref[W_ENC_WIH2:W_ENC_WIH2 + H2, :]
    whh2 = w_ref[W_ENC_WHH2:W_ENC_WHH2 + H2, :]
    bhh1 = b_all[B_ENC_BHH1:B_ENC_BHH1 + 1, :]
    bih2 = b_all[B_ENC_BIH2:B_ENC_BIH2 + 1, :]
    bhh2 = b_all[B_ENC_BHH2:B_ENC_BHH2 + 1, :]

    h1 = jnp.zeros((B, H2), F32)             # [fwd | bwd] layer-1 hidden
    h2 = jnp.zeros((B, H2), F32)             # [fwd | bwd] layer-2 hidden
    for s in range(S):
        gi1 = gi1_all[s * B:(s + 1) * B, :]
        gh1 = jnp.dot(h1.astype(BF16), whh1, preferred_element_type=F32) + bhh1
        h1 = _gru_gates(gi1, gh1, h1)
        gi2 = jnp.dot(h1.astype(BF16), wih2, preferred_element_type=F32) + bih2
        gh2 = jnp.dot(h2.astype(BF16), whh2, preferred_element_type=F32) + bhh2
        h2 = _gru_gates(gi2, gh2, h2)
        # row s*B + b == reference cat(forward_states, backward_states)[b, s, :]
        enc_st_ref[s * B:(s + 1) * B, :] = h2

    # ---- encoder self-attention, batched over B*S with a cross-batch mask -------
    packA = w_ref[W_PACK_A:W_PACK_A + H2, :]
    packB = w_ref[W_PACK_B:W_PACK_B + H2, :]
    att_w, g_top, g_bot = packA[:, 0:H2], packA[:, H2:2 * H2], packA[:, 2 * H2:3 * H2]
    f_top, f_bot = packB[:, 0:H2], packB[:, H2:2 * H2]
    att_b = b_all[B_ENC_ATT:B_ENC_ATT + 1, 0:H2]
    g_b = b_all[B_ENC_ATT:B_ENC_ATT + 1, H2:2 * H2]
    f_b = b_all[B_ENC_ATT:B_ENC_ATT + 1, 2 * H2:3 * H2]

    x_all = enc_st_ref[...]                                              # (S*B, 2H) f32
    x16 = x_all.astype(BF16)
    a_all = jnp.dot(x16, att_w, preferred_element_type=F32) + att_b
    scores = jnp.einsum("ik,jk->ij", a_all.astype(BF16), x16,
                        preferred_element_type=F32)                      # (S*B, S*B)
    ri = lax.broadcasted_iota(jnp.int32, (S * B, S * B), 0)
    ci = lax.broadcasted_iota(jnp.int32, (S * B, S * B), 1)
    probs = _softmax_masked(scores, (ri % B) == (ci % B))                # per-batch softmax
    ctxv = jnp.dot(probs.astype(BF16), x16, preferred_element_type=F32)  # (S*B, 2H)
    g = jax.nn.sigmoid(jnp.dot(ctxv.astype(BF16), g_top, preferred_element_type=F32)
                       + jnp.dot(x16, g_bot, preferred_element_type=F32) + g_b)
    f = jnp.tanh(jnp.dot(ctxv.astype(BF16), f_top, preferred_element_type=F32)
                 + jnp.dot(x16, f_bot, preferred_element_type=F32) + f_b)
    attn_all = g * f + (1.0 - g) * x_all                                 # (S*B, 2H) f32

    # ---- attentive GRU decoder (teacher forcing = 1.0), unrolled -----------------
    packC = w_ref[W_PACK_C:W_PACK_C + H2, :]
    whh_d = w_ref[W_DEC_WHH:W_DEC_WHH + H2, :]
    datt_w = packB[:, 2 * H2:3 * H2]
    ctx_top, ctx_bot = packC[:, 0:H2], packC[:, H2:2 * H2]
    bhh_d = b_all[B_DEC_BHH:B_DEC_BHH + 1, :]
    datt_b = b_all[B_DEC_ATT:B_DEC_ATT + 1, 0:H2]
    dctx_b = b_all[B_DEC_ATT:B_DEC_ATT + 1, H2:2 * H2]

    attn16 = attn_all.astype(BF16)                        # (S*B, 2H)
    attn16_t = jnp.transpose(attn_all).astype(BF16)       # (2H, S*B), hoisted out of loop
    dci = lax.broadcasted_iota(jnp.int32, (B, S * B), 1)
    dri = lax.broadcasted_iota(jnp.int32, (B, S * B), 0)
    dvalid = (dci % B) == dri                             # column j belongs to batch j % B

    h = h1                                  # decoder init = cat(layer-1 fwd, layer-1 bwd)
    for t in range(T):
        gh = jnp.dot(h.astype(BF16), whh_d, preferred_element_type=F32) + bhh_d
        h = _gru_gates(gi_dec[t * B:(t + 1) * B, :], gh, h)
        a = jnp.dot(h.astype(BF16), datt_w, preferred_element_type=F32) + datt_b
        raw = jnp.dot(a.astype(BF16), attn16_t, preferred_element_type=F32)   # (B, S*B)
        probs_d = _softmax_masked(raw, dvalid)
        cv = jnp.dot(probs_d.astype(BF16), attn16, preferred_element_type=F32)
        h = jnp.tanh(jnp.dot(cv.astype(BF16), ctx_top, preferred_element_type=F32)
                     + jnp.dot(h.astype(BF16), ctx_bot, preferred_element_type=F32)
                     + dctx_b)
        dec_st_ref[t * B:(t + 1) * B, :] = h

    # ---- vocabulary projection hoisted out of the recurrence (one matmul) --------
    pred_w = packC[:, 2 * H2:3 * H2]
    pred_b = b_all[B_DEC_ATT:B_DEC_ATT + 1, 2 * H2:3 * H2]
    hd = dec_st_ref[0:T * B, :].astype(BF16)                             # (T*B, 2H)
    preds_ref[...] = jnp.dot(hd, pred_w, preferred_element_type=F32) + pred_b


# ----------------------------- parameter init (deterministic, synthetic) ----------
def _init_params():
    """Raw parameters in PyTorch layout (Linear/GRUCell: weight = (out, in))."""
    key = jax.random.PRNGKey(0)
    ks = iter(jax.random.split(key, 64))

    def mat(shape, scale=0.1):
        return (scale * jax.random.normal(next(ks), shape)).astype(jnp.float32)

    params = {}
    params["glove"] = mat((VOCAB, EMB), 0.3)
    params["bio"] = mat((4, BIO_EMB), 0.3)

    def gru_stack(in_dim, hid):
        return {
            "w_ih1": mat((3 * hid, in_dim)), "w_hh1": mat((3 * hid, hid)),
            "b_ih1": mat((1, 3 * hid)),      "b_hh1": mat((1, 3 * hid)),
            "w_ih2": mat((3 * hid, hid)),    "w_hh2": mat((3 * hid, hid)),
            "b_ih2": mat((1, 3 * hid)),      "b_hh2": mat((1, 3 * hid)),
        }

    params["enc_fwd"] = gru_stack(ENC_IN, H)
    params["enc_bwd"] = gru_stack(ENC_IN, H)
    params["enc_attn"] = {
        "att_w": mat((H2, H2)),      "att_b": mat((1, H2)),
        "g_w": mat((H2, 2 * H2)),    "g_b": mat((1, H2)),
        "f_w": mat((H2, 2 * H2)),    "f_b": mat((1, H2)),
    }
    params["dec"] = {
        "w_ih": mat((3 * H2, DEC_IN)), "w_hh": mat((3 * H2, H2)),
        "b_ih": mat((1, 3 * H2)),      "b_hh": mat((1, 3 * H2)),
        "att_w": mat((H2, H2)),        "att_b": mat((1, H2)),
        "ctx_w": mat((H2, 2 * H2)),    "ctx_b": mat((1, H2)),
        "pred_w": mat((VOCAB, H2)),    "pred_b": mat((1, VOCAB)),
    }
    return params


def _prepare_kernel_params(p):
    """One-time packing: fold embedding tables into input weights, fuse fwd/bwd
    encoder stacks into block-diagonal gate-major weights, pre-transpose / split
    all Linear weights, and pack everything into one bf16 weight slab + one f32
    bias slab (exact algebra, only fp reassociation + bf16 weight cast)."""
    glove, bio = p["glove"], p["bio"]
    ef, eb = p["enc_fwd"], p["enc_bwd"]
    ea, d = p["enc_attn"], p["dec"]

    def fold_emb(q):
        # (VOCAB+4, 3H): rows 0..V-1 = glove word part, rows V..V+3 = bio tag part
        return jnp.concatenate([jnp.dot(glove, q["w_ih1"][:, :EMB].T),
                                jnp.dot(bio, q["w_ih1"][:, EMB:].T)], axis=0)

    def fuse_cols(wf_t, wb_t):
        # block-diagonal fwd/bwd fusion, gate-major columns [rf rb zf zb nf nb]
        in_f, in_b = wf_t.shape[0], wb_t.shape[0]
        out = jnp.zeros((in_f + in_b, 6 * H), jnp.float32)
        for g in range(3):
            out = out.at[:in_f, (2 * g) * H:(2 * g + 1) * H].set(
                wf_t[:, g * H:(g + 1) * H])
            out = out.at[in_f:, (2 * g + 1) * H:(2 * g + 2) * H].set(
                wb_t[:, g * H:(g + 1) * H])
        return out

    def fuse_bias(bf, bb):
        return jnp.concatenate(
            [x for g in range(3)
             for x in (bf[:, g * H:(g + 1) * H], bb[:, g * H:(g + 1) * H])], axis=1)

    enc_gi = fuse_cols(fold_emb(ef), fold_emb(eb))                      # (72, 96)
    enc_gi = jnp.pad(enc_gi, ((0, ENC_OH_W - 2 * (VOCAB + 4)), (0, 0)))  # -> (80, 96)

    w_slab = jnp.concatenate([
        enc_gi,                                                          # rows   0: 80
        fuse_cols(ef["w_hh1"].T, eb["w_hh1"].T),                         # rows  80:112
        fuse_cols(ef["w_ih2"].T, eb["w_ih2"].T),                         # rows 112:144
        fuse_cols(ef["w_hh2"].T, eb["w_hh2"].T),                         # rows 144:176
        jnp.dot(glove, d["w_ih"].T),                                     # rows 176:208
        d["w_hh"].T,                                                     # rows 208:240
        jnp.concatenate([ea["att_w"].T, ea["g_w"][:, :H2].T,
                         ea["g_w"][:, H2:].T], axis=1),                  # rows 240:272
        jnp.concatenate([ea["f_w"][:, :H2].T, ea["f_w"][:, H2:].T,
                         d["att_w"].T], axis=1),                         # rows 272:304
        jnp.concatenate([d["ctx_w"][:, :H2].T, d["ctx_w"][:, H2:].T,
                         d["pred_w"].T], axis=1),                        # rows 304:336
    ], axis=0).astype(jnp.bfloat16)
    assert w_slab.shape == (W_ROWS, 3 * H2), w_slab.shape

    b_slab = jnp.concatenate([
        fuse_bias(ef["b_ih1"], eb["b_ih1"]),
        fuse_bias(ef["b_hh1"], eb["b_hh1"]),
        fuse_bias(ef["b_ih2"], eb["b_ih2"]),
        fuse_bias(ef["b_hh2"], eb["b_hh2"]),
        d["b_ih"], d["b_hh"],
        jnp.concatenate([ea["att_b"], ea["g_b"], ea["f_b"]], axis=1),
        jnp.concatenate([d["att_b"], d["ctx_b"], d["pred_b"]], axis=1),
    ], axis=0).astype(jnp.float32)
    assert b_slab.shape == (8, 3 * H2), b_slab.shape
    return w_slab, b_slab


# ----------------------------- full forward (training path) -----------------------
def paragraph_level_generation_forward(context_ids, answer_tags, target_ids,
                                        w_slab, b_slab):
    """context_ids (B,S,1) int, answer_tags (B,S) int, target_ids (B,T,1) int
    -> preds (B, T, VOCAB) float32 logits."""
    # tiny int-only glue: one packed id table, time-major (row = step*B + batch)
    ctx_tm = jnp.transpose(context_ids[:, :, 0]).reshape(S * B)
    tag_tm = jnp.transpose(answer_tags).reshape(S * B)
    ctx_rev = jnp.transpose(context_ids[:, ::-1, 0]).reshape(S * B)
    tag_rev = jnp.transpose(answer_tags[:, ::-1]).reshape(S * B)
    start_col = jnp.full((B, 1), START_TOKEN_IDX, jnp.int32)
    prev = jnp.concatenate([start_col, target_ids[:, :-1, 0]], axis=1)   # (B, T)
    prev_tm = jnp.transpose(prev).reshape(T * B)
    prev_pad = jnp.concatenate(
        [prev_tm, jnp.zeros((S * B - T * B,), jnp.int32)])
    zcol = jnp.zeros((S * B,), jnp.int32)
    ids = jnp.stack([ctx_tm, tag_tm, ctx_rev, tag_rev, prev_pad,
                     zcol, zcol, zcol], axis=1).astype(jnp.int32)        # (S*B, 8)

    preds_flat = pl.pallas_call(
        fused_kernel,
        out_shape=jax.ShapeDtypeStruct((T * B, VOCAB), jnp.float32),
        in_specs=[_VMEM, _VMEM, _VMEM],
        out_specs=_VMEM,
        scratch_shapes=[
            pltpu.VMEM((S * B, H2), jnp.float32),   # encoder layer-2 [fwd|bwd] states
            pltpu.VMEM((S * B, H2), jnp.float32),   # decoder hidden states (first T*B rows)
        ],
    )(ids, w_slab, b_slab)

    return jnp.transpose(preds_flat.reshape(T, B, VOCAB), (1, 0, 2))     # (B, T, V)


# ----------------------------- main -----------------------------------------------
if __name__ == "__main__":
    raw_params = _init_params()
    w_slab, b_slab = _prepare_kernel_params(raw_params)

    key = jax.random.PRNGKey(0)
    k1, k2, k3 = jax.random.split(key, 3)
    context_ids = jax.random.randint(k1, (B, S, 1), 0, VOCAB, dtype=jnp.int32)
    answer_tags = jax.random.randint(k2, (B, S), 0, 4, dtype=jnp.int32)
    target_ids = jax.random.randint(k3, (B, T, 1), 0, VOCAB, dtype=jnp.int32)

    fwd = jax.jit(paragraph_level_generation_forward)
    preds = jax.block_until_ready(
        fwd(context_ids, answer_tags, target_ids, w_slab, b_slab))

    assert preds.shape == (B, T, VOCAB), preds.shape
    assert bool(jnp.all(jnp.isfinite(preds)))
    print("KERNEL_OK")
</pallas_src>

<mosaic_0001>
module attributes {stable_mosaic.version = 11 : i64} {
  func.func @fused_kernel(%arg0: memref<16x8xi32, #tpu.memory_space<vmem>>, %arg1: memref<336x96xbf16, #tpu.memory_space<vmem>>, %arg2: memref<8x96xf32, #tpu.memory_space<vmem>>, %arg3: memref<12x32xf32, #tpu.memory_space<vmem>>, %arg4: memref<16x32xf32, #tpu.memory_space<vmem>>, %arg5: memref<16x32xf32, #tpu.memory_space<vmem>>) attributes {dimension_semantics = [], scalar_prefetch = 0 : i64, scratch_operands = 2 : i64, tpu.core_type = #tpu.core_type<tc>} {
    %c0 = arith.constant 0 : index
    %c0_0 = arith.constant 0 : index
    %0 = vector.load %arg0[%c0, %c0_0] : memref<16x8xi32, #tpu.memory_space<vmem>>, vector<16x8xi32>
    %c0_1 = arith.constant 0 : index
    %c0_2 = arith.constant 0 : index
    %1 = vector.load %arg2[%c0_1, %c0_2] : memref<8x96xf32, #tpu.memory_space<vmem>>, vector<8x96xf32>
    %2 = vector.extract_strided_slice %0 {offsets = [0, 0], sizes = [16, 1], strides = [1, 1]} : vector<16x8xi32> to vector<16x1xi32>
    %3 = vector.extract_strided_slice %0 {offsets = [0, 1], sizes = [16, 1], strides = [1, 1]} : vector<16x8xi32> to vector<16x1xi32>
    %4 = vector.extract_strided_slice %0 {offsets = [0, 2], sizes = [16, 1], strides = [1, 1]} : vector<16x8xi32> to vector<16x1xi32>
    %5 = vector.extract_strided_slice %0 {offsets = [0, 3], sizes = [16, 1], strides = [1, 1]} : vector<16x8xi32> to vector<16x1xi32>
    %6 = tpu.iota {dimensions = array<i32: 1>} : vector<16x80xi32>
    %c32_i32 = arith.constant 32 : i32
    %7 = vector.broadcast %c32_i32 : i32 to vector<16x80xi32>
    %8 = arith.cmpi slt, %6, %7 : vector<16x80xi32>
    %9 = vector.broadcast %2 : vector<16x1xi32> to vector<16x80xi32>
    %10 = arith.cmpi eq, %9, %6 : vector<16x80xi32>
    %11 = arith.andi %8, %10 : vector<16x80xi1>
    %c32_i32_3 = arith.constant 32 : i32
    %12 = vector.broadcast %c32_i32_3 : i32 to vector<16x80xi32>
    %13 = arith.cmpi sge, %6, %12 : vector<16x80xi32>
    %c36_i32 = arith.constant 36 : i32
    %14 = vector.broadcast %c36_i32 : i32 to vector<16x80xi32>
    %15 = arith.cmpi slt, %6, %14 : vector<16x80xi32>
    %16 = arith.andi %13, %15 : vector<16x80xi1>
    %c32_i32_4 = arith.constant 32 : i32
    %17 = vector.broadcast %c32_i32_4 : i32 to vector<16x80xi32>
    %18 = arith.subi %6, %17 : vector<16x80xi32>
    %19 = vector.broadcast %3 : vector<16x1xi32> to vector<16x80xi32>
    %20 = arith.cmpi eq, %19, %18 : vector<16x80xi32>
    %21 = arith.andi %16, %20 : vector<16x80xi1>
    %22 = arith.ori %11, %21 : vector<16x80xi1>
    %c36_i32_5 = arith.constant 36 : i32
    %23 = vector.broadcast %c36_i32_5 : i32 to vector<16x80xi32>
    %24 = arith.cmpi sge, %6, %23 : vector<16x80xi32>
    %c68_i32 = arith.constant 68 : i32
    %25 = vector.broadcast %c68_i32 : i32 to vector<16x80xi32>
    %26 = arith.cmpi slt, %6, %25 : vector<16x80xi32>
    %27 = arith.andi %24, %26 : vector<16x80xi1>
    %c36_i32_6 = arith.constant 36 : i32
    %28 = vector.broadcast %c36_i32_6 : i32 to vector<16x80xi32>
    %29 = arith.subi %6, %28 : vector<16x80xi32>
    %30 = vector.broadcast %4 : vector<16x1xi32> to vector<16x80xi32>
    %31 = arith.cmpi eq, %30, %29 : vector<16x80xi32>
    %32 = arith.andi %27, %31 : vector<16x80xi1>
    %33 = arith.ori %22, %32 : vector<16x80xi1>
    %c68_i32_7 = arith.constant 68 : i32
    %34 = vector.broadcast %c68_i32_7 : i32 to vector<16x80xi32>
    %35 = arith.cmpi sge, %6, %34 : vector<16x80xi32>
    %c68_i32_8 = arith.constant 68 : i32
    %36 = vector.broadcast %c68_i32_8 : i32 to vector<16x80xi32>
    %37 = arith.subi %6, %36 : vector<16x80xi32>
    %38 = vector.broadcast %5 : vector<16x1xi32> to vector<16x80xi32>
    %39 = arith.cmpi eq, %38, %37 : vector<16x80xi32>
    %40 = arith.andi %35, %39 : vector<16x80xi1>
    %41 = arith.ori %33, %40 : vector<16x80xi1>
    %42 = arith.extui %41 : vector<16x80xi1> to vector<16x80xi32>
    %43 = arith.sitofp %42 : vector<16x80xi32> to vector<16x80xf32>
    %44 = arith.truncf %43 : vector<16x80xf32> to vector<16x80xbf16>
    %45 = tpu.iota {dimensions = array<i32: 1>} : vector<12x32xi32>
    %46 = vector.extract_strided_slice %0 {offsets = [0, 4], sizes = [12, 1], strides = [1, 1]} : vector<16x8xi32> to vector<12x1xi32>
    %47 = vector.broadcast %46 : vector<12x1xi32> to vector<12x32xi32>
    %48 = arith.cmpi eq, %47, %45 : vector<12x32xi32>
    %49 = arith.extui %48 : vector<12x32xi1> to vector<12x32xi32>
    %50 = arith.sitofp %49 : vector<12x32xi32> to vector<12x32xf32>
    %51 = arith.truncf %50 : vector<12x32xf32> to vector<12x32xbf16>
    %c0_9 = arith.constant 0 : index
    %c0_10 = arith.constant 0 : index
    %52 = vector.load %arg1[%c0_9, %c0_10] : memref<336x96xbf16, #tpu.memory_space<vmem>>, vector<80x96xbf16>
    %cst = arith.constant dense<0.000000e+00> : vector<16x96xf32>
    %53 = tpu.matmul %44, %52, %cst {dimension_numbers = #tpu.dot_dimension_numbers<[1], [0], [0], [1], [0, 0, 1, 1], [], []>} : vector<16x80xbf16>, vector<80x96xbf16>, vector<16x96xf32> -> vector<16x96xf32>
    %54 = vector.extract_strided_slice %1 {offsets = [0, 0], sizes = [1, 96], strides = [1, 1]} : vector<8x96xf32> to vector<1x96xf32>
    %55 = vector.broadcast %54 : vector<1x96xf32> to vector<16x96xf32>
    %56 = arith.addf %53, %55 : vector<16x96xf32>
    %c176 = arith.constant 176 : index
    %c0_11 = arith.constant 0 : index
    %57 = vector.load %arg1[%c176, %c0_11] : memref<336x96xbf16, #tpu.memory_space<vmem>>, vector<32x96xbf16>
    %cst_12 = arith.constant dense<0.000000e+00> : vector<12x96xf32>
    %58 = tpu.matmul %51, %57, %cst_12 {dimension_numbers = #tpu.dot_dimension_numbers<[1], [0], [0], [1], [0, 0, 1, 1], [], []>} : vector<12x32xbf16>, vector<32x96xbf16>, vector<12x96xf32> -> vector<12x96xf32>
    %59 = vector.extract_strided_slice %1 {offsets = [4, 0], sizes = [1, 96], strides = [1, 1]} : vector<8x96xf32> to vector<1x96xf32>
    %60 = vector.broadcast %59 : vector<1x96xf32> to vector<12x96xf32>
    %61 = arith.addf %58, %60 : vector<12x96xf32>
    %c80 = arith.constant 80 : index
    %c0_13 = arith.constant 0 : index
    %62 = vector.load %arg1[%c80, %c0_13] : memref<336x96xbf16, #tpu.memory_space<vmem>>, vector<32x96xbf16>
    %c112 = arith.constant 112 : index
    %c0_14 = arith.constant 0 : index
    %63 = vector.load %arg1[%c112, %c0_14] : memref<336x96xbf16, #tpu.memory_space<vmem>>, vector<32x96xbf16>
    %c144 = arith.constant 144 : index
    %c0_15 = arith.constant 0 : index
    %64 = vector.load %arg1[%c144, %c0_15] : memref<336x96xbf16, #tpu.memory_space<vmem>>, vector<32x96xbf16>
    %65 = vector.extract_strided_slice %1 {offsets = [1, 0], sizes = [1, 96], strides = [1, 1]} : vector<8x96xf32> to vector<1x96xf32>
    %66 = vector.extract_strided_slice %1 {offsets = [2, 0], sizes = [1, 96], strides = [1, 1]} : vector<8x96xf32> to vector<1x96xf32>
    %67 = vector.extract_strided_slice %1 {offsets = [3, 0], sizes = [1, 96], strides = [1, 1]} : vector<8x96xf32> to vector<1x96xf32>
    %cst_16 = arith.constant 0.000000e+00 : f32
    %68 = vector.broadcast %cst_16 : f32 to vector<2x32xf32>
    %cst_17 = arith.constant 0.000000e+00 : f32
    %69 = vector.broadcast %cst_17 : f32 to vector<2x32xf32>
    %70 = vector.extract_strided_slice %56 {offsets = [0, 0], sizes = [2, 96], strides = [1, 1]} : vector<16x96xf32> to vector<2x96xf32>
    %71 = arith.truncf %68 : vector<2x32xf32> to vector<2x32xbf16>
    %cst_18 = arith.constant dense<0.000000e+00> : vector<2x96xf32>
    %72 = tpu.matmul %71, %62, %cst_18 {dimension_numbers = #tpu.dot_dimension_numbers<[1], [0], [0], [1], [0, 0, 1, 1], [], []>} : vector<2x32xbf16>, vector<32x96xbf16>, vector<2x96xf32> -> vector<2x96xf32>
    %73 = vector.broadcast %65 : vector<1x96xf32> to vector<2x96xf32>
    %74 = arith.addf %72, %73 : vector<2x96xf32>
    %75 = vector.extract_strided_slice %70 {offsets = [0, 0], sizes = [2, 32], strides = [1, 1]} : vector<2x96xf32> to vector<2x32xf32>
    %76 = vector.extract_strided_slice %74 {offsets = [0, 0], sizes = [2, 32], strides = [1, 1]} : vector<2x96xf32> to vector<2x32xf32>
    %77 = arith.addf %75, %76 : vector<2x32xf32>
    %78 = arith.negf %77 : vector<2x32xf32>
    %79 = math.exp %78 : vector<2x32xf32>
    %cst_19 = arith.constant 1.000000e+00 : f32
    %80 = vector.broadcast %cst_19 : f32 to vector<2x32xf32>
    %81 = arith.addf %80, %79 : vector<2x32xf32>
    %82 = arith.divf %80, %81 : vector<2x32xf32>
    %83 = vector.extract_strided_slice %70 {offsets = [0, 32], sizes = [2, 32], strides = [1, 1]} : vector<2x96xf32> to vector<2x32xf32>
    %84 = vector.extract_strided_slice %74 {offsets = [0, 32], sizes = [2, 32], strides = [1, 1]} : vector<2x96xf32> to vector<2x32xf32>
    %85 = arith.addf %83, %84 : vector<2x32xf32>
    %86 = arith.negf %85 : vector<2x32xf32>
    %87 = math.exp %86 : vector<2x32xf32>
    %cst_20 = arith.constant 1.000000e+00 : f32
    %88 = vector.broadcast %cst_20 : f32 to vector<2x32xf32>
    %89 = arith.addf %88, %87 : vector<2x32xf32>
    %90 = arith.divf %88, %89 : vector<2x32xf32>
    %91 = vector.extract_strided_slice %70 {offsets = [0, 64], sizes = [2, 32], strides = [1, 1]} : vector<2x96xf32> to vector<2x32xf32>
    %92 = vector.extract_strided_slice %74 {offsets = [0, 64], sizes = [2, 32], strides = [1, 1]} : vector<2x96xf32> to vector<2x32xf32>
    %93 = arith.mulf %82, %92 : vector<2x32xf32>
    %94 = arith.addf %91, %93 : vector<2x32xf32>
    %95 = math.tanh %94 : vector<2x32xf32>
    %cst_21 = arith.constant 1.000000e+00 : f32
    %96 = vector.broadcast %cst_21 : f32 to vector<2x32xf32>
    %97 = arith.subf %96, %90 : vector<2x32xf32>
    %98 = arith.mulf %97, %95 : vector<2x32xf32>
    %99 = arith.mulf %90, %68 : vector<2x32xf32>
    %100 = arith.addf %98, %99 : vector<2x32xf32>
    %101 = arith.truncf %100 : vector<2x32xf32> to vector<2x32xbf16>
    %cst_22 = arith.constant dense<0.000000e+00> : vector<2x96xf32>
    %102 = tpu.matmul %101, %63, %cst_22 {dimension_numbers = #tpu.dot_dimension_numbers<[1], [0], [0], [1], [0, 0, 1, 1], [], []>} : vector<2x32xbf16>, vector<32x96xbf16>, vector<2x96xf32> -> vector<2x96xf32>
    %103 = vector.broadcast %66 : vector<1x96xf32> to vector<2x96xf32>
    %104 = arith.addf %102, %103 : vector<2x96xf32>
    %105 = arith.truncf %69 : vector<2x32xf32> to vector<2x32xbf16>
    %cst_23 = arith.constant dense<0.000000e+00> : vector<2x96xf32>
    %106 = tpu.matmul %105, %64, %cst_23 {dimension_numbers = #tpu.dot_dimension_numbers<[1], [0], [0], [1], [0, 0, 1, 1], [], []>} : vector<2x32xbf16>, vector<32x96xbf16>, vector<2x96xf32> -> vector<2x96xf32>
    %107 = vector.broadcast %67 : vector<1x96xf32> to vector<2x96xf32>
    %108 = arith.addf %106, %107 : vector<2x96xf32>
    %109 = vector.extract_strided_slice %104 {offsets = [0, 0], sizes = [2, 32], strides = [1, 1]} : vector<2x96xf32> to vector<2x32xf32>
    %110 = vector.extract_strided_slice %108 {offsets = [0, 0], sizes = [2, 32], strides = [1, 1]} : vector<2x96xf32> to vector<2x32xf32>
    %111 = arith.addf %109, %110 : vector<2x32xf32>
    %112 = arith.negf %111 : vector<2x32xf32>
    %113 = math.exp %112 : vector<2x32xf32>
    %cst_24 = arith.constant 1.000000e+00 : f32
    %114 = vector.broadcast %cst_24 : f32 to vector<2x32xf32>
    %115 = arith.addf %114, %113 : vector<2x32xf32>
    %116 = arith.divf %114, %115 : vector<2x32xf32>
    %117 = vector.extract_strided_slice %104 {offsets = [0, 32], sizes = [2, 32], strides = [1, 1]} : vector<2x96xf32> to vector<2x32xf32>
    %118 = vector.extract_strided_slice %108 {offsets = [0, 32], sizes = [2, 32], strides = [1, 1]} : vector<2x96xf32> to vector<2x32xf32>
    %119 = arith.addf %117, %118 : vector<2x32xf32>
    %120 = arith.negf %119 : vector<2x32xf32>
    %121 = math.exp %120 : vector<2x32xf32>
    %cst_25 = arith.constant 1.000000e+00 : f32
    %122 = vector.broadcast %cst_25 : f32 to vector<2x32xf32>
    %123 = arith.addf %122, %121 : vector<2x32xf32>
    %124 = arith.divf %122, %123 : vector<2x32xf32>
    %125 = vector.extract_strided_slice %104 {offsets = [0, 64], sizes = [2, 32], strides = [1, 1]} : vector<2x96xf32> to vector<2x32xf32>
    %126 = vector.extract_strided_slice %108 {offsets = [0, 64], sizes = [2, 32], strides = [1, 1]} : vector<2x96xf32> to vector<2x32xf32>
    %127 = arith.mulf %116, %126 : vector<2x32xf32>
    %128 = arith.addf %125, %127 : vector<2x32xf32>
    %129 = math.tanh %128 : vector<2x32xf32>
    %cst_26 = arith.constant 1.000000e+00 : f32
    %130 = vector.broadcast %cst_26 : f32 to vector<2x32xf32>
    %131 = arith.subf %130, %124 : vector<2x32xf32>
    %132 = arith.mulf %131, %129 : vector<2x32xf32>
    %133 = arith.mulf %124, %69 : vector<2x32xf32>
    %134 = arith.addf %132, %133 : vector<2x32xf32>
    %c0_27 = arith.constant 0 : index
    %c0_28 = arith.constant 0 : index
    %135 = vector.load %arg4[%c0_27, %c0_28] : memref<16x32xf32, #tpu.memory_space<vmem>>, vector<2x32xf32>
    tpu.vector_store %arg4[%c0_27, %c0_28], %134 {strides = array<i32>} : memref<16x32xf32, #tpu.memory_space<vmem>>, vector<2x32xf32>,
    %136 = vector.extract_strided_slice %56 {offsets = [2, 0], sizes = [2, 96], strides = [1, 1]} : vector<16x96xf32> to vector<2x96xf32>
    %137 = arith.truncf %100 : vector<2x32xf32> to vector<2x32xbf16>
    %cst_29 = arith.constant dense<0.000000e+00> : vector<2x96xf32>
    %138 = tpu.matmul %137, %62, %cst_29 {dimension_numbers = #tpu.dot_dimension_numbers<[1], [0], [0], [1], [0, 0, 1, 1], [], []>} : vector<2x32xbf16>, vector<32x96xbf16>, vector<2x96xf32> -> vector<2x96xf32>
    %139 = vector.broadcast %65 : vector<1x96xf32> to vector<2x96xf32>
    %140 = arith.addf %138, %139 : vector<2x96xf32>
    %141 = vector.extract_strided_slice %136 {offsets = [0, 0], sizes = [2, 32], strides = [1, 1]} : vector<2x96xf32> to vector<2x32xf32>
    %142 = vector.extract_strided_slice %140 {offsets = [0, 0], sizes = [2, 32], strides = [1, 1]} : vector<2x96xf32> to vector<2x32xf32>
    %143 = arith.addf %141, %142 : vector<2x32xf32>
    %144 = arith.negf %143 : vector<2x32xf32>
    %145 = math.exp %144 : vector<2x32xf32>
    %cst_30 = arith.constant 1.000000e+00 : f32
    %146 = vector.broadcast %cst_30 : f32 to vector<2x32xf32>
    %147 = arith.addf %146, %145 : vector<2x32xf32>
    %148 = arith.divf %146, %147 : vector<2x32xf32>
    %149 = vector.extract_strided_slice %136 {offsets = [0, 32], sizes = [2, 32], strides = [1, 1]} : vector<2x96xf32> to vector<2x32xf32>
    %150 = vector.extract_strided_slice %140 {offsets = [0, 32], sizes = [2, 32], strides = [1, 1]} : vector<2x96xf32> to vector<2x32xf32>
    %151 = arith.addf %149, %150 : vector<2x32xf32>
    %152 = arith.negf %151 : vector<2x32xf32>
    %153 = math.exp %152 : vector<2x32xf32>
    %cst_31 = arith.constant 1.000000e+00 : f32
    %154 = vector.broadcast %cst_31 : f32 to vector<2x32xf32>
    %155 = arith.addf %154, %153 : vector<2x32xf32>
    %156 = arith.divf %154, %155 : vector<2x32xf32>
    %157 = vector.extract_strided_slice %136 {offsets = [0, 64], sizes = [2, 32], strides = [1, 1]} : vector<2x96xf32> to vector<2x32xf32>
    %158 = vector.extract_strided_slice %140 {offsets = [0, 64], sizes = [2, 32], strides = [1, 1]} : vector<2x96xf32> to vector<2x32xf32>
    %159 = arith.mulf %148, %158 : vector<2x32xf32>
    %160 = arith.addf %157, %159 : vector<2x32xf32>
    %161 = math.tanh %160 : vector<2x32xf32>
    %cst_32 = arith.constant 1.000000e+00 : f32
    %162 = vector.broadcast %cst_32 : f32 to vector<2x32xf32>
    %163 = arith.subf %162, %156 : vector<2x32xf32>
    %164 = arith.mulf %163, %161 : vector<2x32xf32>
    %165 = arith.mulf %156, %100 : vector<2x32xf32>
    %166 = arith.addf %164, %165 : vector<2x32xf32>
    %167 = arith.truncf %166 : vector<2x32xf32> to vector<2x32xbf16>
    %cst_33 = arith.constant dense<0.000000e+00> : vector<2x96xf32>
    %168 = tpu.matmul %167, %63, %cst_33 {dimension_numbers = #tpu.dot_dimension_numbers<[1], [0], [0], [1], [0, 0, 1, 1], [], []>} : vector<2x32xbf16>, vector<32x96xbf16>, vector<2x96xf32> -> vector<2x96xf32>
    %169 = vector.broadcast %66 : vector<1x96xf32> to vector<2x96xf32>
    %170 = arith.addf %168, %169 : vector<2x96xf32>
    %171 = arith.truncf %134 : vector<2x32xf32> to vector<2x32xbf16>
    %cst_34 = arith.constant dense<0.000000e+00> : vector<2x96xf32>
    %172 = tpu.matmul %171, %64, %cst_34 {dimension_numbers = #tpu.dot_dimension_numbers<[1], [0], [0], [1], [0, 0, 1, 1], [], []>} : vector<2x32xbf16>, vector<32x96xbf16>, vector<2x96xf32> -> vector<2x96xf32>
    %173 = vector.broadcast %67 : vector<1x96xf32> to vector<2x96xf32>
    %174 = arith.addf %172, %173 : vector<2x96xf32>
    %175 = vector.extract_strided_slice %170 {offsets = [0, 0], sizes = [2, 32], strides = [1, 1]} : vector<2x96xf32> to vector<2x32xf32>
    %176 = vector.extract_strided_slice %174 {offsets = [0, 0], sizes = [2, 32], strides = [1, 1]} : vector<2x96xf32> to vector<2x32xf32>
    %177 = arith.addf %175, %176 : vector<2x32xf32>
    %178 = arith.negf %177 : vector<2x32xf32>
    %179 = math.exp %178 : vector<2x32xf32>
    %cst_35 = arith.constant 1.000000e+00 : f32
    %180 = vector.broadcast %cst_35 : f32 to vector<2x32xf32>
    %181 = arith.addf %180, %179 : vector<2x32xf32>
    %182 = arith.divf %180, %181 : vector<2x32xf32>
    %183 = vector.extract_strided_slice %170 {offsets = [0, 32], sizes = [2, 32], strides = [1, 1]} : vector<2x96xf32> to vector<2x32xf32>
    %184 = vector.extract_strided_slice %174 {offsets = [0, 32], sizes = [2, 32], strides = [1, 1]} : vector<2x96xf32> to vector<2x32xf32>
    %185 = arith.addf %183, %184 : vector<2x32xf32>
    %186 = arith.negf %185 : vector<2x32xf32>
    %187 = math.exp %186 : vector<2x32xf32>
    %cst_36 = arith.constant 1.000000e+00 : f32
    %188 = vector.broadcast %cst_36 : f32 to vector<2x32xf32>
    %189 = arith.addf %188, %187 : vector<2x32xf32>
    %190 = arith.divf %188, %189 : vector<2x32xf32>
    %191 = vector.extract_strided_slice %170 {offsets = [0, 64], sizes = [2, 32], strides = [1, 1]} : vector<2x96xf32> to vector<2x32xf32>
    %192 = vector.extract_strided_slice %174 {offsets = [0, 64], sizes = [2, 32], strides = [1, 1]} : vector<2x96xf32> to vector<2x32xf32>
    %193 = arith.mulf %182, %192 : vector<2x32xf32>
    %194 = arith.addf %191, %193 : vector<2x32xf32>
    %195 = math.tanh %194 : vector<2x32xf32>
    %cst_37 = arith.constant 1.000000e+00 : f32
    %196 = vector.broadcast %cst_37 : f32 to vector<2x32xf32>
    %197 = arith.subf %196, %190 : vector<2x32xf32>
    %198 = arith.mulf %197, %195 : vector<2x32xf32>
    %199 = arith.mulf %190, %134 : vector<2x32xf32>
    %200 = arith.addf %198, %199 : vector<2x32xf32>
    %c2 = arith.constant 2 : index
    %c0_38 = arith.constant 0 : index
    %201 = vector.load %arg4[%c2, %c0_38] : memref<16x32xf32, #tpu.memory_space<vmem>>, vector<2x32xf32>
    tpu.vector_store %arg4[%c2, %c0_38], %200 {strides = array<i32>} : memref<16x32xf32, #tpu.memory_space<vmem>>, vector<2x32xf32>,
    %202 = vector.extract_strided_slice %56 {offsets = [4, 0], sizes = [2, 96], strides = [1, 1]} : vector<16x96xf32> to vector<2x96xf32>
    %203 = arith.truncf %166 : vector<2x32xf32> to vector<2x32xbf16>
    %cst_39 = arith.constant dense<0.000000e+00> : vector<2x96xf32>
    %204 = tpu.matmul %203, %62, %cst_39 {dimension_numbers = #tpu.dot_dimension_numbers<[1], [0], [0], [1], [0, 0, 1, 1], [], []>} : vector<2x32xbf16>, vector<32x96xbf16>, vector<2x96xf32> -> vector<2x96xf32>
    %205 = vector.broadcast %65 : vector<1x96xf32> to vector<2x96xf32>
    %206 = arith.addf %204, %205 : vector<2x96xf32>
    %207 = vector.extract_strided_slice %202 {offsets = [0, 0], sizes = [2, 32], strides = [1, 1]} : vector<2x96xf32> to vector<2x32xf32>
    %208 = vector.extract_strided_slice %206 {offsets = [0, 0], sizes = [2, 32], strides = [1, 1]} : vector<2x96xf32> to vector<2x32xf32>
    %209 = arith.addf %207, %208 : vector<2x32xf32>
    %210 = arith.negf %209 : vector<2x32xf32>
    %211 = math.exp %210 : vector<2x32xf32>
    %cst_40 = arith.constant 1.000000e+00 : f32
    %212 = vector.broadcast %cst_40 : f32 to vector<2x32xf32>
    %213 = arith.addf %212, %211 : vector<2x32xf32>
    %214 = arith.divf %212, %213 : vector<2x32xf32>
    %215 = vector.extract_strided_slice %202 {offsets = [0, 32], sizes = [2, 32], strides = [1, 1]} : vector<2x96xf32> to vector<2x32xf32>
    %216 = vector.extract_strided_slice %206 {offsets = [0, 32], sizes = [2, 32], strides = [1, 1]} : vector<2x96xf32> to vector<2x32xf32>
    %217 = arith.addf %215, %216 : vector<2x32xf32>
    %218 = arith.negf %217 : vector<2x32xf32>
    %219 = math.exp %218 : vector<2x32xf32>
    %cst_41 = arith.constant 1.000000e+00 : f32
    %220 = vector.broadcast %cst_41 : f32 to vector<2x32xf32>
    %221 = arith.addf %220, %219 : vector<2x32xf32>
    %222 = arith.divf %220, %221 : vector<2x32xf32>
    %223 = vector.extract_strided_slice %202 {offsets = [0, 64], sizes = [2, 32], strides = [1, 1]} : vector<2x96xf32> to vector<2x32xf32>
    %224 = vector.extract_strided_slice %206 {offsets = [0, 64], sizes = [2, 32], strides = [1, 1]} : vector<2x96xf32> to vector<2x32xf32>
    %225 = arith.mulf %214, %224 : vector<2x32xf32>
    %226 = arith.addf %223, %225 : vector<2x32xf32>
    %227 = math.tanh %226 : vector<2x32xf32>
    %cst_42 = arith.constant 1.000000e+00 : f32
    %228 = vector.broadcast %cst_42 : f32 to vector<2x32xf32>
    %229 = arith.subf %228, %222 : vector<2x32xf32>
    %230 = arith.mulf %229, %227 : vector<2x32xf32>
    %231 = arith.mulf %222, %166 : vector<2x32xf32>
    %232 = arith.addf %230, %231 : vector<2x32xf32>
    %233 = arith.truncf %232 : vector<2x32xf32> to vector<2x32xbf16>
    %cst_43 = arith.constant dense<0.000000e+00> : vector<2x96xf32>
    %234 = tpu.matmul %233, %63, %cst_43 {dimension_numbers = #tpu.dot_dimension_numbers<[1], [0], [0], [1], [0, 0, 1, 1], [], []>} : vector<2x32xbf16>, vector<32x96xbf16>, vector<2x96xf32> -> vector<2x96xf32>
    %235 = vector.broadcast %66 : vector<1x96xf32> to vector<2x96xf32>
    %236 = arith.addf %234, %235 : vector<2x96xf32>
    %237 = arith.truncf %200 : vector<2x32xf32> to vector<2x32xbf16>
    %cst_44 = arith.constant dense<0.000000e+00> : vector<2x96xf32>
    %238 = tpu.matmul %237, %64, %cst_44 {dimension_numbers = #tpu.dot_dimension_numbers<[1], [0], [0], [1], [0, 0, 1, 1], [], []>} : vector<2x32xbf16>, vector<32x96xbf16>, vector<2x96xf32> -> vector<2x96xf32>
    %239 = vector.broadcast %67 : vector<1x96xf32> to vector<2x96xf32>
    %240 = arith.addf %238, %239 : vector<2x96xf32>
    %241 = vector.extract_strided_slice %236 {offsets = [0, 0], sizes = [2, 32], strides = [1, 1]} : vector<2x96xf32> to vector<2x32xf32>
    %242 = vector.extract_strided_slice %240 {offsets = [0, 0], sizes = [2, 32], strides = [1, 1]} : vector<2x96xf32> to vector<2x32xf32>
    %243 = arith.addf %241, %242 : vector<2x32xf32>
    %244 = arith.negf %243 : vector<2x32xf32>
    %245 = math.exp %244 : vector<2x32xf32>
    %cst_45 = arith.constant 1.000000e+00 : f32
    %246 = vector.broadcast %cst_45 : f32 to vector<2x32xf32>
    %247 = arith.addf %246, %245 : vector<2x32xf32>
    %248 = arith.divf %246, %247 : vector<2x32xf32>
    %249 = vector.extract_strided_slice %236 {offsets = [0, 32], sizes = [2, 32], strides = [1, 1]} : vector<2x96xf32> to vector<2x32xf32>
    %250 = vector.extract_strided_slice %240 {offsets = [0, 32], sizes = [2, 32], strides = [1, 1]} : vector<2x96xf32> to vector<2x32xf32>
    %251 = arith.addf %249, %250 : vector<2x32xf32>
    %252 = arith.negf %251 : vector<2x32xf32>
    %253 = math.exp %252 : vector<2x32xf32>
    %cst_46 = arith.constant 1.000000e+00 : f32
    %254 = vector.broadcast %cst_46 : f32 to vector<2x32xf32>
    %255 = arith.addf %254, %253 : vector<2x32xf32>
    %256 = arith.divf %254, %255 : vector<2x32xf32>
    %257 = vector.extract_strided_slice %236 {offsets = [0, 64], sizes = [2, 32], strides = [1, 1]} : vector<2x96xf32> to vector<2x32xf32>
    %258 = vector.extract_strided_slice %240 {offsets = [0, 64], sizes = [2, 32], strides = [1, 1]} : vector<2x96xf32> to vector<2x32xf32>
    %259 = arith.mulf %248, %258 : vector<2x32xf32>
    %260 = arith.addf %257, %259 : vector<2x32xf32>
    %261 = math.tanh %260 : vector<2x32xf32>
    %cst_47 = arith.constant 1.000000e+00 : f32
    %262 = vector.broadcast %cst_47 : f32 to vector<2x32xf32>
    %263 = arith.subf %262, %256 : vector<2x32xf32>
    %264 = arith.mulf %263, %261 : vector<2x32xf32>
    %265 = arith.mulf %256, %200 : vector<2x32xf32>
    %266 = arith.addf %264, %265 : vector<2x32xf32>
    %c4 = arith.constant 4 : index
    %c0_48 = arith.constant 0 : index
    %267 = vector.load %arg4[%c4, %c0_48] : memref<16x32xf32, #tpu.memory_space<vmem>>, vector<2x32xf32>
    tpu.vector_store %arg4[%c4, %c0_48], %266 {strides = array<i32>} : memref<16x32xf32, #tpu.memory_space<vmem>>, vector<2x32xf32>,
    %268 = vector.extract_strided_slice %56 {offsets = [6, 0], sizes = [2, 96], strides = [1, 1]} : vector<16x96xf32> to vector<2x96xf32>
    %269 = arith.truncf %232 : vector<2x32xf32> to vector<2x32xbf16>
    %cst_49 = arith.constant dense<0.000000e+00> : vector<2x96xf32>
    %270 = tpu.matmul %269, %62, %cst_49 {dimension_numbers = #tpu.dot_dimension_numbers<[1], [0], [0], [1], [0, 0, 1, 1], [], []>} : vector<2x32xbf16>, vector<32x96xbf16>, vector<2x96xf32> -> vector<2x96xf32>
    %271 = vector.broadcast %65 : vector<1x96xf32> to vector<2x96xf32>
    %272 = arith.addf %270, %271 : vector<2x96xf32>
    %273 = vector.extract_strided_slice %268 {offsets = [0, 0], sizes = [2, 32], strides = [1, 1]} : vector<2x96xf32> to vector<2x32xf32>
    %274 = vector.extract_strided_slice %272 {offsets = [0, 0], sizes = [2, 32], strides = [1, 1]} : vector<2x96xf32> to vector<2x32xf32>
    %275 = arith.addf %273, %274 : vector<2x32xf32>
    %276 = arith.negf %275 : vector<2x32xf32>
    %277 = math.exp %276 : vector<2x32xf32>
    %cst_50 = arith.constant 1.000000e+00 : f32
    %278 = vector.broadcast %cst_50 : f32 to vector<2x32xf32>
    %279 = arith.addf %278, %277 : vector<2x32xf32>
    %280 = arith.divf %278, %279 : vector<2x32xf32>
    %281 = vector.extract_strided_slice %268 {offsets = [0, 32], sizes = [2, 32], strides = [1, 1]} : vector<2x96xf32> to vector<2x32xf32>
    %282 = vector.extract_strided_slice %272 {offsets = [0, 32], sizes = [2, 32], strides = [1, 1]} : vector<2x96xf32> to vector<2x32xf32>
    %283 = arith.addf %281, %282 : vector<2x32xf32>
    %284 = arith.negf %283 : vector<2x32xf32>
    %285 = math.exp %284 : vector<2x32xf32>
    %cst_51 = arith.constant 1.000000e+00 : f32
    %286 = vector.broadcast %cst_51 : f32 to vector<2x32xf32>
    %287 = arith.addf %286, %285 : vector<2x32xf32>
    %288 = arith.divf %286, %287 : vector<2x32xf32>
    %289 = vector.extract_strided_slice %268 {offsets = [0, 64], sizes = [2, 32], strides = [1, 1]} : vector<2x96xf32> to vector<2x32xf32>
    %290 = vector.extract_strided_slice %272 {offsets = [0, 64], sizes = [2, 32], strides = [1, 1]} : vector<2x96xf32> to vector<2x32xf32>
    %291 = arith.mulf %280, %290 : vector<2x32xf32>
    %292 = arith.addf %289, %291 : vector<2x32xf32>
    %293 = math.tanh %292 : vector<2x32xf32>
    %cst_52 = arith.constant 1.000000e+00 : f32
    %294 = vector.broadcast %cst_52 : f32 to vector<2x32xf32>
    %295 = arith.subf %294, %288 : vector<2x32xf32>
    %296 = arith.mulf %295, %293 : vector<2x32xf32>
    %297 = arith.mulf %288, %232 : vector<2x32xf32>
    %298 = arith.addf %296, %297 : vector<2x32xf32>
    %299 = arith.truncf %298 : vector<2x32xf32> to vector<2x32xbf16>
    %cst_53 = arith.constant dense<0.000000e+00> : vector<2x96xf32>
    %300 = tpu.matmul %299, %63, %cst_53 {dimension_numbers = #tpu.dot_dimension_numbers<[1], [0], [0], [1], [0, 0, 1, 1], [], []>} : vector<2x32xbf16>, vector<32x96xbf16>, vector<2x96xf32> -> vector<2x96xf32>
    %301 = vector.broadcast %66 : vector<1x96xf32> to vector<2x96xf32>
    %302 = arith.addf %300, %301 : vector<2x96xf32>
    %303 = arith.truncf %266 : vector<2x32xf32> to vector<2x32xbf16>
    %cst_54 = arith.constant dense<0.000000e+00> : vector<2x96xf32>
    %304 = tpu.matmul %303, %64, %cst_54 {dimension_numbers = #tpu.dot_dimension_numbers<[1], [0], [0], [1], [0, 0, 1, 1], [], []>} : vector<2x32xbf16>, vector<32x96xbf16>, vector<2x96xf32> -> vector<2x96xf32>
    %305 = vector.broadcast %67 : vector<1x96xf32> to vector<2x96xf32>
    %306 = arith.addf %304, %305 : vector<2x96xf32>
    %307 = vector.extract_strided_slice %302 {offsets = [0, 0], sizes = [2, 32], strides = [1, 1]} : vector<2x96xf32> to vector<2x32xf32>
    %308 = vector.extract_strided_slice %306 {offsets = [0, 0], sizes = [2, 32], strides = [1, 1]} : vector<2x96xf32> to vector<2x32xf32>
    %309 = arith.addf %307, %308 : vector<2x32xf32>
    %310 = arith.negf %309 : vector<2x32xf32>
    %311 = math.exp %310 : vector<2x32xf32>
    %cst_55 = arith.constant 1.000000e+00 : f32
    %312 = vector.broadcast %cst_55 : f32 to vector<2x32xf32>
    %313 = arith.addf %312, %311 : vector<2x32xf32>
    %314 = arith.divf %312, %313 : vector<2x32xf32>
    %315 = vector.extract_strided_slice %302 {offsets = [0, 32], sizes = [2, 32], strides = [1, 1]} : vector<2x96xf32> to vector<2x32xf32>
    %316 = vector.extract_strided_slice %306 {offsets = [0, 32], sizes = [2, 32], strides = [1, 1]} : vector<2x96xf32> to vector<2x32xf32>
    %317 = arith.addf %315, %316 : vector<2x32xf32>
    %318 = arith.negf %317 : vector<2x32xf32>
    %319 = math.exp %318 : vector<2x32xf32>
    %cst_56 = arith.constant 1.000000e+00 : f32
    %320 = vector.broadcast %cst_56 : f32 to vector<2x32xf32>
    %321 = arith.addf %320, %319 : vector<2x32xf32>
    %322 = arith.divf %320, %321 : vector<2x32xf32>
    %323 = vector.extract_strided_slice %302 {offsets = [0, 64], sizes = [2, 32], strides = [1, 1]} : vector<2x96xf32> to vector<2x32xf32>
    %324 = vector.extract_strided_slice %306 {offsets = [0, 64], sizes = [2, 32], strides = [1, 1]} : vector<2x96xf32> to vector<2x32xf32>
    %325 = arith.mulf %314, %324 : vector<2x32xf32>
    %326 = arith.addf %323, %325 : vector<2x32xf32>
    %327 = math.tanh %326 : vector<2x32xf32>
    %cst_57 = arith.constant 1.000000e+00 : f32
    %328 = vector.broadcast %cst_57 : f32 to vector<2x32xf32>
    %329 = arith.subf %328, %322 : vector<2x32xf32>
    %330 = arith.mulf %329, %327 : vector<2x32xf32>
    %331 = arith.mulf %322, %266 : vector<2x32xf32>
    %332 = arith.addf %330, %331 : vector<2x32xf32>
    %c6 = arith.constant 6 : index
    %c0_58 = arith.constant 0 : index
    %333 = vector.load %arg4[%c6, %c0_58] : memref<16x32xf32, #tpu.memory_space<vmem>>, vector<2x32xf32>
    tpu.vector_store %arg4[%c6, %c0_58], %332 {strides = array<i32>} : memref<16x32xf32, #tpu.memory_space<vmem>>, vector<2x32xf32>,
    %334 = vector.extract_strided_slice %56 {offsets = [8, 0], sizes = [2, 96], strides = [1, 1]} : vector<16x96xf32> to vector<2x96xf32>
    %335 = arith.truncf %298 : vector<2x32xf32> to vector<2x32xbf16>
    %cst_59 = arith.constant dense<0.000000e+00> : vector<2x96xf32>
    %336 = tpu.matmul %335, %62, %cst_59 {dimension_numbers = #tpu.dot_dimension_numbers<[1], [0], [0], [1], [0, 0, 1, 1], [], []>} : vector<2x32xbf16>, vector<32x96xbf16>, vector<2x96xf32> -> vector<2x96xf32>
    %337 = vector.broadcast %65 : vector<1x96xf32> to vector<2x96xf32>
    %338 = arith.addf %336, %337 : vector<2x96xf32>
    %339 = vector.extract_strided_slice %334 {offsets = [0, 0], sizes = [2, 32], strides = [1, 1]} : vector<2x96xf32> to vector<2x32xf32>
    %340 = vector.extract_strided_slice %338 {offsets = [0, 0], sizes = [2, 32], strides = [1, 1]} : vector<2x96xf32> to vector<2x32xf32>
    %341 = arith.addf %339, %340 : vector<2x32xf32>
    %342 = arith.negf %341 : vector<2x32xf32>
    %343 = math.exp %342 : vector<2x32xf32>
    %cst_60 = arith.constant 1.000000e+00 : f32
    %344 = vector.broadcast %cst_60 : f32 to vector<2x32xf32>
    %345 = arith.addf %344, %343 : vector<2x32xf32>
    %346 = arith.divf %344, %345 : vector<2x32xf32>
    %347 = vector.extract_strided_slice %334 {offsets = [0, 32], sizes = [2, 32], strides = [1, 1]} : vector<2x96xf32> to vector<2x32xf32>
    %348 = vector.extract_strided_slice %338 {offsets = [0, 32], sizes = [2, 32], strides = [1, 1]} : vector<2x96xf32> to vector<2x32xf32>
    %349 = arith.addf %347, %348 : vector<2x32xf32>
    %350 = arith.negf %349 : vector<2x32xf32>
    %351 = math.exp %350 : vector<2x32xf32>
    %cst_61 = arith.constant 1.000000e+00 : f32
    %352 = vector.broadcast %cst_61 : f32 to vector<2x32xf32>
    %353 = arith.addf %352, %351 : vector<2x32xf32>
    %354 = arith.divf %352, %353 : vector<2x32xf32>
    %355 = vector.extract_strided_slice %334 {offsets = [0, 64], sizes = [2, 32], strides = [1, 1]} : vector<2x96xf32> to vector<2x32xf32>
    %356 = vector.extract_strided_slice %338 {offsets = [0, 64], sizes = [2, 32], strides = [1, 1]} : vector<2x96xf32> to vector<2x32xf32>
    %357 = arith.mulf %346, %356 : vector<2x32xf32>
    %358 = arith.addf %355, %357 : vector<2x32xf32>
    %359 = math.tanh %358 : vector<2x32xf32>
    %cst_62 = arith.constant 1.000000e+00 : f32
    %360 = vector.broadcast %cst_62 : f32 to vector<2x32xf32>
    %361 = arith.subf %360, %354 : vector<2x32xf32>
    %362 = arith.mulf %361, %359 : vector<2x32xf32>
    %363 = arith.mulf %354, %298 : vector<2x32xf32>
    %364 = arith.addf %362, %363 : vector<2x32xf32>
    %365 = arith.truncf %364 : vector<2x32xf32> to vector<2x32xbf16>
    %cst_63 = arith.constant dense<0.000000e+00> : vector<2x96xf32>
    %366 = tpu.matmul %365, %63, %cst_63 {dimension_numbers = #tpu.dot_dimension_numbers<[1], [0], [0], [1], [0, 0, 1, 1], [], []>} : vector<2x32xbf16>, vector<32x96xbf16>, vector<2x96xf32> -> vector<2x96xf32>
    %367 = vector.broadcast %66 : vector<1x96xf32> to vector<2x96xf32>
    %368 = arith.addf %366, %367 : vector<2x96xf32>
    %369 = arith.truncf %332 : vector<2x32xf32> to vector<2x32xbf16>
    %cst_64 = arith.constant dense<0.000000e+00> : vector<2x96xf32>
    %370 = tpu.matmul %369, %64, %cst_64 {dimension_numbers = #tpu.dot_dimension_numbers<[1], [0], [0], [1], [0, 0, 1, 1], [], []>} : vector<2x32xbf16>, vector<32x96xbf16>, vector<2x96xf32> -> vector<2x96xf32>
    %371 = vector.broadcast %67 : vector<1x96xf32> to vector<2x96xf32>
    %372 = arith.addf %370, %371 : vector<2x96xf32>
    %373 = vector.extract_strided_slice %368 {offsets = [0, 0], sizes = [2, 32], strides = [1, 1]} : vector<2x96xf32> to vector<2x32xf32>
    %374 = vector.extract_strided_slice %372 {offsets = [0, 0], sizes = [2, 32], strides = [1, 1]} : vector<2x96xf32> to vector<2x32xf32>
    %375 = arith.addf %373, %374 : vector<2x32xf32>
    %376 = arith.negf %375 : vector<2x32xf32>
    %377 = math.exp %376 : vector<2x32xf32>
    %cst_65 = arith.constant 1.000000e+00 : f32
    %378 = vector.broadcast %cst_65 : f32 to vector<2x32xf32>
    %379 = arith.addf %378, %377 : vector<2x32xf32>
    %380 = arith.divf %378, %379 : vector<2x32xf32>
    %381 = vector.extract_strided_slice %368 {offsets = [0, 32], sizes = [2, 32], strides = [1, 1]} : vector<2x96xf32> to vector<2x32xf32>
    %382 = vector.extract_strided_slice %372 {offsets = [0, 32], sizes = [2, 32], strides = [1, 1]} : vector<2x96xf32> to vector<2x32xf32>
    %383 = arith.addf %381, %382 : vector<2x32xf32>
    %384 = arith.negf %383 : vector<2x32xf32>
    %385 = math.exp %384 : vector<2x32xf32>
    %cst_66 = arith.constant 1.000000e+00 : f32
    %386 = vector.broadcast %cst_66 : f32 to vector<2x32xf32>
    %387 = arith.addf %386, %385 : vector<2x32xf32>
    %388 = arith.divf %386, %387 : vector<2x32xf32>
    %389 = vector.extract_strided_slice %368 {offsets = [0, 64], sizes = [2, 32], strides = [1, 1]} : vector<2x96xf32> to vector<2x32xf32>
    %390 = vector.extract_strided_slice %372 {offsets = [0, 64], sizes = [2, 32], strides = [1, 1]} : vector<2x96xf32> to vector<2x32xf32>
    %391 = arith.mulf %380, %390 : vector<2x32xf32>
    %392 = arith.addf %389, %391 : vector<2x32xf32>
    %393 = math.tanh %392 : vector<2x32xf32>
    %cst_67 = arith.constant 1.000000e+00 : f32
    %394 = vector.broadcast %cst_67 : f32 to vector<2x32xf32>
    %395 = arith.subf %394, %388 : vector<2x32xf32>
    %396 = arith.mulf %395, %393 : vector<2x32xf32>
    %397 = arith.mulf %388, %332 : vector<2x32xf32>
    %398 = arith.addf %396, %397 : vector<2x32xf32>
    %c8 = arith.constant 8 : index
    %c0_68 = arith.constant 0 : index
    %399 = vector.load %arg4[%c8, %c0_68] : memref<16x32xf32, #tpu.memory_space<vmem>>, vector<2x32xf32>
    tpu.vector_store %arg4[%c8, %c0_68], %398 {strides = array<i32>} : memref<16x32xf32, #tpu.memory_space<vmem>>, vector<2x32xf32>,
    %400 = vector.extract_strided_slice %56 {offsets = [10, 0], sizes = [2, 96], strides = [1, 1]} : vector<16x96xf32> to vector<2x96xf32>
    %401 = arith.truncf %364 : vector<2x32xf32> to vector<2x32xbf16>
    %cst_69 = arith.constant dense<0.000000e+00> : vector<2x96xf32>
    %402 = tpu.matmul %401, %62, %cst_69 {dimension_numbers = #tpu.dot_dimension_numbers<[1], [0], [0], [1], [0, 0, 1, 1], [], []>} : vector<2x32xbf16>, vector<32x96xbf16>, vector<2x96xf32> -> vector<2x96xf32>
    %403 = vector.broadcast %65 : vector<1x96xf32> to vector<2x96xf32>
    %404 = arith.addf %402, %403 : vector<2x96xf32>
    %405 = vector.extract_strided_slice %400 {offsets = [0, 0], sizes = [2, 32], strides = [1, 1]} : vector<2x96xf32> to vector<2x32xf32>
    %406 = vector.extract_strided_slice %404 {offsets = [0, 0], sizes = [2, 32], strides = [1, 1]} : vector<2x96xf32> to vector<2x32xf32>
    %407 = arith.addf %405, %406 : vector<2x32xf32>
    %408 = arith.negf %407 : vector<2x32xf32>
    %409 = math.exp %408 : vector<2x32xf32>
    %cst_70 = arith.constant 1.000000e+00 : f32
    %410 = vector.broadcast %cst_70 : f32 to vector<2x32xf32>
    %411 = arith.addf %410, %409 : vector<2x32xf32>
    %412 = arith.divf %410, %411 : vector<2x32xf32>
    %413 = vector.extract_strided_slice %400 {offsets = [0, 32], sizes = [2, 32], strides = [1, 1]} : vector<2x96xf32> to vector<2x32xf32>
    %414 = vector.extract_strided_slice %404 {offsets = [0, 32], sizes = [2, 32], strides = [1, 1]} : vector<2x96xf32> to vector<2x32xf32>
    %415 = arith.addf %413, %414 : vector<2x32xf32>
    %416 = arith.negf %415 : vector<2x32xf32>
    %417 = math.exp %416 : vector<2x32xf32>
    %cst_71 = arith.constant 1.000000e+00 : f32
    %418 = vector.broadcast %cst_71 : f32 to vector<2x32xf32>
    %419 = arith.addf %418, %417 : vector<2x32xf32>
    %420 = arith.divf %418, %419 : vector<2x32xf32>
    %421 = vector.extract_strided_slice %400 {offsets = [0, 64], sizes = [2, 32], strides = [1, 1]} : vector<2x96xf32> to vector<2x32xf32>
    %422 = vector.extract_strided_slice %404 {offsets = [0, 64], sizes = [2, 32], strides = [1, 1]} : vector<2x96xf32> to vector<2x32xf32>
    %423 = arith.mulf %412, %422 : vector<2x32xf32>
    %424 = arith.addf %421, %423 : vector<2x32xf32>
    %425 = math.tanh %424 : vector<2x32xf32>
    %cst_72 = arith.constant 1.000000e+00 : f32
    %426 = vector.broadcast %cst_72 : f32 to vector<2x32xf32>
    %427 = arith.subf %426, %420 : vector<2x32xf32>
    %428 = arith.mulf %427, %425 : vector<2x32xf32>
    %429 = arith.mulf %420, %364 : vector<2x32xf32>
    %430 = arith.addf %428, %429 : vector<2x32xf32>
    %431 = arith.truncf %430 : vector<2x32xf32> to vector<2x32xbf16>
    %cst_73 = arith.constant dense<0.000000e+00> : vector<2x96xf32>
    %432 = tpu.matmul %431, %63, %cst_73 {dimension_numbers = #tpu.dot_dimension_numbers<[1], [0], [0], [1], [0, 0, 1, 1], [], []>} : vector<2x32xbf16>, vector<32x96xbf16>, vector<2x96xf32> -> vector<2x96xf32>
    %433 = vector.broadcast %66 : vector<1x96xf32> to vector<2x96xf32>
    %434 = arith.addf %432, %433 : vector<2x96xf32>
    %435 = arith.truncf %398 : vector<2x32xf32> to vector<2x32xbf16>
    %cst_74 = arith.constant dense<0.000000e+00> : vector<2x96xf32>
    %436 = tpu.matmul %435, %64, %cst_74 {dimension_numbers = #tpu.dot_dimension_numbers<[1], [0], [0], [1], [0, 0, 1, 1], [], []>} : vector<2x32xbf16>, vector<32x96xbf16>, vector<2x96xf32> -> vector<2x96xf32>
    %437 = vector.broadcast %67 : vector<1x96xf32> to vector<2x96xf32>
    %438 = arith.addf %436, %437 : vector<2x96xf32>
    %439 = vector.extract_strided_slice %434 {offsets = [0, 0], sizes = [2, 32], strides = [1, 1]} : vector<2x96xf32> to vector<2x32xf32>
    %440 = vector.extract_strided_slice %438 {offsets = [0, 0], sizes = [2, 32], strides = [1, 1]} : vector<2x96xf32> to vector<2x32xf32>
    %441 = arith.addf %439, %440 : vector<2x32xf32>
    %442 = arith.negf %441 : vector<2x32xf32>
    %443 = math.exp %442 : vector<2x32xf32>
    %cst_75 = arith.constant 1.000000e+00 : f32
    %444 = vector.broadcast %cst_75 : f32 to vector<2x32xf32>
    %445 = arith.addf %444, %443 : vector<2x32xf32>
    %446 = arith.divf %444, %445 : vector<2x32xf32>
    %447 = vector.extract_strided_slice %434 {offsets = [0, 32], sizes = [2, 32], strides = [1, 1]} : vector<2x96xf32> to vector<2x32xf32>
    %448 = vector.extract_strided_slice %438 {offsets = [0, 32], sizes = [2, 32], strides = [1, 1]} : vector<2x96xf32> to vector<2x32xf32>
    %449 = arith.addf %447, %448 : vector<2x32xf32>
    %450 = arith.negf %449 : vector<2x32xf32>
    %451 = math.exp %450 : vector<2x32xf32>
    %cst_76 = arith.constant 1.000000e+00 : f32
    %452 = vector.broadcast %cst_76 : f32 to vector<2x32xf32>
    %453 = arith.addf %452, %451 : vector<2x32xf32>
    %454 = arith.divf %452, %453 : vector<2x32xf32>
    %455 = vector.extract_strided_slice %434 {offsets = [0, 64], sizes = [2, 32], strides = [1, 1]} : vector<2x96xf32> to vector<2x32xf32>
    %456 = vector.extract_strided_slice %438 {offsets = [0, 64], sizes = [2, 32], strides = [1, 1]} : vector<2x96xf32> to vector<2x32xf32>
    %457 = arith.mulf %446, %456 : vector<2x32xf32>
    %458 = arith.addf %455, %457 : vector<2x32xf32>
    %459 = math.tanh %458 : vector<2x32xf32>
    %cst_77 = arith.constant 1.000000e+00 : f32
    %460 = vector.broadcast %cst_77 : f32 to vector<2x32xf32>
    %461 = arith.subf %460, %454 : vector<2x32xf32>
    %462 = arith.mulf %461, %459 : vector<2x32xf32>
    %463 = arith.mulf %454, %398 : vector<2x32xf32>
    %464 = arith.addf %462, %463 : vector<2x32xf32>
    %c10 = arith.constant 10 : index
    %c0_78 = arith.constant 0 : index
    %465 = vector.load %arg4[%c10, %c0_78] : memref<16x32xf32, #tpu.memory_space<vmem>>, vector<2x32xf32>
    tpu.vector_store %arg4[%c10, %c0_78], %464 {strides = array<i32>} : memref<16x32xf32, #tpu.memory_space<vmem>>, vector<2x32xf32>,
    %466 = vector.extract_strided_slice %56 {offsets = [12, 0], sizes = [2, 96], strides = [1, 1]} : vector<16x96xf32> to vector<2x96xf32>
    %467 = arith.truncf %430 : vector<2x32xf32> to vector<2x32xbf16>
    %cst_79 = arith.constant dense<0.000000e+00> : vector<2x96xf32>
    %468 = tpu.matmul %467, %62, %cst_79 {dimension_numbers = #tpu.dot_dimension_numbers<[1], [0], [0], [1], [0, 0, 1, 1], [], []>} : vector<2x32xbf16>, vector<32x96xbf16>, vector<2x96xf32> -> vector<2x96xf32>
    %469 = vector.broadcast %65 : vector<1x96xf32> to vector<2x96xf32>
    %470 = arith.addf %468, %469 : vector<2x96xf32>
    %471 = vector.extract_strided_slice %466 {offsets = [0, 0], sizes = [2, 32], strides = [1, 1]} : vector<2x96xf32> to vector<2x32xf32>
    %472 = vector.extract_strided_slice %470 {offsets = [0, 0], sizes = [2, 32], strides = [1, 1]} : vector<2x96xf32> to vector<2x32xf32>
    %473 = arith.addf %471, %472 : vector<2x32xf32>
    %474 = arith.negf %473 : vector<2x32xf32>
    %475 = math.exp %474 : vector<2x32xf32>
    %cst_80 = arith.constant 1.000000e+00 : f32
    %476 = vector.broadcast %cst_80 : f32 to vector<2x32xf32>
    %477 = arith.addf %476, %475 : vector<2x32xf32>
    %478 = arith.divf %476, %477 : vector<2x32xf32>
    %479 = vector.extract_strided_slice %466 {offsets = [0, 32], sizes = [2, 32], strides = [1, 1]} : vector<2x96xf32> to vector<2x32xf32>
    %480 = vector.extract_strided_slice %470 {offsets = [0, 32], sizes = [2, 32], strides = [1, 1]} : vector<2x96xf32> to vector<2x32xf32>
    %481 = arith.addf %479, %480 : vector<2x32xf32>
    %482 = arith.negf %481 : vector<2x32xf32>
    %483 = math.exp %482 : vector<2x32xf32>
    %cst_81 = arith.constant 1.000000e+00 : f32
    %484 = vector.broadcast %cst_81 : f32 to vector<2x32xf32>
    %485 = arith.addf %484, %483 : vector<2x32xf32>
    %486 = arith.divf %484, %485 : vector<2x32xf32>
    %487 = vector.extract_strided_slice %466 {offsets = [0, 64], sizes = [2, 32], strides = [1, 1]} : vector<2x96xf32> to vector<2x32xf32>
    %488 = vector.extract_strided_slice %470 {offsets = [0, 64], sizes = [2, 32], strides = [1, 1]} : vector<2x96xf32> to vector<2x32xf32>
    %489 = arith.mulf %478, %488 : vector<2x32xf32>
    %490 = arith.addf %487, %489 : vector<2x32xf32>
    %491 = math.tanh %490 : vector<2x32xf32>
    %cst_82 = arith.constant 1.000000e+00 : f32
    %492 = vector.broadcast %cst_82 : f32 to vector<2x32xf32>
    %493 = arith.subf %492, %486 : vector<2x32xf32>
    %494 = arith.mulf %493, %491 : vector<2x32xf32>
    %495 = arith.mulf %486, %430 : vector<2x32xf32>
    %496 = arith.addf %494, %495 : vector<2x32xf32>
    %497 = arith.truncf %496 : vector<2x32xf32> to vector<2x32xbf16>
    %cst_83 = arith.constant dense<0.000000e+00> : vector<2x96xf32>
    %498 = tpu.matmul %497, %63, %cst_83 {dimension_numbers = #tpu.dot_dimension_numbers<[1], [0], [0], [1], [0, 0, 1, 1], [], []>} : vector<2x32xbf16>, vector<32x96xbf16>, vector<2x96xf32> -> vector<2x96xf32>
    %499 = vector.broadcast %66 : vector<1x96xf32> to vector<2x96xf32>
    %500 = arith.addf %498, %499 : vector<2x96xf32>
    %501 = arith.truncf %464 : vector<2x32xf32> to vector<2x32xbf16>
    %cst_84 = arith.constant dense<0.000000e+00> : vector<2x96xf32>
    %502 = tpu.matmul %501, %64, %cst_84 {dimension_numbers = #tpu.dot_dimension_numbers<[1], [0], [0], [1], [0, 0, 1, 1], [], []>} : vector<2x32xbf16>, vector<32x96xbf16>, vector<2x96xf32> -> vector<2x96xf32>
    %503 = vector.broadcast %67 : vector<1x96xf32> to vector<2x96xf32>
    %504 = arith.addf %502, %503 : vector<2x96xf32>
    %505 = vector.extract_strided_slice %500 {offsets = [0, 0], sizes = [2, 32], strides = [1, 1]} : vector<2x96xf32> to vector<2x32xf32>
    %506 = vector.extract_strided_slice %504 {offsets = [0, 0], sizes = [2, 32], strides = [1, 1]} : vector<2x96xf32> to vector<2x32xf32>
    %507 = arith.addf %505, %506 : vector<2x32xf32>
    %508 = arith.negf %507 : vector<2x32xf32>
    %509 = math.exp %508 : vector<2x32xf32>
    %cst_85 = arith.constant 1.000000e+00 : f32
    %510 = vector.broadcast %cst_85 : f32 to vector<2x32xf32>
    %511 = arith.addf %510, %509 : vector<2x32xf32>
    %512 = arith.divf %510, %511 : vector<2x32xf32>
    %513 = vector.extract_strided_slice %500 {offsets = [0, 32], sizes = [2, 32], strides = [1, 1]} : vector<2x96xf32> to vector<2x32xf32>
    %514 = vector.extract_strided_slice %504 {offsets = [0, 32], sizes = [2, 32], strides = [1, 1]} : vector<2x96xf32> to vector<2x32xf32>
    %515 = arith.addf %513, %514 : vector<2x32xf32>
    %516 = arith.negf %515 : vector<2x32xf32>
    %517 = math.exp %516 : vector<2x32xf32>
    %cst_86 = arith.constant 1.000000e+00 : f32
    %518 = vector.broadcast %cst_86 : f32 to vector<2x32xf32>
    %519 = arith.addf %518, %517 : vector<2x32xf32>
    %520 = arith.divf %518, %519 : vector<2x32xf32>
    %521 = vector.extract_strided_slice %500 {offsets = [0, 64], sizes = [2, 32], strides = [1, 1]} : vector<2x96xf32> to vector<2x32xf32>
    %522 = vector.extract_strided_slice %504 {offsets = [0, 64], sizes = [2, 32], strides = [1, 1]} : vector<2x96xf32> to vector<2x32xf32>
    %523 = arith.mulf %512, %522 : vector<2x32xf32>
    %524 = arith.addf %521, %523 : vector<2x32xf32>
    %525 = math.tanh %524 : vector<2x32xf32>
    %cst_87 = arith.constant 1.000000e+00 : f32
    %526 = vector.broadcast %cst_87 : f32 to vector<2x32xf32>
    %527 = arith.subf %526, %520 : vector<2x32xf32>
    %528 = arith.mulf %527, %525 : vector<2x32xf32>
    %529 = arith.mulf %520, %464 : vector<2x32xf32>
    %530 = arith.addf %528, %529 : vector<2x32xf32>
    %c12 = arith.constant 12 : index
    %c0_88 = arith.constant 0 : index
    %531 = vector.load %arg4[%c12, %c0_88] : memref<16x32xf32, #tpu.memory_space<vmem>>, vector<2x32xf32>
    tpu.vector_store %arg4[%c12, %c0_88], %530 {strides = array<i32>} : memref<16x32xf32, #tpu.memory_space<vmem>>, vector<2x32xf32>,
    %532 = vector.extract_strided_slice %56 {offsets = [14, 0], sizes = [2, 96], strides = [1, 1]} : vector<16x96xf32> to vector<2x96xf32>
    %533 = arith.truncf %496 : vector<2x32xf32> to vector<2x32xbf16>
    %cst_89 = arith.constant dense<0.000000e+00> : vector<2x96xf32>
    %534 = tpu.matmul %533, %62, %cst_89 {dimension_numbers = #tpu.dot_dimension_numbers<[1], [0], [0], [1], [0, 0, 1, 1], [], []>} : vector<2x32xbf16>, vector<32x96xbf16>, vector<2x96xf32> -> vector<2x96xf32>
    %535 = vector.broadcast %65 : vector<1x96xf32> to vector<2x96xf32>
    %536 = arith.addf %534, %535 : vector<2x96xf32>
    %537 = vector.extract_strided_slice %532 {offsets = [0, 0], sizes = [2, 32], strides = [1, 1]} : vector<2x96xf32> to vector<2x32xf32>
    %538 = vector.extract_strided_slice %536 {offsets = [0, 0], sizes = [2, 32], strides = [1, 1]} : vector<2x96xf32> to vector<2x32xf32>
    %539 = arith.addf %537, %538 : vector<2x32xf32>
    %540 = arith.negf %539 : vector<2x32xf32>
    %541 = math.exp %540 : vector<2x32xf32>
    %cst_90 = arith.constant 1.000000e+00 : f32
    %542 = vector.broadcast %cst_90 : f32 to vector<2x32xf32>
    %543 = arith.addf %542, %541 : vector<2x32xf32>
    %544 = arith.divf %542, %543 : vector<2x32xf32>
    %545 = vector.extract_strided_slice %532 {offsets = [0, 32], sizes = [2, 32], strides = [1, 1]} : vector<2x96xf32> to vector<2x32xf32>
    %546 = vector.extract_strided_slice %536 {offsets = [0, 32], sizes = [2, 32], strides = [1, 1]} : vector<2x96xf32> to vector<2x32xf32>
    %547 = arith.addf %545, %546 : vector<2x32xf32>
    %548 = arith.negf %547 : vector<2x32xf32>
    %549 = math.exp %548 : vector<2x32xf32>
    %cst_91 = arith.constant 1.000000e+00 : f32
    %550 = vector.broadcast %cst_91 : f32 to vector<2x32xf32>
    %551 = arith.addf %550, %549 : vector<2x32xf32>
    %552 = arith.divf %550, %551 : vector<2x32xf32>
    %553 = vector.extract_strided_slice %532 {offsets = [0, 64], sizes = [2, 32], strides = [1, 1]} : vector<2x96xf32> to vector<2x32xf32>
    %554 = vector.extract_strided_slice %536 {offsets = [0, 64], sizes = [2, 32], strides = [1, 1]} : vector<2x96xf32> to vector<2x32xf32>
    %555 = arith.mulf %544, %554 : vector<2x32xf32>
    %556 = arith.addf %553, %555 : vector<2x32xf32>
    %557 = math.tanh %556 : vector<2x32xf32>
    %cst_92 = arith.constant 1.000000e+00 : f32
    %558 = vector.broadcast %cst_92 : f32 to vector<2x32xf32>
    %559 = arith.subf %558, %552 : vector<2x32xf32>
    %560 = arith.mulf %559, %557 : vector<2x32xf32>
    %561 = arith.mulf %552, %496 : vector<2x32xf32>
    %562 = arith.addf %560, %561 : vector<2x32xf32>
    %563 = arith.truncf %562 : vector<2x32xf32> to vector<2x32xbf16>
    %cst_93 = arith.constant dense<0.000000e+00> : vector<2x96xf32>
    %564 = tpu.matmul %563, %63, %cst_93 {dimension_numbers = #tpu.dot_dimension_numbers<[1], [0], [0], [1], [0, 0, 1, 1], [], []>} : vector<2x32xbf16>, vector<32x96xbf16>, vector<2x96xf32> -> vector<2x96xf32>
    %565 = vector.broadcast %66 : vector<1x96xf32> to vector<2x96xf32>
    %566 = arith.addf %564, %565 : vector<2x96xf32>
    %567 = arith.truncf %530 : vector<2x32xf32> to vector<2x32xbf16>
    %cst_94 = arith.constant dense<0.000000e+00> : vector<2x96xf32>
    %568 = tpu.matmul %567, %64, %cst_94 {dimension_numbers = #tpu.dot_dimension_numbers<[1], [0], [0], [1], [0, 0, 1, 1], [], []>} : vector<2x32xbf16>, vector<32x96xbf16>, vector<2x96xf32> -> vector<2x96xf32>
    %569 = vector.broadcast %67 : vector<1x96xf32> to vector<2x96xf32>
    %570 = arith.addf %568, %569 : vector<2x96xf32>
    %571 = vector.extract_strided_slice %566 {offsets = [0, 0], sizes = [2, 32], strides = [1, 1]} : vector<2x96xf32> to vector<2x32xf32>
    %572 = vector.extract_strided_slice %570 {offsets = [0, 0], sizes = [2, 32], strides = [1, 1]} : vector<2x96xf32> to vector<2x32xf32>
    %573 = arith.addf %571, %572 : vector<2x32xf32>
    %574 = arith.negf %573 : vector<2x32xf32>
    %575 = math.exp %574 : vector<2x32xf32>
    %cst_95 = arith.constant 1.000000e+00 : f32
    %576 = vector.broadcast %cst_95 : f32 to vector<2x32xf32>
    %577 = arith.addf %576, %575 : vector<2x32xf32>
    %578 = arith.divf %576, %577 : vector<2x32xf32>
    %579 = vector.extract_strided_slice %566 {offsets = [0, 32], sizes = [2, 32], strides = [1, 1]} : vector<2x96xf32> to vector<2x32xf32>
    %580 = vector.extract_strided_slice %570 {offsets = [0, 32], sizes = [2, 32], strides = [1, 1]} : vector<2x96xf32> to vector<2x32xf32>
    %581 = arith.addf %579, %580 : vector<2x32xf32>
    %582 = arith.negf %581 : vector<2x32xf32>
    %583 = math.exp %582 : vector<2x32xf32>
    %cst_96 = arith.constant 1.000000e+00 : f32
    %584 = vector.broadcast %cst_96 : f32 to vector<2x32xf32>
    %585 = arith.addf %584, %583 : vector<2x32xf32>
    %586 = arith.divf %584, %585 : vector<2x32xf32>
    %587 = vector.extract_strided_slice %566 {offsets = [0, 64], sizes = [2, 32], strides = [1, 1]} : vector<2x96xf32> to vector<2x32xf32>
    %588 = vector.extract_strided_slice %570 {offsets = [0, 64], sizes = [2, 32], strides = [1, 1]} : vector<2x96xf32> to vector<2x32xf32>
    %589 = arith.mulf %578, %588 : vector<2x32xf32>
    %590 = arith.addf %587, %589 : vector<2x32xf32>
    %591 = math.tanh %590 : vector<2x32xf32>
    %cst_97 = arith.constant 1.000000e+00 : f32
    %592 = vector.broadcast %cst_97 : f32 to vector<2x32xf32>
    %593 = arith.subf %592, %586 : vector<2x32xf32>
    %594 = arith.mulf %593, %591 : vector<2x32xf32>
    %595 = arith.mulf %586, %530 : vector<2x32xf32>
    %596 = arith.addf %594, %595 : vector<2x32xf32>
    %c14 = arith.constant 14 : index
    %c0_98 = arith.constant 0 : index
    %597 = vector.load %arg4[%c14, %c0_98] : memref<16x32xf32, #tpu.memory_space<vmem>>, vector<2x32xf32>
    tpu.vector_store %arg4[%c14, %c0_98], %596 {strides = array<i32>} : memref<16x32xf32, #tpu.memory_space<vmem>>, vector<2x32xf32>,
    %c240 = arith.constant 240 : index
    %c0_99 = arith.constant 0 : index
    %598 = vector.load %arg1[%c240, %c0_99] : memref<336x96xbf16, #tpu.memory_space<vmem>>, vector<32x96xbf16>
    %c272 = arith.constant 272 : index
    %c0_100 = arith.constant 0 : index
    %599 = vector.load %arg1[%c272, %c0_100] : memref<336x96xbf16, #tpu.memory_space<vmem>>, vector<32x96xbf16>
    %600 = vector.extract_strided_slice %598 {offsets = [0, 0], sizes = [32, 32], strides = [1, 1]} : vector<32x96xbf16> to vector<32x32xbf16>
    %601 = vector.extract_strided_slice %598 {offsets = [0, 32], sizes = [32, 32], strides = [1, 1]} : vector<32x96xbf16> to vector<32x32xbf16>
    %602 = vector.extract_strided_slice %598 {offsets = [0, 64], sizes = [32, 32], strides = [1, 1]} : vector<32x96xbf16> to vector<32x32xbf16>
    %603 = vector.extract_strided_slice %599 {offsets = [0, 0], sizes = [32, 32], strides = [1, 1]} : vector<32x96xbf16> to vector<32x32xbf16>
    %604 = vector.extract_strided_slice %599 {offsets = [0, 32], sizes = [32, 32], strides = [1, 1]} : vector<32x96xbf16> to vector<32x32xbf16>
    %605 = vector.extract_strided_slice %1 {offsets = [6, 0], sizes = [1, 32], strides = [1, 1]} : vector<8x96xf32> to vector<1x32xf32>
    %606 = vector.extract_strided_slice %1 {offsets = [6, 32], sizes = [1, 32], strides = [1, 1]} : vector<8x96xf32> to vector<1x32xf32>
    %607 = vector.extract_strided_slice %1 {offsets = [6, 64], sizes = [1, 32], strides = [1, 1]} : vector<8x96xf32> to vector<1x32xf32>
    %c0_101 = arith.constant 0 : index
    %c0_102 = arith.constant 0 : index
    %608 = vector.load %arg4[%c0_101, %c0_102] : memref<16x32xf32, #tpu.memory_space<vmem>>, vector<16x32xf32>
    %609 = arith.truncf %608 : vector<16x32xf32> to vector<16x32xbf16>
    %cst_103 = arith.constant dense<0.000000e+00> : vector<16x32xf32>
    %610 = tpu.matmul %609, %600, %cst_103 {dimension_numbers = #tpu.dot_dimension_numbers<[1], [0], [0], [1], [0, 0, 1, 1], [], []>} : vector<16x32xbf16>, vector<32x32xbf16>, vector<16x32xf32> -> vector<16x32xf32>
    %611 = vector.broadcast %605 : vector<1x32xf32> to vector<16x32xf32>
    %612 = arith.addf %610, %611 : vector<16x32xf32>
    %613 = arith.truncf %612 : vector<16x32xf32> to vector<16x32xbf16>
    "tpu.trace_start"() <{level = 10 : i32, message = "ik,jk->ij"}> : () -> ()
    %cst_104 = arith.constant dense<0.000000e+00> : vector<16x16xf32>
    %614 = tpu.matmul %613, %609, %cst_104 {dimension_numbers = #tpu.dot_dimension_numbers<[1], [1], [0], [0], [0, 0, 1, 0], [], []>} : vector<16x32xbf16>, vector<16x32xbf16>, vector<16x16xf32> -> vector<16x16xf32>
    "tpu.trace_stop"() : () -> ()
    %615 = tpu.iota {dimensions = array<i32: 0>} : vector<16x16xi32>
    %616 = tpu.iota {dimensions = array<i32: 1>} : vector<16x16xi32>
    %c2_i32 = arith.constant 2 : i32
    %c0_i32 = arith.constant 0 : i32
    %617 = arith.cmpi eq, %c2_i32, %c0_i32 : i32
    %c1_i32 = arith.constant 1 : i32
    %618 = arith.select %617, %c1_i32, %c2_i32 : i32
    %619 = vector.broadcast %618 : i32 to vector<16x16xi32>
    %620 = arith.remsi %615, %619 : vector<16x16xi32>
    %c0_i32_105 = arith.constant 0 : i32
    %621 = vector.broadcast %c0_i32_105 : i32 to vector<16x16xi32>
    %622 = arith.cmpi ne, %620, %621 : vector<16x16xi32>
    %c0_i32_106 = arith.constant 0 : i32
    %623 = vector.broadcast %c0_i32_106 : i32 to vector<16x16xi32>
    %624 = arith.cmpi slt, %620, %623 : vector<16x16xi32>
    %c0_i32_107 = arith.constant 0 : i32
    %625 = arith.cmpi slt, %618, %c0_i32_107 : i32
    %626 = vector.broadcast %625 : i1 to vector<16x16xi1>
    %627 = vector.broadcast %626 : vector<16x16xi1> to vector<16x16xi1>
    %628 = arith.xori %624, %627 : vector<16x16xi1>
    %629 = arith.andi %628, %622 : vector<16x16xi1>
    %630 = vector.broadcast %618 : i32 to vector<16x16xi32>
    %631 = arith.addi %620, %630 : vector<16x16xi32>
    %632 = arith.select %629, %631, %620 : vector<16x16xi1>, vector<16x16xi32>
    %c2_i32_108 = arith.constant 2 : i32
    %c0_i32_109 = arith.constant 0 : i32
    %633 = arith.cmpi eq, %c2_i32_108, %c0_i32_109 : i32
    %c1_i32_110 = arith.constant 1 : i32
    %634 = arith.select %633, %c1_i32_110, %c2_i32_108 : i32
    %635 = vector.broadcast %634 : i32 to vector<16x16xi32>
    %636 = arith.remsi %616, %635 : vector<16x16xi32>
    %c0_i32_111 = arith.constant 0 : i32
    %637 = vector.broadcast %c0_i32_111 : i32 to vector<16x16xi32>
    %638 = arith.cmpi ne, %636, %637 : vector<16x16xi32>
    %c0_i32_112 = arith.constant 0 : i32
    %639 = vector.broadcast %c0_i32_112 : i32 to vector<16x16xi32>
    %640 = arith.cmpi slt, %636, %639 : vector<16x16xi32>
    %c0_i32_113 = arith.constant 0 : i32
    %641 = arith.cmpi slt, %634, %c0_i32_113 : i32
    %642 = vector.broadcast %641 : i1 to vector<16x16xi1>
    %643 = vector.broadcast %642 : vector<16x16xi1> to vector<16x16xi1>
    %644 = arith.xori %640, %643 : vector<16x16xi1>
    %645 = arith.andi %644, %638 : vector<16x16xi1>
    %646 = vector.broadcast %634 : i32 to vector<16x16xi32>
    %647 = arith.addi %636, %646 : vector<16x16xi32>
    %648 = arith.select %645, %647, %636 : vector<16x16xi1>, vector<16x16xi32>
    %649 = arith.cmpi eq, %632, %648 : vector<16x16xi32>
    %cst_114 = arith.constant -1.000000e+30 : f32
    %650 = vector.broadcast %cst_114 : f32 to vector<16x16xf32>
    %651 = arith.select %649, %614, %650 : vector<16x16xi1>, vector<16x16xf32>
    %cst_115 = arith.constant dense<0xFF800000> : vector<16xf32>
    %652 = vector.multi_reduction <maximumf>, %651, %cst_115 [1] : vector<16x16xf32> to vector<16xf32>
    %653 = vector.shape_cast %652 : vector<16xf32> to vector<16x1xf32>
    %654 = vector.broadcast %653 : vector<16x1xf32> to vector<16x16xf32>
    %655 = arith.subf %651, %654 : vector<16x16xf32>
    %656 = math.exp %655 : vector<16x16xf32>
    %cst_116 = arith.constant dense<0.000000e+00> : vector<16xf32>
    %657 = vector.multi_reduction <add>, %656, %cst_116 [1] : vector<16x16xf32> to vector<16xf32>
    %658 = vector.shape_cast %657 : vector<16xf32> to vector<16x1xf32>
    %659 = tpu.reciprocal %658 {approx = true} : vector<16x1xf32> -> vector<16x1xf32>
    %660 = vector.broadcast %659 : vector<16x1xf32> to vector<16x16xf32>
    %661 = arith.mulf %656, %660 : vector<16x16xf32>
    %662 = arith.truncf %661 : vector<16x16xf32> to vector<16x16xbf16>
    %cst_117 = arith.constant dense<0.000000e+00> : vector<16x32xf32>
    %663 = tpu.matmul %662, %609, %cst_117 {dimension_numbers = #tpu.dot_dimension_numbers<[1], [0], [0], [1], [0, 0, 1, 1], [], []>} : vector<16x16xbf16>, vector<16x32xbf16>, vector<16x32xf32> -> vector<16x32xf32>
    %664 = arith.truncf %663 : vector<16x32xf32> to vector<16x32xbf16>
    %cst_118 = arith.constant dense<0.000000e+00> : vector<16x32xf32>
    %665 = tpu.matmul %664, %601, %cst_118 {dimension_numbers = #tpu.dot_dimension_numbers<[1], [0], [0], [1], [0, 0, 1, 1], [], []>} : vector<16x32xbf16>, vector<32x32xbf16>, vector<16x32xf32> -> vector<16x32xf32>
    %cst_119 = arith.constant dense<0.000000e+00> : vector<16x32xf32>
    %666 = tpu.matmul %609, %602, %cst_119 {dimension_numbers = #tpu.dot_dimension_numbers<[1], [0], [0], [1], [0, 0, 1, 1], [], []>} : vector<16x32xbf16>, vector<32x32xbf16>, vector<16x32xf32> -> vector<16x32xf32>
    %667 = arith.addf %665, %666 : vector<16x32xf32>
    %668 = vector.broadcast %606 : vector<1x32xf32> to vector<16x32xf32>
    %669 = arith.addf %667, %668 : vector<16x32xf32>
    %670 = arith.negf %669 : vector<16x32xf32>
    %671 = math.exp %670 : vector<16x32xf32>
    %cst_120 = arith.constant 1.000000e+00 : f32
    %672 = vector.broadcast %cst_120 : f32 to vector<16x32xf32>
    %673 = arith.addf %672, %671 : vector<16x32xf32>
    %674 = arith.divf %672, %673 : vector<16x32xf32>
    %675 = arith.truncf %663 : vector<16x32xf32> to vector<16x32xbf16>
    %cst_121 = arith.constant dense<0.000000e+00> : vector<16x32xf32>
    %676 = tpu.matmul %675, %603, %cst_121 {dimension_numbers = #tpu.dot_dimension_numbers<[1], [0], [0], [1], [0, 0, 1, 1], [], []>} : vector<16x32xbf16>, vector<32x32xbf16>, vector<16x32xf32> -> vector<16x32xf32>
    %cst_122 = arith.constant dense<0.000000e+00> : vector<16x32xf32>
    %677 = tpu.matmul %609, %604, %cst_122 {dimension_numbers = #tpu.dot_dimension_numbers<[1], [0], [0], [1], [0, 0, 1, 1], [], []>} : vector<16x32xbf16>, vector<32x32xbf16>, vector<16x32xf32> -> vector<16x32xf32>
    %678 = arith.addf %676, %677 : vector<16x32xf32>
    %679 = vector.broadcast %607 : vector<1x32xf32> to vector<16x32xf32>
    %680 = arith.addf %678, %679 : vector<16x32xf32>
    %681 = math.tanh %680 : vector<16x32xf32>
    %682 = arith.mulf %674, %681 : vector<16x32xf32>
    %cst_123 = arith.constant 1.000000e+00 : f32
    %683 = vector.broadcast %cst_123 : f32 to vector<16x32xf32>
    %684 = arith.subf %683, %674 : vector<16x32xf32>
    %685 = arith.mulf %684, %608 : vector<16x32xf32>
    %686 = arith.addf %682, %685 : vector<16x32xf32>
    %c304 = arith.constant 304 : index
    %c0_124 = arith.constant 0 : index
    %687 = vector.load %arg1[%c304, %c0_124] : memref<336x96xbf16, #tpu.memory_space<vmem>>, vector<32x96xbf16>
    %c208 = arith.constant 208 : index
    %c0_125 = arith.constant 0 : index
    %688 = vector.load %arg1[%c208, %c0_125] : memref<336x96xbf16, #tpu.memory_space<vmem>>, vector<32x96xbf16>
    %689 = vector.extract_strided_slice %599 {offsets = [0, 64], sizes = [32, 32], strides = [1, 1]} : vector<32x96xbf16> to vector<32x32xbf16>
    %690 = vector.extract_strided_slice %687 {offsets = [0, 0], sizes = [32, 32], strides = [1, 1]} : vector<32x96xbf16> to vector<32x32xbf16>
    %691 = vector.extract_strided_slice %687 {offsets = [0, 32], sizes = [32, 32], strides = [1, 1]} : vector<32x96xbf16> to vector<32x32xbf16>
    %692 = vector.extract_strided_slice %1 {offsets = [5, 0], sizes = [1, 96], strides = [1, 1]} : vector<8x96xf32> to vector<1x96xf32>
    %693 = vector.extract_strided_slice %1 {offsets = [7, 0], sizes = [1, 32], strides = [1, 1]} : vector<8x96xf32> to vector<1x32xf32>
    %694 = vector.extract_strided_slice %1 {offsets = [7, 32], sizes = [1, 32], strides = [1, 1]} : vector<8x96xf32> to vector<1x32xf32>
    %695 = arith.truncf %686 : vector<16x32xf32> to vector<16x32xbf16>
    %696 = tpu.transpose %686, [1, 0] : vector<16x32xf32> -> vector<32x16xf32>
    %697 = arith.truncf %696 : vector<32x16xf32> to vector<32x16xbf16>
    %698 = tpu.iota {dimensions = array<i32: 1>} : vector<2x16xi32>
    %699 = tpu.iota {dimensions = array<i32: 0>} : vector<2x16xi32>
    %c2_i32_126 = arith.constant 2 : i32
    %c0_i32_127 = arith.constant 0 : i32
    %700 = arith.cmpi eq, %c2_i32_126, %c0_i32_127 : i32
    %c1_i32_128 = arith.constant 1 : i32
    %701 = arith.select %700, %c1_i32_128, %c2_i32_126 : i32
    %702 = vector.broadcast %701 : i32 to vector<2x16xi32>
    %703 = arith.remsi %698, %702 : vector<2x16xi32>
    %c0_i32_129 = arith.constant 0 : i32
    %704 = vector.broadcast %c0_i32_129 : i32 to vector<2x16xi32>
    %705 = arith.cmpi ne, %703, %704 : vector<2x16xi32>
    %c0_i32_130 = arith.constant 0 : i32
    %706 = vector.broadcast %c0_i32_130 : i32 to vector<2x16xi32>
    %707 = arith.cmpi slt, %703, %706 : vector<2x16xi32>
    %c0_i32_131 = arith.constant 0 : i32
    %708 = arith.cmpi slt, %701, %c0_i32_131 : i32
    %709 = vector.broadcast %708 : i1 to vector<2x16xi1>
    %710 = vector.broadcast %709 : vector<2x16xi1> to vector<2x16xi1>
    %711 = arith.xori %707, %710 : vector<2x16xi1>
    %712 = arith.andi %711, %705 : vector<2x16xi1>
    %713 = vector.broadcast %701 : i32 to vector<2x16xi32>
    %714 = arith.addi %703, %713 : vector<2x16xi32>
    %715 = arith.select %712, %714, %703 : vector<2x16xi1>, vector<2x16xi32>
    %716 = arith.cmpi eq, %715, %699 : vector<2x16xi32>
    %717 = arith.truncf %562 : vector<2x32xf32> to vector<2x32xbf16>
    %cst_132 = arith.constant dense<0.000000e+00> : vector<2x96xf32>
    %718 = tpu.matmul %717, %688, %cst_132 {dimension_numbers = #tpu.dot_dimension_numbers<[1], [0], [0], [1], [0, 0, 1, 1], [], []>} : vector<2x32xbf16>, vector<32x96xbf16>, vector<2x96xf32> -> vector<2x96xf32>
    %719 = vector.broadcast %692 : vector<1x96xf32> to vector<2x96xf32>
    %720 = arith.addf %718, %719 : vector<2x96xf32>
    %721 = vector.extract_strided_slice %61 {offsets = [0, 0], sizes = [2, 96], strides = [1, 1]} : vector<12x96xf32> to vector<2x96xf32>
    %722 = vector.extract_strided_slice %721 {offsets = [0, 0], sizes = [2, 32], strides = [1, 1]} : vector<2x96xf32> to vector<2x32xf32>
    %723 = vector.extract_strided_slice %720 {offsets = [0, 0], sizes = [2, 32], strides = [1, 1]} : vector<2x96xf32> to vector<2x32xf32>
    %724 = arith.addf %722, %723 : vector<2x32xf32>
    %725 = arith.negf %724 : vector<2x32xf32>
    %726 = math.exp %725 : vector<2x32xf32>
    %cst_133 = arith.constant 1.000000e+00 : f32
    %727 = vector.broadcast %cst_133 : f32 to vector<2x32xf32>
    %728 = arith.addf %727, %726 : vector<2x32xf32>
    %729 = arith.divf %727, %728 : vector<2x32xf32>
    %730 = vector.extract_strided_slice %721 {offsets = [0, 32], sizes = [2, 32], strides = [1, 1]} : vector<2x96xf32> to vector<2x32xf32>
    %731 = vector.extract_strided_slice %720 {offsets = [0, 32], sizes = [2, 32], strides = [1, 1]} : vector<2x96xf32> to vector<2x32xf32>
    %732 = arith.addf %730, %731 : vector<2x32xf32>
    %733 = arith.negf %732 : vector<2x32xf32>
    %734 = math.exp %733 : vector<2x32xf32>
    %cst_134 = arith.constant 1.000000e+00 : f32
    %735 = vector.broadcast %cst_134 : f32 to vector<2x32xf32>
    %736 = arith.addf %735, %734 : vector<2x32xf32>
    %737 = arith.divf %735, %736 : vector<2x32xf32>
    %738 = vector.extract_strided_slice %721 {offsets = [0, 64], sizes = [2, 32], strides = [1, 1]} : vector<2x96xf32> to vector<2x32xf32>
    %739 = vector.extract_strided_slice %720 {offsets = [0, 64], sizes = [2, 32], strides = [1, 1]} : vector<2x96xf32> to vector<2x32xf32>
    %740 = arith.mulf %729, %739 : vector<2x32xf32>
    %741 = arith.addf %738, %740 : vector<2x32xf32>
    %742 = math.tanh %741 : vector<2x32xf32>
    %cst_135 = arith.constant 1.000000e+00 : f32
    %743 = vector.broadcast %cst_135 : f32 to vector<2x32xf32>
    %744 = arith.subf %743, %737 : vector<2x32xf32>
    %745 = arith.mulf %744, %742 : vector<2x32xf32>
    %746 = arith.mulf %737, %562 : vector<2x32xf32>
    %747 = arith.addf %745, %746 : vector<2x32xf32>
    %748 = arith.truncf %747 : vector<2x32xf32> to vector<2x32xbf16>
    %cst_136 = arith.constant dense<0.000000e+00> : vector<2x32xf32>
    %749 = tpu.matmul %748, %689, %cst_136 {dimension_numbers = #tpu.dot_dimension_numbers<[1], [0], [0], [1], [0, 0, 1, 1], [], []>} : vector<2x32xbf16>, vector<32x32xbf16>, vector<2x32xf32> -> vector<2x32xf32>
    %750 = vector.broadcast %693 : vector<1x32xf32> to vector<2x32xf32>
    %751 = arith.addf %749, %750 : vector<2x32xf32>
    %752 = arith.truncf %751 : vector<2x32xf32> to vector<2x32xbf16>
    %cst_137 = arith.constant dense<0.000000e+00> : vector<2x16xf32>
    %753 = tpu.matmul %752, %697, %cst_137 {dimension_numbers = #tpu.dot_dimension_numbers<[1], [0], [0], [1], [0, 0, 1, 1], [], []>} : vector<2x32xbf16>, vector<32x16xbf16>, vector<2x16xf32> -> vector<2x16xf32>
    %cst_138 = arith.constant -1.000000e+30 : f32
    %754 = vector.broadcast %cst_138 : f32 to vector<2x16xf32>
    %755 = arith.select %716, %753, %754 : vector<2x16xi1>, vector<2x16xf32>
    %cst_139 = arith.constant dense<0xFF800000> : vector<2xf32>
    %756 = vector.multi_reduction <maximumf>, %755, %cst_139 [1] : vector<2x16xf32> to vector<2xf32>
    %757 = vector.shape_cast %756 : vector<2xf32> to vector<2x1xf32>
    %758 = vector.broadcast %757 : vector<2x1xf32> to vector<2x16xf32>
    %759 = arith.subf %755, %758 : vector<2x16xf32>
    %760 = math.exp %759 : vector<2x16xf32>
    %cst_140 = arith.constant dense<0.000000e+00> : vector<2xf32>
    %761 = vector.multi_reduction <add>, %760, %cst_140 [1] : vector<2x16xf32> to vector<2xf32>
    %762 = vector.shape_cast %761 : vector<2xf32> to vector<2x1xf32>
    %763 = tpu.reciprocal %762 {approx = true} : vector<2x1xf32> -> vector<2x1xf32>
    %764 = vector.broadcast %763 : vector<2x1xf32> to vector<2x16xf32>
    %765 = arith.mulf %760, %764 : vector<2x16xf32>
    %766 = arith.truncf %765 : vector<2x16xf32> to vector<2x16xbf16>
    %cst_141 = arith.constant dense<0.000000e+00> : vector<2x32xf32>
    %767 = tpu.matmul %766, %695, %cst_141 {dimension_numbers = #tpu.dot_dimension_numbers<[1], [0], [0], [1], [0, 0, 1, 1], [], []>} : vector<2x16xbf16>, vector<16x32xbf16>, vector<2x32xf32> -> vector<2x32xf32>
    %768 = arith.truncf %767 : vector<2x32xf32> to vector<2x32xbf16>
    %cst_142 = arith.constant dense<0.000000e+00> : vector<2x32xf32>
    %769 = tpu.matmul %768, %690, %cst_142 {dimension_numbers = #tpu.dot_dimension_numbers<[1], [0], [0], [1], [0, 0, 1, 1], [], []>} : vector<2x32xbf16>, vector<32x32xbf16>, vector<2x32xf32> -> vector<2x32xf32>
    %770 = arith.truncf %747 : vector<2x32xf32> to vector<2x32xbf16>
    %cst_143 = arith.constant dense<0.000000e+00> : vector<2x32xf32>
    %771 = tpu.matmul %770, %691, %cst_143 {dimension_numbers = #tpu.dot_dimension_numbers<[1], [0], [0], [1], [0, 0, 1, 1], [], []>} : vector<2x32xbf16>, vector<32x32xbf16>, vector<2x32xf32> -> vector<2x32xf32>
    %772 = arith.addf %769, %771 : vector<2x32xf32>
    %773 = vector.broadcast %694 : vector<1x32xf32> to vector<2x32xf32>
    %774 = arith.addf %772, %773 : vector<2x32xf32>
    %775 = math.tanh %774 : vector<2x32xf32>
    %c0_144 = arith.constant 0 : index
    %c0_145 = arith.constant 0 : index
    %776 = vector.load %arg5[%c0_144, %c0_145] : memref<16x32xf32, #tpu.memory_space<vmem>>, vector<2x32xf32>
    tpu.vector_store %arg5[%c0_144, %c0_145], %775 {strides = array<i32>} : memref<16x32xf32, #tpu.memory_space<vmem>>, vector<2x32xf32>,
    %777 = arith.truncf %775 : vector<2x32xf32> to vector<2x32xbf16>
    %cst_146 = arith.constant dense<0.000000e+00> : vector<2x96xf32>
    %778 = tpu.matmul %777, %688, %cst_146 {dimension_numbers = #tpu.dot_dimension_numbers<[1], [0], [0], [1], [0, 0, 1, 1], [], []>} : vector<2x32xbf16>, vector<32x96xbf16>, vector<2x96xf32> -> vector<2x96xf32>
    %779 = vector.broadcast %692 : vector<1x96xf32> to vector<2x96xf32>
    %780 = arith.addf %778, %779 : vector<2x96xf32>
    %781 = vector.extract_strided_slice %61 {offsets = [2, 0], sizes = [2, 96], strides = [1, 1]} : vector<12x96xf32> to vector<2x96xf32>
    %782 = vector.extract_strided_slice %781 {offsets = [0, 0], sizes = [2, 32], strides = [1, 1]} : vector<2x96xf32> to vector<2x32xf32>
    %783 = vector.extract_strided_slice %780 {offsets = [0, 0], sizes = [2, 32], strides = [1, 1]} : vector<2x96xf32> to vector<2x32xf32>
    %784 = arith.addf %782, %783 : vector<2x32xf32>
    %785 = arith.negf %784 : vector<2x32xf32>
    %786 = math.exp %785 : vector<2x32xf32>
    %cst_147 = arith.constant 1.000000e+00 : f32
    %787 = vector.broadcast %cst_147 : f32 to vector<2x32xf32>
    %788 = arith.addf %787, %786 : vector<2x32xf32>
    %789 = arith.divf %787, %788 : vector<2x32xf32>
    %790 = vector.extract_strided_slice %781 {offsets = [0, 32], sizes = [2, 32], strides = [1, 1]} : vector<2x96xf32> to vector<2x32xf32>
    %791 = vector.extract_strided_slice %780 {offsets = [0, 32], sizes = [2, 32], strides = [1, 1]} : vector<2x96xf32> to vector<2x32xf32>
    %792 = arith.addf %790, %791 : vector<2x32xf32>
    %793 = arith.negf %792 : vector<2x32xf32>
    %794 = math.exp %793 : vector<2x32xf32>
    %cst_148 = arith.constant 1.000000e+00 : f32
    %795 = vector.broadcast %cst_148 : f32 to vector<2x32xf32>
    %796 = arith.addf %795, %794 : vector<2x32xf32>
    %797 = arith.divf %795, %796 : vector<2x32xf32>
    %798 = vector.extract_strided_slice %781 {offsets = [0, 64], sizes = [2, 32], strides = [1, 1]} : vector<2x96xf32> to vector<2x32xf32>
    %799 = vector.extract_strided_slice %780 {offsets = [0, 64], sizes = [2, 32], strides = [1, 1]} : vector<2x96xf32> to vector<2x32xf32>
    %800 = arith.mulf %789, %799 : vector<2x32xf32>
    %801 = arith.addf %798, %800 : vector<2x32xf32>
    %802 = math.tanh %801 : vector<2x32xf32>
    %cst_149 = arith.constant 1.000000e+00 : f32
    %803 = vector.broadcast %cst_149 : f32 to vector<2x32xf32>
    %804 = arith.subf %803, %797 : vector<2x32xf32>
    %805 = arith.mulf %804, %802 : vector<2x32xf32>
    %806 = arith.mulf %797, %775 : vector<2x32xf32>
    %807 = arith.addf %805, %806 : vector<2x32xf32>
    %808 = arith.truncf %807 : vector<2x32xf32> to vector<2x32xbf16>
    %cst_150 = arith.constant dense<0.000000e+00> : vector<2x32xf32>
    %809 = tpu.matmul %808, %689, %cst_150 {dimension_numbers = #tpu.dot_dimension_numbers<[1], [0], [0], [1], [0, 0, 1, 1], [], []>} : vector<2x32xbf16>, vector<32x32xbf16>, vector<2x32xf32> -> vector<2x32xf32>
    %810 = vector.broadcast %693 : vector<1x32xf32> to vector<2x32xf32>
    %811 = arith.addf %809, %810 : vector<2x32xf32>
    %812 = arith.truncf %811 : vector<2x32xf32> to vector<2x32xbf16>
    %cst_151 = arith.constant dense<0.000000e+00> : vector<2x16xf32>
    %813 = tpu.matmul %812, %697, %cst_151 {dimension_numbers = #tpu.dot_dimension_numbers<[1], [0], [0], [1], [0, 0, 1, 1], [], []>} : vector<2x32xbf16>, vector<32x16xbf16>, vector<2x16xf32> -> vector<2x16xf32>
    %cst_152 = arith.constant -1.000000e+30 : f32
    %814 = vector.broadcast %cst_152 : f32 to vector<2x16xf32>
    %815 = arith.select %716, %813, %814 : vector<2x16xi1>, vector<2x16xf32>
    %cst_153 = arith.constant dense<0xFF800000> : vector<2xf32>
    %816 = vector.multi_reduction <maximumf>, %815, %cst_153 [1] : vector<2x16xf32> to vector<2xf32>
    %817 = vector.shape_cast %816 : vector<2xf32> to vector<2x1xf32>
    %818 = vector.broadcast %817 : vector<2x1xf32> to vector<2x16xf32>
    %819 = arith.subf %815, %818 : vector<2x16xf32>
    %820 = math.exp %819 : vector<2x16xf32>
    %cst_154 = arith.constant dense<0.000000e+00> : vector<2xf32>
    %821 = vector.multi_reduction <add>, %820, %cst_154 [1] : vector<2x16xf32> to vector<2xf32>
    %822 = vector.shape_cast %821 : vector<2xf32> to vector<2x1xf32>
    %823 = tpu.reciprocal %822 {approx = true} : vector<2x1xf32> -> vector<2x1xf32>
    %824 = vector.broadcast %823 : vector<2x1xf32> to vector<2x16xf32>
    %825 = arith.mulf %820, %824 : vector<2x16xf32>
    %826 = arith.truncf %825 : vector<2x16xf32> to vector<2x16xbf16>
    %cst_155 = arith.constant dense<0.000000e+00> : vector<2x32xf32>
    %827 = tpu.matmul %826, %695, %cst_155 {dimension_numbers = #tpu.dot_dimension_numbers<[1], [0], [0], [1], [0, 0, 1, 1], [], []>} : vector<2x16xbf16>, vector<16x32xbf16>, vector<2x32xf32> -> vector<2x32xf32>
    %828 = arith.truncf %827 : vector<2x32xf32> to vector<2x32xbf16>
    %cst_156 = arith.constant dense<0.000000e+00> : vector<2x32xf32>
    %829 = tpu.matmul %828, %690, %cst_156 {dimension_numbers = #tpu.dot_dimension_numbers<[1], [0], [0], [1], [0, 0, 1, 1], [], []>} : vector<2x32xbf16>, vector<32x32xbf16>, vector<2x32xf32> -> vector<2x32xf32>
    %830 = arith.truncf %807 : vector<2x32xf32> to vector<2x32xbf16>
    %cst_157 = arith.constant dense<0.000000e+00> : vector<2x32xf32>
    %831 = tpu.matmul %830, %691, %cst_157 {dimension_numbers = #tpu.dot_dimension_numbers<[1], [0], [0], [1], [0, 0, 1, 1], [], []>} : vector<2x32xbf16>, vector<32x32xbf16>, vector<2x32xf32> -> vector<2x32xf32>
    %832 = arith.addf %829, %831 : vector<2x32xf32>
    %833 = vector.broadcast %694 : vector<1x32xf32> to vector<2x32xf32>
    %834 = arith.addf %832, %833 : vector<2x32xf32>
    %835 = math.tanh %834 : vector<2x32xf32>
    %c2_158 = arith.constant 2 : index
    %c0_159 = arith.constant 0 : index
    %836 = vector.load %arg5[%c2_158, %c0_159] : memref<16x32xf32, #tpu.memory_space<vmem>>, vector<2x32xf32>
    tpu.vector_store %arg5[%c2_158, %c0_159], %835 {strides = array<i32>} : memref<16x32xf32, #tpu.memory_space<vmem>>, vector<2x32xf32>,
    %837 = arith.truncf %835 : vector<2x32xf32> to vector<2x32xbf16>
    %cst_160 = arith.constant dense<0.000000e+00> : vector<2x96xf32>
    %838 = tpu.matmul %837, %688, %cst_160 {dimension_numbers = #tpu.dot_dimension_numbers<[1], [0], [0], [1], [0, 0, 1, 1], [], []>} : vector<2x32xbf16>, vector<32x96xbf16>, vector<2x96xf32> -> vector<2x96xf32>
    %839 = vector.broadcast %692 : vector<1x96xf32> to vector<2x96xf32>
    %840 = arith.addf %838, %839 : vector<2x96xf32>
    %841 = vector.extract_strided_slice %61 {offsets = [4, 0], sizes = [2, 96], strides = [1, 1]} : vector<12x96xf32> to vector<2x96xf32>
    %842 = vector.extract_strided_slice %841 {offsets = [0, 0], sizes = [2, 32], strides = [1, 1]} : vector<2x96xf32> to vector<2x32xf32>
    %843 = vector.extract_strided_slice %840 {offsets = [0, 0], sizes = [2, 32], strides = [1, 1]} : vector<2x96xf32> to vector<2x32xf32>
    %844 = arith.addf %842, %843 : vector<2x32xf32>
    %845 = arith.negf %844 : vector<2x32xf32>
    %846 = math.exp %845 : vector<2x32xf32>
    %cst_161 = arith.constant 1.000000e+00 : f32
    %847 = vector.broadcast %cst_161 : f32 to vector<2x32xf32>
    %848 = arith.addf %847, %846 : vector<2x32xf32>
    %849 = arith.divf %847, %848 : vector<2x32xf32>
    %850 = vector.extract_strided_slice %841 {offsets = [0, 32], sizes = [2, 32], strides = [1, 1]} : vector<2x96xf32> to vector<2x32xf32>
    %851 = vector.extract_strided_slice %840 {offsets = [0, 32], sizes = [2, 32], strides = [1, 1]} : vector<2x96xf32> to vector<2x32xf32>
    %852 = arith.addf %850, %851 : vector<2x32xf32>
    %853 = arith.negf %852 : vector<2x32xf32>
    %854 = math.exp %853 : vector<2x32xf32>
    %cst_162 = arith.constant 1.000000e+00 : f32
    %855 = vector.broadcast %cst_162 : f32 to vector<2x32xf32>
    %856 = arith.addf %855, %854 : vector<2x32xf32>
    %857 = arith.divf %855, %856 : vector<2x32xf32>
    %858 = vector.extract_strided_slice %841 {offsets = [0, 64], sizes = [2, 32], strides = [1, 1]} : vector<2x96xf32> to vector<2x32xf32>
    %859 = vector.extract_strided_slice %840 {offsets = [0, 64], sizes = [2, 32], strides = [1, 1]} : vector<2x96xf32> to vector<2x32xf32>
    %860 = arith.mulf %849, %859 : vector<2x32xf32>
    %861 = arith.addf %858, %860 : vector<2x32xf32>
    %862 = math.tanh %861 : vector<2x32xf32>
    %cst_163 = arith.constant 1.000000e+00 : f32
    %863 = vector.broadcast %cst_163 : f32 to vector<2x32xf32>
    %864 = arith.subf %863, %857 : vector<2x32xf32>
    %865 = arith.mulf %864, %862 : vector<2x32xf32>
    %866 = arith.mulf %857, %835 : vector<2x32xf32>
    %867 = arith.addf %865, %866 : vector<2x32xf32>
    %868 = arith.truncf %867 : vector<2x32xf32> to vector<2x32xbf16>
    %cst_164 = arith.constant dense<0.000000e+00> : vector<2x32xf32>
    %869 = tpu.matmul %868, %689, %cst_164 {dimension_numbers = #tpu.dot_dimension_numbers<[1], [0], [0], [1], [0, 0, 1, 1], [], []>} : vector<2x32xbf16>, vector<32x32xbf16>, vector<2x32xf32> -> vector<2x32xf32>
    %870 = vector.broadcast %693 : vector<1x32xf32> to vector<2x32xf32>
    %871 = arith.addf %869, %870 : vector<2x32xf32>
    %872 = arith.truncf %871 : vector<2x32xf32> to vector<2x32xbf16>
    %cst_165 = arith.constant dense<0.000000e+00> : vector<2x16xf32>
    %873 = tpu.matmul %872, %697, %cst_165 {dimension_numbers = #tpu.dot_dimension_numbers<[1], [0], [0], [1], [0, 0, 1, 1], [], []>} : vector<2x32xbf16>, vector<32x16xbf16>, vector<2x16xf32> -> vector<2x16xf32>
    %cst_166 = arith.constant -1.000000e+30 : f32
    %874 = vector.broadcast %cst_166 : f32 to vector<2x16xf32>
    %875 = arith.select %716, %873, %874 : vector<2x16xi1>, vector<2x16xf32>
    %cst_167 = arith.constant dense<0xFF800000> : vector<2xf32>
    %876 = vector.multi_reduction <maximumf>, %875, %cst_167 [1] : vector<2x16xf32> to vector<2xf32>
    %877 = vector.shape_cast %876 : vector<2xf32> to vector<2x1xf32>
    %878 = vector.broadcast %877 : vector<2x1xf32> to vector<2x16xf32>
    %879 = arith.subf %875, %878 : vector<2x16xf32>
    %880 = math.exp %879 : vector<2x16xf32>
    %cst_168 = arith.constant dense<0.000000e+00> : vector<2xf32>
    %881 = vector.multi_reduction <add>, %880, %cst_168 [1] : vector<2x16xf32> to vector<2xf32>
    %882 = vector.shape_cast %881 : vector<2xf32> to vector<2x1xf32>
    %883 = tpu.reciprocal %882 {approx = true} : vector<2x1xf32> -> vector<2x1xf32>
    %884 = vector.broadcast %883 : vector<2x1xf32> to vector<2x16xf32>
    %885 = arith.mulf %880, %884 : vector<2x16xf32>
    %886 = arith.truncf %885 : vector<2x16xf32> to vector<2x16xbf16>
    %cst_169 = arith.constant dense<0.000000e+00> : vector<2x32xf32>
    %887 = tpu.matmul %886, %695, %cst_169 {dimension_numbers = #tpu.dot_dimension_numbers<[1], [0], [0], [1], [0, 0, 1, 1], [], []>} : vector<2x16xbf16>, vector<16x32xbf16>, vector<2x32xf32> -> vector<2x32xf32>
    %888 = arith.truncf %887 : vector<2x32xf32> to vector<2x32xbf16>
    %cst_170 = arith.constant dense<0.000000e+00> : vector<2x32xf32>
    %889 = tpu.matmul %888, %690, %cst_170 {dimension_numbers = #tpu.dot_dimension_numbers<[1], [0], [0], [1], [0, 0, 1, 1], [], []>} : vector<2x32xbf16>, vector<32x32xbf16>, vector<2x32xf32> -> vector<2x32xf32>
    %890 = arith.truncf %867 : vector<2x32xf32> to vector<2x32xbf16>
    %cst_171 = arith.constant dense<0.000000e+00> : vector<2x32xf32>
    %891 = tpu.matmul %890, %691, %cst_171 {dimension_numbers = #tpu.dot_dimension_numbers<[1], [0], [0], [1], [0, 0, 1, 1], [], []>} : vector<2x32xbf16>, vector<32x32xbf16>, vector<2x32xf32> -> vector<2x32xf32>
    %892 = arith.addf %889, %891 : vector<2x32xf32>
    %893 = vector.broadcast %694 : vector<1x32xf32> to vector<2x32xf32>
    %894 = arith.addf %892, %893 : vector<2x32xf32>
    %895 = math.tanh %894 : vector<2x32xf32>
    %c4_172 = arith.constant 4 : index
    %c0_173 = arith.constant 0 : index
    %896 = vector.load %arg5[%c4_172, %c0_173] : memref<16x32xf32, #tpu.memory_space<vmem>>, vector<2x32xf32>
    tpu.vector_store %arg5[%c4_172, %c0_173], %895 {strides = array<i32>} : memref<16x32xf32, #tpu.memory_space<vmem>>, vector<2x32xf32>,
    %897 = arith.truncf %895 : vector<2x32xf32> to vector<2x32xbf16>
    %cst_174 = arith.constant dense<0.000000e+00> : vector<2x96xf32>
    %898 = tpu.matmul %897, %688, %cst_174 {dimension_numbers = #tpu.dot_dimension_numbers<[1], [0], [0], [1], [0, 0, 1, 1], [], []>} : vector<2x32xbf16>, vector<32x96xbf16>, vector<2x96xf32> -> vector<2x96xf32>
    %899 = vector.broadcast %692 : vector<1x96xf32> to vector<2x96xf32>
    %900 = arith.addf %898, %899 : vector<2x96xf32>
    %901 = vector.extract_strided_slice %61 {offsets = [6, 0], sizes = [2, 96], strides = [1, 1]} : vector<12x96xf32> to vector<2x96xf32>
    %902 = vector.extract_strided_slice %901 {offsets = [0, 0], sizes = [2, 32], strides = [1, 1]} : vector<2x96xf32> to vector<2x32xf32>
    %903 = vector.extract_strided_slice %900 {offsets = [0, 0], sizes = [2, 32], strides = [1, 1]} : vector<2x96xf32> to vector<2x32xf32>
    %904 = arith.addf %902, %903 : vector<2x32xf32>
    %905 = arith.negf %904 : vector<2x32xf32>
    %906 = math.exp %905 : vector<2x32xf32>
    %cst_175 = arith.constant 1.000000e+00 : f32
    %907 = vector.broadcast %cst_175 : f32 to vector<2x32xf32>
    %908 = arith.addf %907, %906 : vector<2x32xf32>
    %909 = arith.divf %907, %908 : vector<2x32xf32>
    %910 = vector.extract_strided_slice %901 {offsets = [0, 32], sizes = [2, 32], strides = [1, 1]} : vector<2x96xf32> to vector<2x32xf32>
    %911 = vector.extract_strided_slice %900 {offsets = [0, 32], sizes = [2, 32], strides = [1, 1]} : vector<2x96xf32> to vector<2x32xf32>
    %912 = arith.addf %910, %911 : vector<2x32xf32>
    %913 = arith.negf %912 : vector<2x32xf32>
    %914 = math.exp %913 : vector<2x32xf32>
    %cst_176 = arith.constant 1.000000e+00 : f32
    %915 = vector.broadcast %cst_176 : f32 to vector<2x32xf32>
    %916 = arith.addf %915, %914 : vector<2x32xf32>
    %917 = arith.divf %915, %916 : vector<2x32xf32>
    %918 = vector.extract_strided_slice %901 {offsets = [0, 64], sizes = [2, 32], strides = [1, 1]} : vector<2x96xf32> to vector<2x32xf32>
    %919 = vector.extract_strided_slice %900 {offsets = [0, 64], sizes = [2, 32], strides = [1, 1]} : vector<2x96xf32> to vector<2x32xf32>
    %920 = arith.mulf %909, %919 : vector<2x32xf32>
    %921 = arith.addf %918, %920 : vector<2x32xf32>
    %922 = math.tanh %921 : vector<2x32xf32>
    %cst_177 = arith.constant 1.000000e+00 : f32
    %923 = vector.broadcast %cst_177 : f32 to vector<2x32xf32>
    %924 = arith.subf %923, %917 : vector<2x32xf32>
    %925 = arith.mulf %924, %922 : vector<2x32xf32>
    %926 = arith.mulf %917, %895 : vector<2x32xf32>
    %927 = arith.addf %925, %926 : vector<2x32xf32>
    %928 = arith.truncf %927 : vector<2x32xf32> to vector<2x32xbf16>
    %cst_178 = arith.constant dense<0.000000e+00> : vector<2x32xf32>
    %929 = tpu.matmul %928, %689, %cst_178 {dimension_numbers = #tpu.dot_dimension_numbers<[1], [0], [0], [1], [0, 0, 1, 1], [], []>} : vector<2x32xbf16>, vector<32x32xbf16>, vector<2x32xf32> -> vector<2x32xf32>
    %930 = vector.broadcast %693 : vector<1x32xf32> to vector<2x32xf32>
    %931 = arith.addf %929, %930 : vector<2x32xf32>
    %932 = arith.truncf %931 : vector<2x32xf32> to vector<2x32xbf16>
    %cst_179 = arith.constant dense<0.000000e+00> : vector<2x16xf32>
    %933 = tpu.matmul %932, %697, %cst_179 {dimension_numbers = #tpu.dot_dimension_numbers<[1], [0], [0], [1], [0, 0, 1, 1], [], []>} : vector<2x32xbf16>, vector<32x16xbf16>, vector<2x16xf32> -> vector<2x16xf32>
    %cst_180 = arith.constant -1.000000e+30 : f32
    %934 = vector.broadcast %cst_180 : f32 to vector<2x16xf32>
    %935 = arith.select %716, %933, %934 : vector<2x16xi1>, vector<2x16xf32>
    %cst_181 = arith.constant dense<0xFF800000> : vector<2xf32>
    %936 = vector.multi_reduction <maximumf>, %935, %cst_181 [1] : vector<2x16xf32> to vector<2xf32>
    %937 = vector.shape_cast %936 : vector<2xf32> to vector<2x1xf32>
    %938 = vector.broadcast %937 : vector<2x1xf32> to vector<2x16xf32>
    %939 = arith.subf %935, %938 : vector<2x16xf32>
    %940 = math.exp %939 : vector<2x16xf32>
    %cst_182 = arith.constant dense<0.000000e+00> : vector<2xf32>
    %941 = vector.multi_reduction <add>, %940, %cst_182 [1] : vector<2x16xf32> to vector<2xf32>
    %942 = vector.shape_cast %941 : vector<2xf32> to vector<2x1xf32>
    %943 = tpu.reciprocal %942 {approx = true} : vector<2x1xf32> -> vector<2x1xf32>
    %944 = vector.broadcast %943 : vector<2x1xf32> to vector<2x16xf32>
    %945 = arith.mulf %940, %944 : vector<2x16xf32>
    %946 = arith.truncf %945 : vector<2x16xf32> to vector<2x16xbf16>
    %cst_183 = arith.constant dense<0.000000e+00> : vector<2x32xf32>
    %947 = tpu.matmul %946, %695, %cst_183 {dimension_numbers = #tpu.dot_dimension_numbers<[1], [0], [0], [1], [0, 0, 1, 1], [], []>} : vector<2x16xbf16>, vector<16x32xbf16>, vector<2x32xf32> -> vector<2x32xf32>
    %948 = arith.truncf %947 : vector<2x32xf32> to vector<2x32xbf16>
    %cst_184 = arith.constant dense<0.000000e+00> : vector<2x32xf32>
    %949 = tpu.matmul %948, %690, %cst_184 {dimension_numbers = #tpu.dot_dimension_numbers<[1], [0], [0], [1], [0, 0, 1, 1], [], []>} : vector<2x32xbf16>, vector<32x32xbf16>, vector<2x32xf32> -> vector<2x32xf32>
    %950 = arith.truncf %927 : vector<2x32xf32> to vector<2x32xbf16>
    %cst_185 = arith.constant dense<0.000000e+00> : vector<2x32xf32>
    %951 = tpu.matmul %950, %691, %cst_185 {dimension_numbers = #tpu.dot_dimension_numbers<[1], [0], [0], [1], [0, 0, 1, 1], [], []>} : vector<2x32xbf16>, vector<32x32xbf16>, vector<2x32xf32> -> vector<2x32xf32>
    %952 = arith.addf %949, %951 : vector<2x32xf32>
    %953 = vector.broadcast %694 : vector<1x32xf32> to vector<2x32xf32>
    %954 = arith.addf %952, %953 : vector<2x32xf32>
    %955 = math.tanh %954 : vector<2x32xf32>
    %c6_186 = arith.constant 6 : index
    %c0_187 = arith.constant 0 : index
    %956 = vector.load %arg5[%c6_186, %c0_187] : memref<16x32xf32, #tpu.memory_space<vmem>>, vector<2x32xf32>
    tpu.vector_store %arg5[%c6_186, %c0_187], %955 {strides = array<i32>} : memref<16x32xf32, #tpu.memory_space<vmem>>, vector<2x32xf32>,
    %957 = arith.truncf %955 : vector<2x32xf32> to vector<2x32xbf16>
    %cst_188 = arith.constant dense<0.000000e+00> : vector<2x96xf32>
    %958 = tpu.matmul %957, %688, %cst_188 {dimension_numbers = #tpu.dot_dimension_numbers<[1], [0], [0], [1], [0, 0, 1, 1], [], []>} : vector<2x32xbf16>, vector<32x96xbf16>, vector<2x96xf32> -> vector<2x96xf32>
    %959 = vector.broadcast %692 : vector<1x96xf32> to vector<2x96xf32>
    %960 = arith.addf %958, %959 : vector<2x96xf32>
    %961 = vector.extract_strided_slice %61 {offsets = [8, 0], sizes = [2, 96], strides = [1, 1]} : vector<12x96xf32> to vector<2x96xf32>
    %962 = vector.extract_strided_slice %961 {offsets = [0, 0], sizes = [2, 32], strides = [1, 1]} : vector<2x96xf32> to vector<2x32xf32>
    %963 = vector.extract_strided_slice %960 {offsets = [0, 0], sizes = [2, 32], strides = [1, 1]} : vector<2x96xf32> to vector<2x32xf32>
    %964 = arith.addf %962, %963 : vector<2x32xf32>
    %965 = arith.negf %964 : vector<2x32xf32>
    %966 = math.exp %965 : vector<2x32xf32>
    %cst_189 = arith.constant 1.000000e+00 : f32
    %967 = vector.broadcast %cst_189 : f32 to vector<2x32xf32>
    %968 = arith.addf %967, %966 : vector<2x32xf32>
    %969 = arith.divf %967, %968 : vector<2x32xf32>
    %970 = vector.extract_strided_slice %961 {offsets = [0, 32], sizes = [2, 32], strides = [1, 1]} : vector<2x96xf32> to vector<2x32xf32>
    %971 = vector.extract_strided_slice %960 {offsets = [0, 32], sizes = [2, 32], strides = [1, 1]} : vector<2x96xf32> to vector<2x32xf32>
    %972 = arith.addf %970, %971 : vector<2x32xf32>
    %973 = arith.negf %972 : vector<2x32xf32>
    %974 = math.exp %973 : vector<2x32xf32>
    %cst_190 = arith.constant 1.000000e+00 : f32
    %975 = vector.broadcast %cst_190 : f32 to vector<2x32xf32>
    %976 = arith.addf %975, %974 : vector<2x32xf32>
    %977 = arith.divf %975, %976 : vector<2x32xf32>
    %978 = vector.extract_strided_slice %961 {offsets = [0, 64], sizes = [2, 32], strides = [1, 1]} : vector<2x96xf32> to vector<2x32xf32>
    %979 = vector.extract_strided_slice %960 {offsets = [0, 64], sizes = [2, 32], strides = [1, 1]} : vector<2x96xf32> to vector<2x32xf32>
    %980 = arith.mulf %969, %979 : vector<2x32xf32>
    %981 = arith.addf %978, %980 : vector<2x32xf32>
    %982 = math.tanh %981 : vector<2x32xf32>
    %cst_191 = arith.constant 1.000000e+00 : f32
    %983 = vector.broadcast %cst_191 : f32 to vector<2x32xf32>
    %984 = arith.subf %983, %977 : vector<2x32xf32>
    %985 = arith.mulf %984, %982 : vector<2x32xf32>
    %986 = arith.mulf %977, %955 : vector<2x32xf32>
    %987 = arith.addf %985, %986 : vector<2x32xf32>
    %988 = arith.truncf %987 : vector<2x32xf32> to vector<2x32xbf16>
    %cst_192 = arith.constant dense<0.000000e+00> : vector<2x32xf32>
    %989 = tpu.matmul %988, %689, %cst_192 {dimension_numbers = #tpu.dot_dimension_numbers<[1], [0], [0], [1], [0, 0, 1, 1], [], []>} : vector<2x32xbf16>, vector<32x32xbf16>, vector<2x32xf32> -> vector<2x32xf32>
    %990 = vector.broadcast %693 : vector<1x32xf32> to vector<2x32xf32>
    %991 = arith.addf %989, %990 : vector<2x32xf32>
    %992 = arith.truncf %991 : vector<2x32xf32> to vector<2x32xbf16>
    %cst_193 = arith.constant dense<0.000000e+00> : vector<2x16xf32>
    %993 = tpu.matmul %992, %697, %cst_193 {dimension_numbers = #tpu.dot_dimension_numbers<[1], [0], [0], [1], [0, 0, 1, 1], [], []>} : vector<2x32xbf16>, vector<32x16xbf16>, vector<2x16xf32> -> vector<2x16xf32>
    %cst_194 = arith.constant -1.000000e+30 : f32
    %994 = vector.broadcast %cst_194 : f32 to vector<2x16xf32>
    %995 = arith.select %716, %993, %994 : vector<2x16xi1>, vector<2x16xf32>
    %cst_195 = arith.constant dense<0xFF800000> : vector<2xf32>
    %996 = vector.multi_reduction <maximumf>, %995, %cst_195 [1] : vector<2x16xf32> to vector<2xf32>
    %997 = vector.shape_cast %996 : vector<2xf32> to vector<2x1xf32>
    %998 = vector.broadcast %997 : vector<2x1xf32> to vector<2x16xf32>
    %999 = arith.subf %995, %998 : vector<2x16xf32>
    %1000 = math.exp %999 : vector<2x16xf32>
    %cst_196 = arith.constant dense<0.000000e+00> : vector<2xf32>
    %1001 = vector.multi_reduction <add>, %1000, %cst_196 [1] : vector<2x16xf32> to vector<2xf32>
    %1002 = vector.shape_cast %1001 : vector<2xf32> to vector<2x1xf32>
    %1003 = tpu.reciprocal %1002 {approx = true} : vector<2x1xf32> -> vector<2x1xf32>
    %1004 = vector.broadcast %1003 : vector<2x1xf32> to vector<2x16xf32>
    %1005 = arith.mulf %1000, %1004 : vector<2x16xf32>
    %1006 = arith.truncf %1005 : vector<2x16xf32> to vector<2x16xbf16>
    %cst_197 = arith.constant dense<0.000000e+00> : vector<2x32xf32>
    %1007 = tpu.matmul %1006, %695, %cst_197 {dimension_numbers = #tpu.dot_dimension_numbers<[1], [0], [0], [1], [0, 0, 1, 1], [], []>} : vector<2x16xbf16>, vector<16x32xbf16>, vector<2x32xf32> -> vector<2x32xf32>
    %1008 = arith.truncf %1007 : vector<2x32xf32> to vector<2x32xbf16>
    %cst_198 = arith.constant dense<0.000000e+00> : vector<2x32xf32>
    %1009 = tpu.matmul %1008, %690, %cst_198 {dimension_numbers = #tpu.dot_dimension_numbers<[1], [0], [0], [1], [0, 0, 1, 1], [], []>} : vector<2x32xbf16>, vector<32x32xbf16>, vector<2x32xf32> -> vector<2x32xf32>
    %1010 = arith.truncf %987 : vector<2x32xf32> to vector<2x32xbf16>
    %cst_199 = arith.constant dense<0.000000e+00> : vector<2x32xf32>
    %1011 = tpu.matmul %1010, %691, %cst_199 {dimension_numbers = #tpu.dot_dimension_numbers<[1], [0], [0], [1], [0, 0, 1, 1], [], []>} : vector<2x32xbf16>, vector<32x32xbf16>, vector<2x32xf32> -> vector<2x32xf32>
    %1012 = arith.addf %1009, %1011 : vector<2x32xf32>
    %1013 = vector.broadcast %694 : vector<1x32xf32> to vector<2x32xf32>
    %1014 = arith.addf %1012, %1013 : vector<2x32xf32>
    %1015 = math.tanh %1014 : vector<2x32xf32>
    %c8_200 = arith.constant 8 : index
    %c0_201 = arith.constant 0 : index
    %1016 = vector.load %arg5[%c8_200, %c0_201] : memref<16x32xf32, #tpu.memory_space<vmem>>, vector<2x32xf32>
    tpu.vector_store %arg5[%c8_200, %c0_201], %1015 {strides = array<i32>} : memref<16x32xf32, #tpu.memory_space<vmem>>, vector<2x32xf32>,
    %1017 = arith.truncf %1015 : vector<2x32xf32> to vector<2x32xbf16>
    %cst_202 = arith.constant dense<0.000000e+00> : vector<2x96xf32>
    %1018 = tpu.matmul %1017, %688, %cst_202 {dimension_numbers = #tpu.dot_dimension_numbers<[1], [0], [0], [1], [0, 0, 1, 1], [], []>} : vector<2x32xbf16>, vector<32x96xbf16>, vector<2x96xf32> -> vector<2x96xf32>
    %1019 = vector.broadcast %692 : vector<1x96xf32> to vector<2x96xf32>
    %1020 = arith.addf %1018, %1019 : vector<2x96xf32>
    %1021 = vector.extract_strided_slice %61 {offsets = [10, 0], sizes = [2, 96], strides = [1, 1]} : vector<12x96xf32> to vector<2x96xf32>
    %1022 = vector.extract_strided_slice %1021 {offsets = [0, 0], sizes = [2, 32], strides = [1, 1]} : vector<2x96xf32> to vector<2x32xf32>
    %1023 = vector.extract_strided_slice %1020 {offsets = [0, 0], sizes = [2, 32], strides = [1, 1]} : vector<2x96xf32> to vector<2x32xf32>
    %1024 = arith.addf %1022, %1023 : vector<2x32xf32>
    %1025 = arith.negf %1024 : vector<2x32xf32>
    %1026 = math.exp %1025 : vector<2x32xf32>
    %cst_203 = arith.constant 1.000000e+00 : f32
    %1027 = vector.broadcast %cst_203 : f32 to vector<2x32xf32>
    %1028 = arith.addf %1027, %1026 : vector<2x32xf32>
    %1029 = arith.divf %1027, %1028 : vector<2x32xf32>
    %1030 = vector.extract_strided_slice %1021 {offsets = [0, 32], sizes = [2, 32], strides = [1, 1]} : vector<2x96xf32> to vector<2x32xf32>
    %1031 = vector.extract_strided_slice %1020 {offsets = [0, 32], sizes = [2, 32], strides = [1, 1]} : vector<2x96xf32> to vector<2x32xf32>
    %1032 = arith.addf %1030, %1031 : vector<2x32xf32>
    %1033 = arith.negf %1032 : vector<2x32xf32>
    %1034 = math.exp %1033 : vector<2x32xf32>
    %cst_204 = arith.constant 1.000000e+00 : f32
    %1035 = vector.broadcast %cst_204 : f32 to vector<2x32xf32>
    %1036 = arith.addf %1035, %1034 : vector<2x32xf32>
    %1037 = arith.divf %1035, %1036 : vector<2x32xf32>
    %1038 = vector.extract_strided_slice %1021 {offsets = [0, 64], sizes = [2, 32], strides = [1, 1]} : vector<2x96xf32> to vector<2x32xf32>
    %1039 = vector.extract_strided_slice %1020 {offsets = [0, 64], sizes = [2, 32], strides = [1, 1]} : vector<2x96xf32> to vector<2x32xf32>
    %1040 = arith.mulf %1029, %1039 : vector<2x32xf32>
    %1041 = arith.addf %1038, %1040 : vector<2x32xf32>
    %1042 = math.tanh %1041 : vector<2x32xf32>
    %cst_205 = arith.constant 1.000000e+00 : f32
    %1043 = vector.broadcast %cst_205 : f32 to vector<2x32xf32>
    %1044 = arith.subf %1043, %1037 : vector<2x32xf32>
    %1045 = arith.mulf %1044, %1042 : vector<2x32xf32>
    %1046 = arith.mulf %1037, %1015 : vector<2x32xf32>
    %1047 = arith.addf %1045, %1046 : vector<2x32xf32>
    %1048 = arith.truncf %1047 : vector<2x32xf32> to vector<2x32xbf16>
    %cst_206 = arith.constant dense<0.000000e+00> : vector<2x32xf32>
    %1049 = tpu.matmul %1048, %689, %cst_206 {dimension_numbers = #tpu.dot_dimension_numbers<[1], [0], [0], [1], [0, 0, 1, 1], [], []>} : vector<2x32xbf16>, vector<32x32xbf16>, vector<2x32xf32> -> vector<2x32xf32>
    %1050 = vector.broadcast %693 : vector<1x32xf32> to vector<2x32xf32>
    %1051 = arith.addf %1049, %1050 : vector<2x32xf32>
    %1052 = arith.truncf %1051 : vector<2x32xf32> to vector<2x32xbf16>
    %cst_207 = arith.constant dense<0.000000e+00> : vector<2x16xf32>
    %1053 = tpu.matmul %1052, %697, %cst_207 {dimension_numbers = #tpu.dot_dimension_numbers<[1], [0], [0], [1], [0, 0, 1, 1], [], []>} : vector<2x32xbf16>, vector<32x16xbf16>, vector<2x16xf32> -> vector<2x16xf32>
    %cst_208 = arith.constant -1.000000e+30 : f32
    %1054 = vector.broadcast %cst_208 : f32 to vector<2x16xf32>
    %1055 = arith.select %716, %1053, %1054 : vector<2x16xi1>, vector<2x16xf32>
    %cst_209 = arith.constant dense<0xFF800000> : vector<2xf32>
    %1056 = vector.multi_reduction <maximumf>, %1055, %cst_209 [1] : vector<2x16xf32> to vector<2xf32>
    %1057 = vector.shape_cast %1056 : vector<2xf32> to vector<2x1xf32>
    %1058 = vector.broadcast %1057 : vector<2x1xf32> to vector<2x16xf32>
    %1059 = arith.subf %1055, %1058 : vector<2x16xf32>
    %1060 = math.exp %1059 : vector<2x16xf32>
    %cst_210 = arith.constant dense<0.000000e+00> : vector<2xf32>
    %1061 = vector.multi_reduction <add>, %1060, %cst_210 [1] : vector<2x16xf32> to vector<2xf32>
    %1062 = vector.shape_cast %1061 : vector<2xf32> to vector<2x1xf32>
    %1063 = tpu.reciprocal %1062 {approx = true} : vector<2x1xf32> -> vector<2x1xf32>
    %1064 = vector.broadcast %1063 : vector<2x1xf32> to vector<2x16xf32>
    %1065 = arith.mulf %1060, %1064 : vector<2x16xf32>
    %1066 = arith.truncf %1065 : vector<2x16xf32> to vector<2x16xbf16>
    %cst_211 = arith.constant dense<0.000000e+00> : vector<2x32xf32>
    %1067 = tpu.matmul %1066, %695, %cst_211 {dimension_numbers = #tpu.dot_dimension_numbers<[1], [0], [0], [1], [0, 0, 1, 1], [], []>} : vector<2x16xbf16>, vector<16x32xbf16>, vector<2x32xf32> -> vector<2x32xf32>
    %1068 = arith.truncf %1067 : vector<2x32xf32> to vector<2x32xbf16>
    %cst_212 = arith.constant dense<0.000000e+00> : vector<2x32xf32>
    %1069 = tpu.matmul %1068, %690, %cst_212 {dimension_numbers = #tpu.dot_dimension_numbers<[1], [0], [0], [1], [0, 0, 1, 1], [], []>} : vector<2x32xbf16>, vector<32x32xbf16>, vector<2x32xf32> -> vector<2x32xf32>
    %1070 = arith.truncf %1047 : vector<2x32xf32> to vector<2x32xbf16>
    %cst_213 = arith.constant dense<0.000000e+00> : vector<2x32xf32>
    %1071 = tpu.matmul %1070, %691, %cst_213 {dimension_numbers = #tpu.dot_dimension_numbers<[1], [0], [0], [1], [0, 0, 1, 1], [], []>} : vector<2x32xbf16>, vector<32x32xbf16>, vector<2x32xf32> -> vector<2x32xf32>
    %1072 = arith.addf %1069, %1071 : vector<2x32xf32>
    %1073 = vector.broadcast %694 : vector<1x32xf32> to vector<2x32xf32>
    %1074 = arith.addf %1072, %1073 : vector<2x32xf32>
    %1075 = math.tanh %1074 : vector<2x32xf32>
    %c10_214 = arith.constant 10 : index
    %c0_215 = arith.constant 0 : index
    %1076 = vector.load %arg5[%c10_214, %c0_215] : memref<16x32xf32, #tpu.memory_space<vmem>>, vector<2x32xf32>
    tpu.vector_store %arg5[%c10_214, %c0_215], %1075 {strides = array<i32>} : memref<16x32xf32, #tpu.memory_space<vmem>>, vector<2x32xf32>,
    %1077 = vector.extract_strided_slice %687 {offsets = [0, 64], sizes = [32, 32], strides = [1, 1]} : vector<32x96xbf16> to vector<32x32xbf16>
    %1078 = vector.extract_strided_slice %1 {offsets = [7, 64], sizes = [1, 32], strides = [1, 1]} : vector<8x96xf32> to vector<1x32xf32>
    %c0_216 = arith.constant 0 : index
    %c0_217 = arith.constant 0 : index
    %1079 = vector.load %arg5[%c0_216, %c0_217] : memref<16x32xf32, #tpu.memory_space<vmem>>, vector<12x32xf32>
    %1080 = arith.truncf %1079 : vector<12x32xf32> to vector<12x32xbf16>
    %cst_218 = arith.constant dense<0.000000e+00> : vector<12x32xf32>
    %1081 = tpu.matmul %1080, %1077, %cst_218 {dimension_numbers = #tpu.dot_dimension_numbers<[1], [0], [0], [1], [0, 0, 1, 1], [], []>} : vector<12x32xbf16>, vector<32x32xbf16>, vector<12x32xf32> -> vector<12x32xf32>
    %1082 = vector.broadcast %1078 : vector<1x32xf32> to vector<12x32xf32>
    %1083 = arith.addf %1081, %1082 : vector<12x32xf32>
    %c0_219 = arith.constant 0 : index
    %c0_220 = arith.constant 0 : index
    %1084 = vector.load %arg3[%c0_219, %c0_220] : memref<12x32xf32, #tpu.memory_space<vmem>>, vector<12x32xf32>
    tpu.vector_store %arg3[%c0_219, %c0_220], %1083 {strides = array<i32>} : memref<12x32xf32, #tpu.memory_space<vmem>>, vector<12x32xf32>,
    return
  }
}

</mosaic_0001>

<bundles_post_ra>
// kernel: paragraph_level_generation_forward.1
= control target key start
LH: loop header
LB: loop body
LE: loop exit
PB: predicated region body
PF: predicated region fallthrough
CT: control target
= control target key end

     0   :  { %v3159_v0 = vmov 1   ;;  %v3160_v1 = vmov 0   ;;  %v3161_v4 = vmov 2   ;;  %v3162_v7 = vmov 3   ;;  %s3164_s4 = smov 64   ;;  %s3166_s5 = smov 96   ;;  %s3970_s0 = inlined_call_operand.vmem [shape: s32[16,8], index: 0, kind: input, shape index: {}]   ;;  %s3971_s1 = inlined_call_operand.vmem [shape: bf16[336,96], index: 1, kind: input, shape index: {}]   ;;  %s3972_s2 = inlined_call_operand.vmem [shape: f32[8,96], index: 2, kind: input, shape index: {}]   ;;  %s3973_s3 = inlined_call_operand.vmem [shape: f32[12,32], index: 3, kind: output, shape index: {}]  }
   0x1   :  { %2958 = vset.pattern.permute.xlu1 %v3159_v0  ;;  %2957 = vset.pattern.permute.xlu0 %v3160_v1  ;;  %v3192_v2 = vld [vmem:[%s3970_s0] sm:$0xff]  ;;  %v3197_v3 = vld [vmem:[%s3971_s1 + $0x30] sm:$0xff]  ;;  %v3205_v5 = vld [vmem:[%s3971_s1 + $0x28] sm:$0xff]  ;;  %v18_v13 = vlaneseq  ;;  %v3976_v22 = vmov 0  ;;  %v3163_v29 = vmov 0.0   ;;  %v3165_v56 = vmov 4  }
   0x2   :  { %36 = vperm.xlu1 %2958, %v3192_v2   ;;  %22 = vperm.xlu0 %2957, %v3192_v2   ;;  %v3211_v6 = vld [vmem:[%s3970_s0 + $0x8] sm:$0xff]  ;;  %v2931_v8 = vld [vmem:[%s3971_s1 + $0x20] sm:$0xff]  ;;  %v2930_v9 = vld [vmem:[%s3971_s1 + $0x18] sm:$0xff]  ;;  %s3167_s13 = smov 32  }
   0x3   :  { %2959 = vset.pattern.permute.xlu2 %v3161_v4  ;;  %223 = vmatpush.bf16.msra.mxu2 %v3197_v3  ;;  %v2929_v10 = vld [vmem:[%s3971_s1 + $0x10] sm:$0xff]  ;;  %v2928_v11 = vld [vmem:[%s3971_s1 + $0x8] sm:$0xff]  ;;  %v2927_v12 = vld [vmem:[%s3971_s1] sm:$0xff]  ;;  %v3238_v14 = vand.u32 127, %v18_v13 }
   0x4   :  { %52 = vperm.xlu2 %2959, %v3192_v2   ;;  %143 = vmatpush.bf16.msra.mxu0 %v2931_v8  ;;  %v3268_v28 = vld [vmem:[%s3972_s2] sm:$0xff]  ;;  %v3294_v61 = vld [vmem:[%s3971_s1 + $0x50] sm:$0xff]  ;;  %v2932_v63 = vld [vmem:[%s3971_s1 + $0x58] sm:$0xff] }
   0x5   :  { %v2745_v18 = vadd.s32 4294967260, %v3238_v14  ;;  %vm47_vm0 = vcmp.ge.s32.totalorder %v3238_v14, 36  ;;  %vm48_vm1 = vcmp.lt.s32.totalorder %v3238_v14, 68  ;;  %v2744_v19 = vadd.s32 4294967264, %v3238_v14  ;;  %v2933_v60 = vld [vmem:[%s3971_s1 + $0x60] sm:$0xff]  ;;  %v3309_v0 = vld [vmem:[%s3971_s1 + $0x38] sm:$0xff] }
   0x6   :  { %vm31_vm2 = vcmp.ge.s32.totalorder %v3238_v14, 32  ;;  %vm32_vm3 = vcmp.lt.s32.totalorder %v3238_v14, 36  ;;  %vm3246_vm4 = vmand %vm47_vm0, %vm48_vm1  ;;  %vm20_vm9 = vcmp.lt.s32.totalorder %v3238_v14, 32  ;;  %v2746_v25 = vadd.s32 4294967228, %v3238_v14  ;;  %v3299_v62 = vld [vmem:[%s3971_s1 + $0x40] sm:$0xff]  ;;  %181 = vmatpush.bf16.msra.mxu1 %v2933_v60 }
   0x7   :  { %224 = vmatpush.bf16.msra.mxu2 %v3205_v5  ;;  %vm33_vm6 = vmand %vm31_vm2, %vm32_vm3  ;;  %v3273_v32 = vperm.slane %v3268_v28, 1  ;;  %v105_v37 = vperm.slane %v3268_v28, 0  ;;  %295 = vmatpush.bf16.msra.mxu3 %v3299_v62  ;;  %v3352_v20 = vperm.slane %v3268_v28, 3 }
   0x8   :  { %144 = vmatpush.bf16.msra.mxu0 %v2930_v9 }
   0xa   :  { %39 = vperm.xlu1 %2958, %v3211_v6   ;;  %25 = vperm.xlu0 %2957, %v3211_v6  }
   0xb   :  { %379 = vmatpush.bf16.msrb.mxu2 %v3197_v3  ;;  %182 = vmatpush.bf16.msra.mxu1 %v2932_v63 }
   0xc   :  { %225 = vmatmul.bf16.vlgmr.msra.gmra.mxu2 %v3160_v1  ;;  %55 = vperm.xlu2 %2959, %v3211_v6  }
   0xd   :  { %145 = vmatpush.bf16.msra.mxu0 %v2929_v10  ;;  %296 = vmatpush.bf16.msra.mxu3 %v3309_v0 }
   0xf   :  { %380 = vmatpush.bf16.msrb.mxu2 %v3205_v5  ;;  %321 = vmatpush.bf16.msrb.mxu1 %v3294_v61 }
  0x11   :  { %146 = vmatpush.bf16.msra.mxu0 %v2928_v11  ;;  %444 = vmatpush.bf16.msrb.mxu3 %v3299_v62 }
  0x12   :  { %2961 = vset.pattern.permute.xlu1 %v3162_v7  ;;  %2960 = vset.pattern.permute.xlu0 %v3162_v7 }
  0x13   :  { %69 = vperm.xlu1 %2961, %v3211_v6   ;;  %66 = vperm.xlu0 %2960, %v3192_v2  }
  0x14   :  { %586 = vmatpush.bf16.msra.mxu2 %v3299_v62 }
  0x15   :  { %147 = vmatpush.bf16.msra.mxu0 %v2927_v12  ;;  %445 = vmatpush.bf16.msrb.mxu3 %v3309_v0 }
  0x18   :  { %587 = vmatpush.bf16.msra.mxu2 %v3309_v0 }
  0x19   :  { %464 = vmatpush.bf16.msrb.mxu0 %v3294_v61 }
  0x1b   :  { %2963 = vset.pattern.permute.xlu1 %v3165_v56  ;;  %2962 = vset.pattern.permute.xlu0 %v3165_v56 }
  0x1c   :  { %83 = vperm.xlu0 %2962, %v3192_v2   ;;  %v3315_v2 = vld [vmem:[%s3971_s1 + $0x48] sm:$0xff] }
  0x1d   :  { %465 = vmatpush.bf16.msrb.mxu0 %v3315_v2  ;;  %322 = vmatpush.bf16.msrb.mxu1 %v3315_v2 }
  0x5e   :  { %v53_v15 = vpop.permute.xlu2 %52 }
  0x5f   :  { %vm57_vm5 = vcmp.eq.s32.totalorder %v53_v15, %v2745_v18 }
  0x60   :  { %vm3254_vm10 = vmand %vm3246_vm4, %vm57_vm5 }
  0x61   :  { %v3977_v22 = vsel %vm3254_vm10, 4294967295, %v3976_v22  ;;  %vm63_vm10 = vcmp.ge.s32.totalorder %v3238_v14, 68 }
  0x66   :  { %v56_v21 = vpop.permute.xlu2 %55 }
  0x67   :  { %vm58_vm14 = vcmp.eq.s32.totalorder %v56_v21, %v2745_v18 }
  0x68   :  { %vm60_vm2 = vmand %vm3246_vm4, %vm58_vm14 }
  0x74   :  { %v37_v16 = vpop.permute.xlu1 %36  ;;  %v23_v17 = vpop.permute.xlu0 %22 }
  0x75   :  { %vm41_vm7 = vcmp.eq.s32.totalorder %v37_v16, %v2744_v19  ;;  %vm27_vm8 = vcmp.eq.s32.totalorder %v23_v17, %v3238_v14 }
  0x76   :  { %vm43_vm11 = vmand %vm33_vm6, %vm41_vm7  ;;  %vm3978_vm7 = vnez %v3977_v22 }
  0x77   :  { %vm29_vm15 = vmand %vm20_vm9, %vm27_vm8 }
  0x78   :  { %vm45_vm3 = vmor %vm29_vm15, %vm43_vm11  ;;  %vm136_vm15 = vcmask 654336  }
  0x79   :  { %vm61_vm8 = vmor %vm45_vm3, %vm3978_vm7  ;;  %vm171_vm7 = vcmask 261120  }
  0x7c   :  { %v40_v23 = vpop.permute.xlu1 %39  ;;  %v26_v24 = vpop.permute.xlu0 %25 }
  0x7d   :  { %vm42_vm12 = vcmp.eq.s32.totalorder %v40_v23, %v2744_v19  ;;  %vm28_vm13 = vcmp.eq.s32.totalorder %v26_v24, %v3238_v14  ;;  %v3357_v24 = vperm.slane %v3268_v28, 2 }
  0x7e   :  { %vm44_vm0 = vmand %vm33_vm6, %vm42_vm12 }
  0x7f   :  { %vm30_vm1 = vmand %vm20_vm9, %vm28_vm13 }
  0x80   :  { %vm46_vm5 = vmor %vm30_vm1, %vm44_vm0 }
  0x81   :  { %vm62_vm6 = vmor %vm46_vm5, %vm60_vm2 }
  0x85   :  { %v70_v26 = vpop.permute.xlu1 %69  ;;  %v67_v27 = vpop.permute.xlu0 %66 }
  0x86   :  { %vm72_vm12 = vcmp.eq.s32.totalorder %v70_v26, %v2746_v25  ;;  %vm71_vm9 = vcmp.eq.s32.totalorder %v67_v27, %v2746_v25 }
  0x87   :  { %vm74_vm13 = vmand %vm63_vm10, %vm72_vm12 }
  0x88   :  { %vm76_vm4 = vmor %vm62_vm6, %vm74_vm13 }
  0x89   :  { %v2748_v30 = vsel %vm76_vm4, 1.0, %v3163_v29  ;;  %vm73_vm11 = vmand %vm63_vm10, %vm71_vm9 }
  0x8a   :  { %vm75_vm14 = vmor %vm61_vm8, %vm73_vm11 }
  0x8b   :  { %v2747_v31 = vsel %vm75_vm14, 1.0, %v3163_v29 }
  0x8c   :  { %v81_v33 = vpack.c.bf16 %v2748_v30, %v2747_v31 }
  0x8e   :  { %2771 = vmatmul.msk.bf16.vlgmr.msra.gmra.mxu0 %vm136_vm15, %v81_v33 }
  0x8f   :  { %v226_v34 = vpop.f32.mrf.mxu2  ;;  %663 = vmatpush.bf16.msra.mxu0 %v3197_v3 }
  0x90   :  { %v227_v35 = vadd.f32 %v226_v34, %v3273_v32 }
  0x92   :  { %251 = vrot.lane.b32.xlu2 %v227_v35, %s3164_s4 }
  0x93   :  { %664 = vmatpush.bf16.msra.mxu0 %v3205_v5 }
  0x97   :  { %v228_v36 = vpop.f32.mrf.mxu2 }
  0xec   :  { %v252_v51 = vpop.permute.xlu2 %251 }
 0x10b   :  { %v149_v38 = vpop.f32.mrf.mxu0 }
 0x10c   :  { %v3280_v39 = vadd.f32 %v149_v38, %v105_v37 }
 0x10e   :  { %v230_v40 = vadd.f32 %v227_v35, %v3280_v39 }
 0x110   :  { %v2789_v41 = vmul.f32 -1.442695, %v230_v40 }
 0x112   :  { %2964 = vpow2.f32 %v2789_v41 }
 0x118   :  { %v2965_v42 = vpop.eup %2964 }
 0x119   :  { %v234_v43 = vadd.f32 1.0, %v2965_v42 }
 0x11b   :  { %2966 = vrcp.f32 %v234_v43  ;;  %v246_v47 = vand.u32 2147483648, %v234_v43  ;;  %v244_v49 = vand.u32 2147483647, %v234_v43  ;;  %vm240_vm0 = vweird.f32 %v234_v43 }
 0x11d   :  { %v247_v52 = vor.u32 1.1754944e-38, %v246_v47  ;;  %vm245_vm2 = vcmp.eq.f32.partialorder %v244_v49, 8.507059e+37 }
 0x121   :  { %v2967_v44 = vpop.eup %2966 }
 0x122   :  { %v236_v45 = vmul.f32 %v2967_v44, %v234_v43  ;;  %vm241_vm10 = vweird.f32 %v2967_v44 }
 0x123   :  { %vm242_vm1 = vmor %vm240_vm0, %vm241_vm10 }
 0x124   :  { %v237_v46 = vsub.f32 1.0, %v236_v45 }
 0x126   :  { %v238_v48 = vmul.f32 %v2967_v44, %v237_v46 }
 0x128   :  { %v239_v50 = vadd.f32 %v2967_v44, %v238_v48 }
 0x12a   :  { %v243_v53 = vsel %vm242_vm1, %v2967_v44, %v239_v50 }
 0x12b   :  { %v248_v54 = vsel %vm245_vm2, %v247_v52, %v243_v53 }
 0x12c   :  { %v254_v55 = vmul.f32 %v252_v51, %v248_v54  ;;  %v261_v10 = vsub.f32 1.0, %v248_v54  ;;  %v267_v12 = vmul.f32 0.0, %v248_v54 }
 0x12e   :  { %256 = vrot.lane.b32.xlu1 %v254_v55, %s3164_s4 }
 0x136   :  { %86 = vperm.xlu1 %2963, %v3211_v6   ;;  %v84_v6 = vpop.permute.xlu0 %83 }
 0x137   :  { %vm88_vm5 = vcmp.eq.s32.totalorder %v84_v6, %v3238_v14 }
 0x138   :  { %v2749_v8 = vsel %vm88_vm5, 1.0, %v3163_v29 }
 0x1a0   :  { %v257_v57 = vpop.permute.xlu1 %256 }
 0x1a1   :  { %v259_v58 = vadd.f32 %v257_v57, %v3280_v39 }
 0x1a3   :  { %2968 = vtanh.f32 %v259_v58 }
 0x1a8   :  { %v87_v4 = vpop.permute.xlu1 %86 }
 0x1a9   :  { %v2969_v59 = vpop.eup %2968  ;;  %vm89_vm3 = vcmp.eq.s32.totalorder %v87_v4, %v3238_v14 }
 0x1aa   :  { %263 = vrot.lane.b32.xlu2 %v2969_v59, %s3166_s5  ;;  %v2750_v7 = vsel %vm89_vm3, 1.0, %v3163_v29 }
 0x1ab   :  { %v94_v9 = vpack.c.bf16 %v2750_v7, %v2749_v8 }
 0x1ad   :  { %2780 = vmatmul.msk.bf16.vlgmr.msra.gmra.mxu1 %vm171_vm7, %v94_v9 }
 0x1ae   :  { %521 = vmatpush.bf16.msra.mxu1 %v3197_v3 }
 0x1b2   :  { %522 = vmatpush.bf16.msra.mxu1 %v3205_v5 }
 0x1bd   :  { %323 = vmatmul.bf16.vlgmr.msrb.gmra.mxu1 %v3160_v1 }
 0x1be   :  { %728 = vmatpush.bf16.msrb.mxu1 %v3299_v62 }
 0x1c2   :  { %729 = vmatpush.bf16.msrb.mxu1 %v3309_v0 }
 0x204   :  { %v264_v11 = vpop.permute.xlu2 %263 }
 0x205   :  { %v266_v15 = vmul.f32 %v264_v11, %v261_v10 }
 0x207   :  { %v3333_v16 = vadd.f32 %v267_v12, %v266_v15 }
 0x209   :  { %v269_v17 = vpack.c.bf16 %v3333_v16, %v3333_v16 }
 0x20b   :  { %272 = vrot.lane.b32.xlu2 %v269_v17, %s3166_s5 }
 0x22a   :  { %v3347_v19 = vpop.f32.mrf.mxu1 }
 0x232   :  { %v3349_v1 = vpop.f32.mrf.mxu1 }
 0x23a   :  { %v324_v21 = vpop.f32.mrf.mxu1 }
 0x23b   :  { %v325_v22 = vadd.f32 %v324_v21, %v3352_v20 }
 0x23d   :  { %349 = vrot.lane.b32.xlu2 %v325_v22, %s3164_s4 }
 0x242   :  { %v326_v23 = vpop.f32.mrf.mxu1 }
 0x265   :  { %v273_v18 = vpop.permute.xlu2 %272 }
 0x266   :  { %2798 = vmatmul.msk.bf16.vlgmr.msra.gmra.mxu3 %vm171_vm7, %v273_v18  ;;  %2808 = vmatmul.msk.bf16.vlgmr.msrb.gmra.mxu2 %vm171_vm7, %v273_v18 }
 0x267   :  { %606 = vmatpush.bf16.msra.mxu3 %v3294_v61  ;;  %748 = vmatpush.bf16.msrb.mxu2 %v3294_v61 }
 0x26b   :  { %607 = vmatpush.bf16.msra.mxu3 %v3315_v2  ;;  %749 = vmatpush.bf16.msrb.mxu2 %v3315_v2 }
 0x297   :  { %v350_v47 = vpop.permute.xlu2 %349 }
 0x2e9   :  { %v298_v25 = vpop.f32.mrf.mxu3  ;;  %v382_v26 = vpop.f32.mrf.mxu2 }
 0x2ea   :  { %v299_v27 = vadd.f32 %v298_v25, %v3357_v24  ;;  %v383_v29 = vadd.f32 %v382_v26, %v3273_v32 }
 0x2ec   :  { %v328_v30 = vadd.f32 %v325_v22, %v299_v27  ;;  %v387_v31 = vrot.slane %v383_v29, 6 }
 0x2ee   :  { %v2807_v33 = vmul.f32 -1.442695, %v328_v30  ;;  %409 = vrot.lane.b32.xlu1 %v387_v31, %s3164_s4  ;;  %v389_v52 = vadd.f32 %v387_v31, %v3280_v39  ;;  %v426_v30 = vrot.slane %v3333_v16, 6 }
 0x2f0   :  { %2970 = vpow2.f32 %v2807_v33  ;;  %v2809_v53 = vmul.f32 -1.442695, %v389_v52 }
 0x2f1   :  { %v300_v34 = vpop.f32.mrf.mxu3  ;;  %v384_v35 = vpop.f32.mrf.mxu2 }
 0x2f6   :  { %v2971_v36 = vpop.eup %2970 }
 0x2f7   :  { %v332_v38 = vadd.f32 1.0, %v2971_v36 }
 0x2f9   :  { %2972 = vrcp.f32 %v332_v38  ;;  %v344_v43 = vand.u32 2147483648, %v332_v38  ;;  %v342_v45 = vand.u32 2147483647, %v332_v38  ;;  %vm338_vm6 = vweird.f32 %v332_v38 }
 0x2fa   :  { %2974 = vpow2.f32 %v2809_v53 }
 0x2fb   :  { %v345_v48 = vor.u32 1.1754944e-38, %v344_v43  ;;  %vm343_vm9 = vcmp.eq.f32.partialorder %v342_v45, 8.507059e+37 }
 0x2ff   :  { %v2973_v40 = vpop.eup %2972 }
 0x300   :  { %v334_v41 = vmul.f32 %v2973_v40, %v332_v38  ;;  %vm339_vm8 = vweird.f32 %v2973_v40  ;;  %v2975_v54 = vpop.eup %2974 }
 0x301   :  { %vm340_vm12 = vmor %vm338_vm6, %vm339_vm8  ;;  %v393_v55 = vadd.f32 1.0, %v2975_v54 }
 0x302   :  { %v335_v42 = vsub.f32 1.0, %v334_v41 }
 0x303   :  { %2976 = vrcp.f32 %v393_v55  ;;  %v405_v63 = vand.u32 2147483648, %v393_v55  ;;  %vm399_vm4 = vweird.f32 %v393_v55  ;;  %v403_v4 = vand.u32 2147483647, %v393_v55 }
 0x304   :  { %v336_v44 = vmul.f32 %v2973_v40, %v335_v42  ;;  %v3388_v42 = vpop.f32.mrf.mxu0 }
 0x305   :  { %v406_v7 = vor.u32 1.1754944e-38, %v405_v63  ;;  %vm404_vm14 = vcmp.eq.f32.partialorder %v403_v4, 8.507059e+37 }
 0x306   :  { %v337_v46 = vadd.f32 %v2973_v40, %v336_v44 }
 0x308   :  { %v341_v49 = vsel %vm340_vm12, %v2973_v40, %v337_v46 }
 0x309   :  { %v346_v50 = vsel %vm343_vm9, %v345_v48, %v341_v49  ;;  %v2977_v56 = vpop.eup %2976 }
 0x30a   :  { %v352_v51 = vmul.f32 %v350_v47, %v346_v50  ;;  %v395_v57 = vmul.f32 %v2977_v56, %v393_v55  ;;  %vm400_vm13 = vweird.f32 %v2977_v56  ;;  %v359_v22 = vsub.f32 1.0, %v346_v50 }
 0x30b   :  { %vm401_vm11 = vmor %vm399_vm4, %vm400_vm13  ;;  %v365_v25 = vmul.f32 0.0, %v346_v50 }
 0x30c   :  { %354 = vrot.lane.b32.xlu1 %v352_v51, %s3164_s4  ;;  %v396_v58 = vsub.f32 1.0, %v395_v57 }
 0x30e   :  { %v397_v59 = vmul.f32 %v2977_v56, %v396_v58 }
 0x310   :  { %v398_v60 = vadd.f32 %v2977_v56, %v397_v59 }
 0x312   :  { %v402_v6 = vsel %vm401_vm11, %v2977_v56, %v398_v60 }
 0x313   :  { %v407_v8 = vsel %vm404_vm14, %v406_v7, %v402_v6 }
 0x314   :  { %v419_v31 = vsub.f32 1.0, %v407_v8  ;;  %v428_v34 = vmul.f32 %v426_v30, %v407_v8 }
 0x360   :  { %v410_v9 = vpop.permute.xlu1 %409 }
 0x361   :  { %v412_v10 = vmul.f32 %v410_v9, %v407_v8 }
 0x363   :  { %414 = vrot.lane.b32.xlu0 %v412_v10, %s3164_s4 }
 0x37e   :  { %v355_v11 = vpop.permute.xlu1 %354 }
 0x37f   :  { %v357_v12 = vadd.f32 %v355_v11, %v299_v27 }
 0x381   :  { %2978 = vtanh.f32 %v357_v12 }
 0x387   :  { %v2979_v15 = vpop.eup %2978 }
 0x388   :  { %361 = vrot.lane.b32.xlu0 %v2979_v15, %s3166_s5 }
 0x3d5   :  { %v415_v17 = vpop.permute.xlu0 %414 }
 0x3d6   :  { %v417_v18 = vadd.f32 %v415_v17, %v3280_v39 }
 0x3d8   :  { %2980 = vtanh.f32 %v417_v18 }
 0x3de   :  { %v2981_v21 = vpop.eup %2980 }
 0x3df   :  { %421 = vrot.lane.b32.xlu2 %v2981_v21, %s3166_s5 }
 0x3fa   :  { %v362_v23 = vpop.permute.xlu0 %361 }
 0x3fb   :  { %v364_v26 = vmul.f32 %v362_v23, %v359_v22 }
 0x3fd   :  { %v3368_v29 = vadd.f32 %v365_v25, %v364_v26 }
 0x3ff   :  { %v451_v27 = vpack.c.bf16 %v3368_v29, %v3368_v29 }
 0x401   :  { %453 = vrot.lane.b32.xlu2 %v451_v27, %s3166_s5 }
 0x439   :  { %v422_v33 = vpop.permute.xlu2 %421 }
 0x43a   :  { %v424_v35 = vmul.f32 %v422_v33, %v419_v31 }
 0x43c   :  { %v3374_v36 = vadd.f32 %v428_v34, %v424_v35 }
 0x43e   :  { %v430_v38 = vpack.c.bf16 %v3374_v36, %v3374_v36 }
 0x440   :  { %v432_v40 = vrot.slane %v430_v38, 1 }
 0x442   :  { %433 = vrot.lane.b32.xlu1 %v432_v40, %s3166_s5 }
 0x45b   :  { %v454_v41 = vpop.permute.xlu2 %453 }
 0x45c   :  { %2811 = vmatmul.msk.bf16.vlgmr.msrb.gmra.mxu0 %vm171_vm7, %v454_v41 }
 0x45d   :  { %867 = vmatpush.bf16.msrb.mxu0 %v3299_v62 }
 0x461   :  { %868 = vmatpush.bf16.msrb.mxu0 %v3309_v0 }
 0x4b4   :  { %v434_v16 = vpop.permute.xlu1 %433 }
 0x4b5   :  { %2810 = vmatmul.msk.bf16.vlgmr.msrb.gmra.mxu3 %vm171_vm7, %v434_v16  ;;  %2813 = vmatmul.msk.bf16.vlgmr.msra.gmra.mxu1 %vm171_vm7, %v434_v16 }
 0x4b6   :  { %805 = vmatpush.bf16.msrb.mxu3 %v3197_v3  ;;  %887 = vmatpush.bf16.msra.mxu1 %v3294_v61 }
 0x4ba   :  { %806 = vmatpush.bf16.msrb.mxu3 %v3205_v5  ;;  %888 = vmatpush.bf16.msra.mxu1 %v3315_v2 }
 0x4d9   :  { %v467_v43 = vpop.f32.mrf.mxu0 }
 0x4da   :  { %v468_v44 = vadd.f32 %v467_v43, %v3352_v20 }
 0x4dc   :  { %492 = vrot.lane.b32.xlu1 %v468_v44, %s3164_s4 }
 0x4e1   :  { %v469_v45 = vpop.f32.mrf.mxu0 }
 0x532   :  { %v524_v46 = vpop.f32.mrf.mxu1 }
 0x533   :  { %v525_v47 = vadd.f32 %v524_v46, %v3273_v32 }
 0x535   :  { %v529_v48 = vrot.slane %v525_v47, 4 }
 0x537   :  { %551 = vrot.lane.b32.xlu0 %v529_v48, %s3164_s4  ;;  %v531_v12 = vadd.f32 %v529_v48, %v3280_v39 }
 0x538   :  { %v447_v49 = vpop.f32.mrf.mxu3 }
 0x539   :  { %v448_v50 = vadd.f32 %v447_v49, %v3357_v24  ;;  %v2814_v15 = vmul.f32 -1.442695, %v531_v12 }
 0x53a   :  { %v526_v51 = vpop.f32.mrf.mxu1 }
 0x53b   :  { %v471_v52 = vadd.f32 %v468_v44, %v448_v50 }
 0x53d   :  { %v2812_v53 = vmul.f32 -1.442695, %v471_v52  ;;  %v568_v52 = vrot.slane %v3374_v36, 6 }
 0x53f   :  { %2982 = vpow2.f32 %v2812_v53 }
 0x540   :  { %v449_v54 = vpop.f32.mrf.mxu3 }
 0x545   :  { %v2983_v55 = vpop.eup %2982 }
 0x546   :  { %v475_v56 = vadd.f32 1.0, %v2983_v55 }
 0x548   :  { %2984 = vrcp.f32 %v475_v56  ;;  %v487_v60 = vand.u32 2147483648, %v475_v56  ;;  %v485_v4 = vand.u32 2147483647, %v475_v56  ;;  %vm481_vm10 = vweird.f32 %v475_v56 }
 0x549   :  { %2986 = vpow2.f32 %v2814_v15 }
 0x54a   :  { %v488_v7 = vor.u32 1.1754944e-38, %v487_v60  ;;  %vm486_vm1 = vcmp.eq.f32.partialorder %v485_v4, 8.507059e+37 }
 0x54e   :  { %v2985_v57 = vpop.eup %2984  ;;  %v493_v9 = vpop.permute.xlu1 %492 }
 0x54f   :  { %v477_v58 = vmul.f32 %v2985_v57, %v475_v56  ;;  %vm482_vm15 = vweird.f32 %v2985_v57  ;;  %v2987_v17 = vpop.eup %2986 }
 0x550   :  { %vm483_vm0 = vmor %vm481_vm10, %vm482_vm15  ;;  %v535_v18 = vadd.f32 1.0, %v2987_v17 }
 0x551   :  { %v478_v59 = vsub.f32 1.0, %v477_v58 }
 0x552   :  { %2988 = vrcp.f32 %v535_v18  ;;  %v547_v27 = vand.u32 2147483648, %v535_v18  ;;  %vm541_vm3 = vweird.f32 %v535_v18  ;;  %v545_v30 = vand.u32 2147483647, %v535_v18 }
 0x553   :  { %v479_v63 = vmul.f32 %v2985_v57, %v478_v59 }
 0x554   :  { %v548_v33 = vor.u32 1.1754944e-38, %v547_v27  ;;  %vm546_vm8 = vcmp.eq.f32.partialorder %v545_v30, 8.507059e+37 }
 0x555   :  { %v480_v6 = vadd.f32 %v2985_v57, %v479_v63 }
 0x557   :  { %v484_v8 = vsel %vm483_vm0, %v2985_v57, %v480_v6 }
 0x558   :  { %v489_v10 = vsel %vm486_vm1, %v488_v7, %v484_v8  ;;  %v2989_v21 = vpop.eup %2988 }
 0x559   :  { %v495_v11 = vmul.f32 %v493_v9, %v489_v10  ;;  %v537_v22 = vmul.f32 %v2989_v21, %v535_v18  ;;  %vm542_vm2 = vweird.f32 %v2989_v21  ;;  %v502_v46 = vsub.f32 1.0, %v489_v10 }
 0x55a   :  { %vm543_vm5 = vmor %vm541_vm3, %vm542_vm2  ;;  %v508_v48 = vmul.f32 %v489_v10, %v3368_v29 }
 0x55b   :  { %497 = vrot.lane.b32.xlu0 %v495_v11, %s3164_s4  ;;  %v538_v23 = vsub.f32 1.0, %v537_v22 }
 0x55d   :  { %v539_v25 = vmul.f32 %v2989_v21, %v538_v23 }
 0x55f   :  { %v540_v26 = vadd.f32 %v2989_v21, %v539_v25 }
 0x561   :  { %v544_v31 = vsel %vm543_vm5, %v2989_v21, %v540_v26 }
 0x562   :  { %v549_v34 = vsel %vm546_vm8, %v548_v33, %v544_v31 }
 0x563   :  { %v561_v53 = vsub.f32 1.0, %v549_v34  ;;  %v570_v55 = vmul.f32 %v568_v52, %v549_v34 }
 0x5a9   :  { %v552_v35 = vpop.permute.xlu0 %551 }
 0x5aa   :  { %v554_v38 = vmul.f32 %v552_v35, %v549_v34 }
 0x5ac   :  { %556 = vrot.lane.b32.xlu2 %v554_v38, %s3164_s4 }
 0x5cd   :  { %v498_v40 = vpop.permute.xlu0 %497 }
 0x5ce   :  { %v500_v41 = vadd.f32 %v498_v40, %v448_v50 }
 0x5d0   :  { %2990 = vtanh.f32 %v500_v41 }
 0x5d6   :  { %v2991_v16 = vpop.eup %2990 }
 0x5d7   :  { %504 = vrot.lane.b32.xlu2 %v2991_v16, %s3166_s5 }
 0x606   :  { %v557_v43 = vpop.permute.xlu2 %556 }
 0x607   :  { %v559_v44 = vadd.f32 %v557_v43, %v3280_v39 }
 0x609   :  { %2992 = vtanh.f32 %v559_v44 }
 0x60f   :  { %v2993_v45 = vpop.eup %2992 }
 0x610   :  { %563 = vrot.lane.b32.xlu1 %v2993_v45, %s3166_s5 }
 0x631   :  { %v505_v47 = vpop.permute.xlu2 %504 }
 0x632   :  { %v507_v49 = vmul.f32 %v505_v47, %v502_v46 }
 0x634   :  { %v3402_v51 = vadd.f32 %v508_v48, %v507_v49 }
 0x636   :  { %v593_v50 = vpack.c.bf16 %v3402_v51, %v3402_v51 }
 0x638   :  { %595 = vrot.lane.b32.xlu1 %v593_v50, %s3166_s5 }
 0x682   :  { %v564_v54 = vpop.permute.xlu1 %563 }
 0x683   :  { %v566_v56 = vmul.f32 %v564_v54, %v561_v53 }
 0x685   :  { %v3408_v57 = vadd.f32 %v570_v55, %v566_v56 }
 0x687   :  { %v572_v58 = vpack.c.bf16 %v3408_v57, %v3408_v57  ;;  %v710_v44 = vrot.slane %v3408_v57, 6 }
 0x689   :  { %v574_v59 = vrot.slane %v572_v58, 2 }
 0x68b   :  { %575 = vrot.lane.b32.xlu0 %v574_v59, %s3166_s5 }
 0x6aa   :  { %v596_v60 = vpop.permute.xlu1 %595 }
 0x6ab   :  { %2816 = vmatmul.msk.bf16.vlgmr.msra.gmra.mxu3 %vm171_vm7, %v596_v60 }
 0x6ac   :  { %1009 = vmatpush.bf16.msra.mxu3 %v3299_v62 }
 0x6b0   :  { %1010 = vmatpush.bf16.msra.mxu3 %v3309_v0 }
 0x6fd   :  { %v576_v36 = vpop.permute.xlu0 %575 }
 0x6fe   :  { %2815 = vmatmul.msk.bf16.vlgmr.msra.gmra.mxu2 %vm171_vm7, %v576_v36  ;;  %2818 = vmatmul.msk.bf16.vlgmr.msra.gmra.mxu0 %vm171_vm7, %v576_v36 }
 0x6ff   :  { %944 = vmatpush.bf16.msra.mxu2 %v3197_v3  ;;  %1029 = vmatpush.bf16.msra.mxu0 %v3294_v61 }
 0x703   :  { %945 = vmatpush.bf16.msra.mxu2 %v3205_v5  ;;  %1030 = vmatpush.bf16.msra.mxu0 %v3315_v2 }
 0x72e   :  { %v609_v63 = vpop.f32.mrf.mxu3 }
 0x72f   :  { %v610_v4 = vadd.f32 %v609_v63, %v3352_v20 }
 0x731   :  { %634 = vrot.lane.b32.xlu0 %v610_v4, %s3164_s4 }
 0x736   :  { %v611_v6 = vpop.f32.mrf.mxu3 }
 0x77b   :  { %v666_v7 = vpop.f32.mrf.mxu0 }
 0x77c   :  { %v667_v8 = vadd.f32 %v666_v7, %v3273_v32 }
 0x77e   :  { %v671_v9 = vrot.slane %v667_v8, 2 }
 0x780   :  { %v673_v10 = vadd.f32 %v671_v9, %v3280_v39  ;;  %693 = vrot.lane.b32.xlu2 %v671_v9, %s3164_s4 }
 0x781   :  { %v589_v11 = vpop.f32.mrf.mxu2 }
 0x782   :  { %v2819_v12 = vmul.f32 -1.442695, %v673_v10  ;;  %v590_v15 = vadd.f32 %v589_v11, %v3357_v24 }
 0x783   :  { %v668_v17 = vpop.f32.mrf.mxu0 }
 0x784   :  { %2994 = vpow2.f32 %v2819_v12  ;;  %v613_v18 = vadd.f32 %v610_v4, %v590_v15 }
 0x786   :  { %v2817_v21 = vmul.f32 -1.442695, %v613_v18 }
 0x788   :  { %2996 = vpow2.f32 %v2817_v21 }
 0x789   :  { %v591_v22 = vpop.f32.mrf.mxu2 }
 0x78a   :  { %v2995_v23 = vpop.eup %2994 }
 0x78b   :  { %v677_v25 = vadd.f32 1.0, %v2995_v23 }
 0x78d   :  { %2998 = vrcp.f32 %v677_v25  ;;  %v689_v35 = vand.u32 2147483648, %v677_v25  ;;  %v687_v41 = vand.u32 2147483647, %v677_v25  ;;  %vm683_vm12 = vweird.f32 %v677_v25 }
 0x78e   :  { %v2997_v26 = vpop.eup %2996 }
 0x78f   :  { %v617_v27 = vadd.f32 1.0, %v2997_v26  ;;  %v690_v45 = vor.u32 1.1754944e-38, %v689_v35  ;;  %vm688_vm4 = vcmp.eq.f32.partialorder %v687_v41, 8.507059e+37 }
 0x791   :  { %3000 = vrcp.f32 %v617_v27  ;;  %v629_v48 = vand.u32 2147483648, %v617_v27  ;;  %vm623_vm11 = vweird.f32 %v617_v27  ;;  %v627_v52 = vand.u32 2147483647, %v617_v27 }
 0x793   :  { %v2999_v30 = vpop.eup %2998  ;;  %v630_v55 = vor.u32 1.1754944e-38, %v629_v48  ;;  %vm628_vm15 = vcmp.eq.f32.partialorder %v627_v52, 8.507059e+37 }
 0x794   :  { %v679_v31 = vmul.f32 %v2999_v30, %v677_v25  ;;  %vm684_vm6 = vweird.f32 %v2999_v30 }
 0x795   :  { %vm685_vm9 = vmor %vm683_vm12, %vm684_vm6 }
 0x796   :  { %v680_v33 = vsub.f32 1.0, %v679_v31 }
 0x797   :  { %v3001_v34 = vpop.eup %3000 }
 0x798   :  { %v619_v38 = vmul.f32 %v3001_v34, %v617_v27  ;;  %v681_v40 = vmul.f32 %v2999_v30, %v680_v33  ;;  %vm624_vm13 = vweird.f32 %v3001_v34 }
 0x799   :  { %vm625_vm14 = vmor %vm623_vm11, %vm624_vm13 }
 0x79a   :  { %v620_v16 = vsub.f32 1.0, %v619_v38  ;;  %v682_v43 = vadd.f32 %v2999_v30, %v681_v40 }
 0x79c   :  { %v621_v46 = vmul.f32 %v3001_v34, %v620_v16  ;;  %v686_v47 = vsel %vm685_vm9, %v2999_v30, %v682_v43 }
 0x79d   :  { %v691_v49 = vsel %vm688_vm4, %v690_v45, %v686_v47 }
 0x79e   :  { %v622_v50 = vadd.f32 %v3001_v34, %v621_v46  ;;  %v712_v53 = vmul.f32 %v710_v44, %v691_v49  ;;  %v703_v18 = vsub.f32 1.0, %v691_v49 }
 0x7a0   :  { %v626_v54 = vsel %vm625_vm14, %v3001_v34, %v622_v50 }
 0x7a1   :  { %v631_v56 = vsel %vm628_vm15, %v630_v55, %v626_v54 }
 0x7a2   :  { %v644_v9 = vsub.f32 1.0, %v631_v56  ;;  %v650_v11 = vmul.f32 %v631_v56, %v3402_v51 }
 0x7a3   :  { %v635_v58 = vpop.permute.xlu0 %634 }
 0x7a4   :  { %v637_v59 = vmul.f32 %v635_v58, %v631_v56 }
 0x7a6   :  { %639 = vrot.lane.b32.xlu2 %v637_v59, %s3164_s4  ;;  %v3463_v59 = vadd.f32 %v3388_v42, %v105_v37 }
 0x7da   :  { %v694_v57 = vpop.permute.xlu2 %693 }
 0x7db   :  { %v696_v60 = vmul.f32 %v694_v57, %v691_v49 }
 0x7dd   :  { %698 = vrot.lane.b32.xlu1 %v696_v60, %s3164_s4 }
 0x800   :  { %v640_v36 = vpop.permute.xlu2 %639 }
 0x801   :  { %v642_v63 = vadd.f32 %v640_v36, %v590_v15 }
 0x803   :  { %3002 = vtanh.f32 %v642_v63 }
 0x809   :  { %v3003_v4 = vpop.eup %3002 }
 0x80a   :  { %646 = vrot.lane.b32.xlu1 %v3003_v4, %s3166_s5 }
 0x84f   :  { %v699_v6 = vpop.permute.xlu1 %698 }
 0x850   :  { %v701_v7 = vadd.f32 %v699_v6, %v3280_v39 }
 0x852   :  { %3004 = vtanh.f32 %v701_v7 }
 0x858   :  { %v3005_v8 = vpop.eup %3004 }
 0x859   :  { %705 = vrot.lane.b32.xlu0 %v3005_v8, %s3166_s5 }
 0x87c   :  { %v647_v10 = vpop.permute.xlu1 %646 }
 0x87d   :  { %v649_v12 = vmul.f32 %v647_v10, %v644_v9 }
 0x87f   :  { %v3435_v17 = vadd.f32 %v650_v11, %v649_v12 }
 0x881   :  { %v735_v15 = vpack.c.bf16 %v3435_v17, %v3435_v17 }
 0x883   :  { %737 = vrot.lane.b32.xlu0 %v735_v15, %s3166_s5 }
 0x8cb   :  { %v706_v21 = vpop.permute.xlu0 %705 }
 0x8cc   :  { %v708_v22 = vmul.f32 %v706_v21, %v703_v18 }
 0x8ce   :  { %v3440_v39 = vadd.f32 %v712_v53, %v708_v22 }
 0x8d0   :  { %v714_v23 = vpack.c.bf16 %v3440_v39, %v3440_v39 }
 0x8d2   :  { %v716_v25 = vrot.slane %v714_v23, 3 }
 0x8d4   :  { %717 = vrot.lane.b32.xlu2 %v716_v25, %s3166_s5 }
 0x8f5   :  { %v738_v26 = vpop.permute.xlu0 %737 }
 0x8f6   :  { %2821 = vmatmul.msk.bf16.vlgmr.msrb.gmra.mxu2 %vm171_vm7, %v738_v26 }
 0x8f7   :  { %1151 = vmatpush.bf16.msrb.mxu2 %v3299_v62 }
 0x8fb   :  { %1152 = vmatpush.bf16.msrb.mxu2 %v3309_v0 }
 0x92e   :  { %v718_v27 = vpop.permute.xlu2 %717 }
 0x92f   :  { %2820 = vmatmul.msk.bf16.vlgmr.msrb.gmra.mxu1 %vm171_vm7, %v718_v27  ;;  %2823 = vmatmul.msk.bf16.vlgmr.msrb.gmra.mxu3 %vm171_vm7, %v718_v27 }
 0x930   :  { %1086 = vmatpush.bf16.msrb.mxu1 %v3197_v3  ;;  %1171 = vmatpush.bf16.msrb.mxu3 %v3294_v61 }
 0x934   :  { %1087 = vmatpush.bf16.msrb.mxu1 %v3205_v5  ;;  %1172 = vmatpush.bf16.msrb.mxu3 %v3315_v2 }
 0x979   :  { %v751_v30 = vpop.f32.mrf.mxu2 }
 0x97a   :  { %v752_v31 = vadd.f32 %v751_v30, %v3352_v20 }
 0x97c   :  { %776 = vrot.lane.b32.xlu2 %v752_v31, %s3164_s4 }
 0x981   :  { %v753_v33 = vpop.f32.mrf.mxu2 }
 0x9ac   :  { %v731_v34 = vpop.f32.mrf.mxu1 }
 0x9ad   :  { %v732_v35 = vadd.f32 %v731_v34, %v3357_v24 }
 0x9af   :  { %v755_v38 = vadd.f32 %v752_v31, %v732_v35 }
 0x9b1   :  { %v2822_v40 = vmul.f32 -1.442695, %v755_v38  ;;  %v850_v38 = vrot.slane %v3440_v39, 6  ;;  %v3152_v39 = vld [vmem:[%s3971_s1 + $0x30] sm:$0xff] }
 0x9b2   :  { %v808_v41 = vpop.f32.mrf.mxu3 }
 0x9b3   :  { %3006 = vpow2.f32 %v2822_v40  ;;  %v809_v3 = vadd.f32 %v808_v41, %v3273_v32 }
 0x9b4   :  { %v733_v16 = vpop.f32.mrf.mxu1 }
 0x9b5   :  { %833 = vrot.lane.b32.xlu1 %v809_v3, %s3164_s4  ;;  %v812_v57 = vadd.f32 %v809_v3, %v3463_v59 }
 0x9b7   :  { %v2824_v60 = vmul.f32 -1.442695, %v812_v57 }
 0x9b9   :  { %v3007_v5 = vpop.eup %3006 }
 0x9ba   :  { %v759_v43 = vadd.f32 1.0, %v3007_v5  ;;  %v810_v44 = vpop.f32.mrf.mxu3 }
 0x9bc   :  { %3008 = vrcp.f32 %v759_v43  ;;  %v771_v50 = vand.u32 2147483648, %v759_v43  ;;  %vm765_vm0 = vweird.f32 %v759_v43  ;;  %v769_v52 = vand.u32 2147483647, %v759_v43 }
 0x9bd   :  { %3010 = vpow2.f32 %v2824_v60 }
 0x9be   :  { %v772_v54 = vor.u32 1.1754944e-38, %v771_v50  ;;  %vm770_vm2 = vcmp.eq.f32.partialorder %v769_v52, 8.507059e+37 }
 0x9c2   :  { %v3009_v45 = vpop.eup %3008 }
 0x9c3   :  { %v761_v46 = vmul.f32 %v3009_v45, %v759_v43  ;;  %vm766_vm10 = vweird.f32 %v3009_v45  ;;  %v3011_v36 = vpop.eup %3010 }
 0x9c4   :  { %vm767_vm1 = vmor %vm765_vm0, %vm766_vm10  ;;  %v816_v63 = vadd.f32 1.0, %v3011_v36 }
 0x9c5   :  { %v762_v47 = vsub.f32 1.0, %v761_v46  ;;  %v3153_v46 = vld [vmem:[%s3971_s1 + $0x28] sm:$0xff] }
 0x9c6   :  { %3012 = vrcp.f32 %v816_v63  ;;  %v828_v10 = vand.u32 2147483648, %v816_v63  ;;  %vm822_vm5 = vweird.f32 %v816_v63  ;;  %v826_v11 = vand.u32 2147483647, %v816_v63 }
 0x9c7   :  { %v763_v48 = vmul.f32 %v3009_v45, %v762_v47 }
 0x9c8   :  { %v829_v37 = vor.u32 1.1754944e-38, %v828_v10  ;;  %vm827_vm6 = vcmp.eq.f32.partialorder %v826_v11, 8.507059e+37 }
 0x9c9   :  { %v764_v49 = vadd.f32 %v3009_v45, %v763_v48 }
 0x9cb   :  { %v768_v53 = vsel %vm767_vm1, %v3009_v45, %v764_v49 }
 0x9cc   :  { %v773_v56 = vsel %vm770_vm2, %v772_v54, %v768_v53  ;;  %v3013_v4 = vpop.eup %3012 }
 0x9cd   :  { %v818_v6 = vmul.f32 %v3013_v4, %v816_v63  ;;  %vm823_vm3 = vweird.f32 %v3013_v4  ;;  %v786_v27 = vsub.f32 1.0, %v773_v56  ;;  %v792_v31 = vmul.f32 %v773_v56, %v3435_v17 }
 0x9ce   :  { %vm824_vm8 = vmor %vm822_vm5, %vm823_vm3 }
 0x9cf   :  { %v819_v7 = vsub.f32 1.0, %v818_v6 }
 0x9d1   :  { %v820_v8 = vmul.f32 %v3013_v4, %v819_v7 }
 0x9d3   :  { %v821_v9 = vadd.f32 %v3013_v4, %v820_v8 }
 0x9d5   :  { %v825_v28 = vsel %vm824_vm8, %v3013_v4, %v821_v9 }
 0x9d6   :  { %v777_v55 = vpop.permute.xlu2 %776  ;;  %v830_v12 = vsel %vm827_vm6, %v829_v37, %v825_v28 }
 0x9d7   :  { %v779_v58 = vmul.f32 %v777_v55, %v773_v56  ;;  %v843_v40 = vsub.f32 1.0, %v830_v12  ;;  %v852_v3 = vmul.f32 %v850_v38, %v830_v12 }
 0x9d9   :  { %781 = vrot.lane.b32.xlu1 %v779_v58, %s3164_s4 }
 0xa27   :  { %v834_v42 = vpop.permute.xlu1 %833 }
 0xa28   :  { %v836_v15 = vmul.f32 %v834_v42, %v830_v12 }
 0xa2a   :  { %838 = vrot.lane.b32.xlu0 %v836_v15, %s3164_s4 }
 0xa4b   :  { %v782_v18 = vpop.permute.xlu1 %781 }
 0xa4c   :  { %v784_v21 = vadd.f32 %v782_v18, %v732_v35 }
 0xa4e   :  { %3014 = vtanh.f32 %v784_v21 }
 0xa54   :  { %v3015_v22 = vpop.eup %3014 }
 0xa55   :  { %788 = vrot.lane.b32.xlu0 %v3015_v22, %s3166_s5 }
 0xa9c   :  { %v839_v23 = vpop.permute.xlu0 %838 }
 0xa9d   :  { %v841_v25 = vadd.f32 %v839_v23, %v3463_v59 }
 0xa9f   :  { %3016 = vtanh.f32 %v841_v25 }
 0xaa5   :  { %v3017_v26 = vpop.eup %3016 }
 0xaa6   :  { %845 = vrot.lane.b32.xlu2 %v3017_v26, %s3166_s5 }
 0xac7   :  { %v789_v30 = vpop.permute.xlu0 %788 }
 0xac8   :  { %v791_v33 = vmul.f32 %v789_v30, %v786_v27 }
 0xaca   :  { %v3471_v34 = vadd.f32 %v792_v31, %v791_v33 }
 0xacc   :  { %v874_v35 = vpack.c.bf16 %v3471_v34, %v3471_v34 }
 0xace   :  { %876 = vrot.lane.b32.xlu2 %v874_v35, %s3166_s5 }
 0xb00   :  { %v846_v41 = vpop.permute.xlu2 %845 }
 0xb01   :  { %v848_v16 = vmul.f32 %v846_v41, %v843_v40 }
 0xb03   :  { %v3477_v5 = vadd.f32 %v852_v3, %v848_v16 }
 0xb05   :  { %v854_v43 = vpack.c.bf16 %v3477_v5, %v3477_v5 }
 0xb07   :  { %856 = vrot.lane.b32.xlu1 %v854_v43, %s3166_s5 }
 0xb28   :  { %v877_v44 = vpop.permute.xlu2 %876 }
 0xb29   :  { %2826 = vmatmul.msk.bf16.vlgmr.msra.gmra.mxu1 %vm171_vm7, %v877_v44 }
 0xb2a   :  { %1293 = vmatpush.bf16.msra.mxu1 %v3299_v62 }
 0xb2e   :  { %1294 = vmatpush.bf16.msra.mxu1 %v3309_v0 }
 0xb79   :  { %v857_v45 = vpop.permute.xlu1 %856 }
 0xb7a   :  { %2825 = vmatmul.msk.bf16.vlgmr.msrb.gmra.mxu0 %vm171_vm7, %v857_v45  ;;  %2828 = vmatmul.msk.bf16.vlgmr.msra.gmra.mxu2 %vm171_vm7, %v857_v45 }
 0xb7b   :  { %1228 = vmatpush.bf16.msrb.mxu0 %v3152_v39  ;;  %1313 = vmatpush.bf16.msra.mxu2 %v3294_v61 }
 0xb7f   :  { %1229 = vmatpush.bf16.msrb.mxu0 %v3153_v46  ;;  %1314 = vmatpush.bf16.msra.mxu2 %v3315_v2 }
 0xba6   :  { %v890_v62 = vpop.f32.mrf.mxu1 }
 0xba7   :  { %v891_v0 = vadd.f32 %v890_v62, %v3352_v20 }
 0xba9   :  { %915 = vrot.lane.b32.xlu0 %v891_v0, %s3164_s4 }
 0xbae   :  { %v892_v47 = vpop.f32.mrf.mxu1 }
 0xbf7   :  { %v870_v48 = vpop.f32.mrf.mxu0 }
 0xbf8   :  { %v871_v49 = vadd.f32 %v870_v48, %v3357_v24  ;;  %v991_v48 = vrot.slane %v3477_v5, 6 }
 0xbfa   :  { %v894_v50 = vadd.f32 %v891_v0, %v871_v49 }
 0xbfc   :  { %v2827_v52 = vmul.f32 -1.442695, %v894_v50 }
 0xbfd   :  { %v947_v53 = vpop.f32.mrf.mxu2 }
 0xbfe   :  { %3018 = vpow2.f32 %v2827_v52  ;;  %v948_v61 = vadd.f32 %v947_v53, %v3273_v32 }
 0xbff   :  { %v872_v54 = vpop.f32.mrf.mxu0 }
 0xc00   :  { %v952_v55 = vrot.slane %v948_v61, 6 }
 0xc02   :  { %974 = vrot.lane.b32.xlu1 %v952_v55, %s3164_s4  ;;  %v954_v37 = vadd.f32 %v952_v55, %v3463_v59 }
 0xc04   :  { %v3019_v2 = vpop.eup %3018  ;;  %v2829_v42 = vmul.f32 -1.442695, %v954_v37 }
 0xc05   :  { %v898_v56 = vadd.f32 1.0, %v3019_v2  ;;  %v949_v58 = vpop.f32.mrf.mxu2 }
 0xc07   :  { %3020 = vrcp.f32 %v898_v56  ;;  %v910_v6 = vand.u32 2147483648, %v898_v56  ;;  %vm904_vm9 = vweird.f32 %v898_v56  ;;  %v908_v7 = vand.u32 2147483647, %v898_v56 }
 0xc08   :  { %3022 = vpow2.f32 %v2829_v42 }
 0xc09   :  { %v911_v9 = vor.u32 1.1754944e-38, %v910_v6  ;;  %vm909_vm4 = vcmp.eq.f32.partialorder %v908_v7, 8.507059e+37 }
 0xc0d   :  { %v3021_v57 = vpop.eup %3020 }
 0xc0e   :  { %v900_v60 = vmul.f32 %v3021_v57, %v898_v56  ;;  %vm905_vm12 = vweird.f32 %v3021_v57  ;;  %v3023_v12 = vpop.eup %3022 }
 0xc0f   :  { %vm906_vm13 = vmor %vm904_vm9, %vm905_vm12  ;;  %v958_v15 = vadd.f32 1.0, %v3023_v12 }
 0xc10   :  { %v901_v36 = vsub.f32 1.0, %v900_v60 }
 0xc11   :  { %3024 = vrcp.f32 %v958_v15  ;;  %v970_v26 = vand.u32 2147483648, %v958_v15  ;;  %vm964_vm14 = vweird.f32 %v958_v15  ;;  %v968_v27 = vand.u32 2147483647, %v958_v15 }
 0xc12   :  { %v902_v63 = vmul.f32 %v3021_v57, %v901_v36 }
 0xc13   :  { %v971_v31 = vor.u32 1.1754944e-38, %v970_v26  ;;  %vm969_vm10 = vcmp.eq.f32.partialorder %v968_v27, 8.507059e+37 }
 0xc14   :  { %v903_v4 = vadd.f32 %v3021_v57, %v902_v63 }
 0xc16   :  { %v907_v8 = vsel %vm906_vm13, %v3021_v57, %v903_v4 }
 0xc17   :  { %v912_v11 = vsel %vm909_vm4, %v911_v9, %v907_v8  ;;  %v3025_v18 = vpop.eup %3024 }
 0xc18   :  { %v960_v21 = vmul.f32 %v3025_v18, %v958_v15  ;;  %vm965_vm11 = vweird.f32 %v3025_v18  ;;  %v925_v45 = vsub.f32 1.0, %v912_v11  ;;  %v931_v46 = vmul.f32 %v912_v11, %v3471_v34 }
 0xc19   :  { %vm966_vm15 = vmor %vm964_vm14, %vm965_vm11 }
 0xc1a   :  { %v961_v22 = vsub.f32 1.0, %v960_v21 }
 0xc1b   :  { %v916_v10 = vpop.permute.xlu0 %915 }
 0xc1c   :  { %v918_v28 = vmul.f32 %v916_v10, %v912_v11  ;;  %v962_v23 = vmul.f32 %v3025_v18, %v961_v22 }
 0xc1e   :  { %920 = vrot.lane.b32.xlu2 %v918_v28, %s3164_s4  ;;  %v963_v25 = vadd.f32 %v3025_v18, %v962_v23 }
 0xc20   :  { %v967_v30 = vsel %vm966_vm15, %v3025_v18, %v963_v25 }
 0xc21   :  { %v972_v35 = vsel %vm969_vm10, %v971_v31, %v967_v30 }
 0xc22   :  { %v993_v52 = vmul.f32 %v991_v48, %v972_v35 }
 0xc74   :  { %v975_v33 = vpop.permute.xlu1 %974 }
 0xc75   :  { %v977_v38 = vmul.f32 %v975_v33, %v972_v35 }
 0xc77   :  { %979 = vrot.lane.b32.xlu0 %v977_v38, %s3164_s4 }
 0xc78   :  { %v921_v40 = vpop.permute.xlu2 %920 }
 0xc79   :  { %v923_v41 = vadd.f32 %v921_v40, %v871_v49  ;;  %v984_v49 = vsub.f32 1.0, %v972_v35 }
 0xc7b   :  { %3026 = vtanh.f32 %v923_v41 }
 0xc81   :  { %v3027_v3 = vpop.eup %3026 }
 0xc82   :  { %927 = vrot.lane.b32.xlu1 %v3027_v3, %s3166_s5 }
 0xce9   :  { %v980_v16 = vpop.permute.xlu0 %979 }
 0xcea   :  { %v982_v43 = vadd.f32 %v980_v16, %v3463_v59 }
 0xcec   :  { %3028 = vtanh.f32 %v982_v43 }
 0xcf2   :  { %v3029_v44 = vpop.eup %3028 }
 0xcf3   :  { %986 = vrot.lane.b32.xlu2 %v3029_v44, %s3166_s5 }
 0xcf4   :  { %v928_v39 = vpop.permute.xlu1 %927 }
 0xcf5   :  { %v930_v62 = vmul.f32 %v928_v39, %v925_v45 }
 0xcf7   :  { %v3507_v0 = vadd.f32 %v931_v46, %v930_v62 }
 0xcf9   :  { %v1016_v47 = vpack.c.bf16 %v3507_v0, %v3507_v0 }
 0xcfb   :  { %1018 = vrot.lane.b32.xlu0 %v1016_v47, %s3166_s5 }
 0xd4d   :  { %v987_v50 = vpop.permute.xlu2 %986 }
 0xd4e   :  { %v989_v53 = vmul.f32 %v987_v50, %v984_v49 }
 0xd50   :  { %v3513_v61 = vadd.f32 %v993_v52, %v989_v53 }
 0xd52   :  { %v995_v54 = vpack.c.bf16 %v3513_v61, %v3513_v61 }
 0xd54   :  { %v997_v55 = vrot.slane %v995_v54, 1 }
 0xd56   :  { %998 = vrot.lane.b32.xlu1 %v997_v55, %s3166_s5 }
 0xd6d   :  { %v1019_v2 = vpop.permute.xlu0 %1018 }
 0xd6e   :  { %2831 = vmatmul.msk.bf16.vlgmr.msra.gmra.mxu0 %vm171_vm7, %v1019_v2 }
 0xdc8   :  { %v999_v56 = vpop.permute.xlu1 %998 }
 0xdc9   :  { %2830 = vmatmul.msk.bf16.vlgmr.msra.gmra.mxu3 %vm171_vm7, %v999_v56  ;;  %2833 = vmatmul.msk.bf16.vlgmr.msrb.gmra.mxu1 %vm171_vm7, %v999_v56 }
 0xdeb   :  { %v1032_v5 = vpop.f32.mrf.mxu0 }
 0xdec   :  { %v1033_v58 = vadd.f32 %v1032_v5, %v3352_v20 }
 0xdee   :  { %1057 = vrot.lane.b32.xlu2 %v1033_v58, %s3164_s4 }
 0xdf3   :  { %v1034_v57 = vpop.f32.mrf.mxu0 }
 0xe46   :  { %v1089_v60 = vpop.f32.mrf.mxu1 }
 0xe47   :  { %v1090_v36 = vadd.f32 %v1089_v60, %v3273_v32 }
 0xe48   :  { %v1058_v26 = vpop.permute.xlu2 %1057 }
 0xe49   :  { %v1094_v63 = vrot.slane %v1090_v36, 4  ;;  %v1133_v36 = vrot.slane %v3513_v61, 6 }
 0xe4b   :  { %1116 = vrot.lane.b32.xlu0 %v1094_v63, %s3164_s4  ;;  %v1096_v31 = vadd.f32 %v1094_v63, %v3463_v59 }
 0xe4c   :  { %v1012_v4 = vpop.f32.mrf.mxu3 }
 0xe4d   :  { %v1013_v6 = vadd.f32 %v1012_v4, %v3357_v24  ;;  %v2834_v33 = vmul.f32 -1.442695, %v1096_v31 }
 0xe4e   :  { %v1091_v7 = vpop.f32.mrf.mxu1 }
 0xe4f   :  { %v1036_v8 = vadd.f32 %v1033_v58, %v1013_v6 }
 0xe51   :  { %v2832_v9 = vmul.f32 -1.442695, %v1036_v8 }
 0xe53   :  { %3030 = vpow2.f32 %v2832_v9 }
 0xe54   :  { %v1014_v10 = vpop.f32.mrf.mxu3 }
 0xe59   :  { %v3031_v11 = vpop.eup %3030 }
 0xe5a   :  { %v1040_v28 = vadd.f32 1.0, %v3031_v11 }
 0xe5c   :  { %3032 = vrcp.f32 %v1040_v28  ;;  %v1052_v15 = vand.u32 2147483648, %v1040_v28  ;;  %v1050_v21 = vand.u32 2147483647, %v1040_v28  ;;  %vm1046_vm1 = vweird.f32 %v1040_v28 }
 0xe5d   :  { %3034 = vpow2.f32 %v2834_v33 }
 0xe5e   :  { %v1053_v23 = vor.u32 1.1754944e-38, %v1052_v15  ;;  %vm1051_vm3 = vcmp.eq.f32.partialorder %v1050_v21, 8.507059e+37 }
 0xe62   :  { %v3033_v37 = vpop.eup %3032 }
 0xe63   :  { %v1042_v42 = vmul.f32 %v3033_v37, %v1040_v28  ;;  %vm1047_vm0 = vweird.f32 %v3033_v37  ;;  %v3035_v35 = vpop.eup %3034 }
 0xe64   :  { %vm1048_vm2 = vmor %vm1046_vm1, %vm1047_vm0  ;;  %v1100_v38 = vadd.f32 1.0, %v3035_v35 }
 0xe65   :  { %v1043_v12 = vsub.f32 1.0, %v1042_v42 }
 0xe66   :  { %3036 = vrcp.f32 %v1100_v38  ;;  %v1112_v44 = vand.u32 2147483648, %v1100_v38  ;;  %vm1106_vm8 = vweird.f32 %v1100_v38  ;;  %v1110_v45 = vand.u32 2147483647, %v1100_v38 }
 0xe67   :  { %v1044_v18 = vmul.f32 %v3033_v37, %v1043_v12 }
 0xe68   :  { %v1113_v46 = vor.u32 1.1754944e-38, %v1112_v44  ;;  %vm1111_vm12 = vcmp.eq.f32.partialorder %v1110_v45, 8.507059e+37 }
 0xe69   :  { %v1045_v22 = vadd.f32 %v3033_v37, %v1044_v18 }
 0xe6b   :  { %v1049_v25 = vsel %vm1048_vm2, %v3033_v37, %v1045_v22 }
 0xe6c   :  { %v1054_v27 = vsel %vm1051_vm3, %v1053_v23, %v1049_v25  ;;  %v3037_v40 = vpop.eup %3036 }
 0xe6d   :  { %v1060_v30 = vmul.f32 %v1058_v26, %v1054_v27  ;;  %v1102_v41 = vmul.f32 %v3037_v40, %v1100_v38  ;;  %vm1107_vm5 = vweird.f32 %v3037_v40  ;;  %v1067_v2 = vsub.f32 1.0, %v1054_v27 }
 0xe6e   :  { %vm1108_vm6 = vmor %vm1106_vm8, %vm1107_vm5  ;;  %v1073_v5 = vmul.f32 %v1054_v27, %v3507_v0  ;;  %vm371_vm8 = vcmask 254976  }
 0xe6f   :  { %1062 = vrot.lane.b32.xlu1 %v1060_v30, %s3164_s4  ;;  %v1103_v3 = vsub.f32 1.0, %v1102_v41 }
 0xe71   :  { %v1104_v16 = vmul.f32 %v3037_v40, %v1103_v3 }
 0xe73   :  { %v1105_v43 = vadd.f32 %v3037_v40, %v1104_v16 }
 0xe75   :  { %v1109_v39 = vsel %vm1108_vm6, %v3037_v40, %v1105_v43 }
 0xe76   :  { %v1114_v47 = vsel %vm1111_vm12, %v1113_v46, %v1109_v39  ;;  %vm1466_vm12 = vcmask 130048  }
 0xe77   :  { %v1126_v63 = vsub.f32 1.0, %v1114_v47 }
 0xebd   :  { %v1117_v62 = vpop.permute.xlu0 %1116 }
 0xebe   :  { %v1119_v48 = vmul.f32 %v1117_v62, %v1114_v47 }
 0xec0   :  { %1121 = vrot.lane.b32.xlu2 %v1119_v48, %s3164_s4 }
 0xee1   :  { %v1063_v49 = vpop.permute.xlu1 %1062 }
 0xee2   :  { %v1065_v50 = vadd.f32 %v1063_v49, %v1013_v6  ;;  %v1135_v6 = vmul.f32 %v1133_v36, %v1114_v47 }
 0xee4   :  { %3038 = vtanh.f32 %v1065_v50 }
 0xeea   :  { %v3039_v52 = vpop.eup %3038 }
 0xeeb   :  { %1069 = vrot.lane.b32.xlu0 %v3039_v52, %s3166_s5 }
 0xf1a   :  { %v1122_v53 = vpop.permute.xlu2 %1121 }
 0xf1b   :  { %v1124_v54 = vadd.f32 %v1122_v53, %v3463_v59 }
 0xf1d   :  { %3040 = vtanh.f32 %v1124_v54 }
 0xf23   :  { %v3041_v55 = vpop.eup %3040 }
 0xf24   :  { %1128 = vrot.lane.b32.xlu1 %v3041_v55, %s3166_s5 }
 0xf5d   :  { %v1070_v56 = vpop.permute.xlu0 %1069 }
 0xf5e   :  { %v1072_v58 = vmul.f32 %v1070_v56, %v1067_v2 }
 0xf60   :  { %v3533_v57 = vadd.f32 %v1073_v5, %v1072_v58 }
 0xf62   :  { %v1158_v60 = vpack.c.bf16 %v3533_v57, %v3533_v57 }
 0xf64   :  { %1160 = vrot.lane.b32.xlu2 %v1158_v60, %s3166_s5 }
 0xf96   :  { %v1129_v4 = vpop.permute.xlu1 %1128 }
 0xf97   :  { %v1131_v7 = vmul.f32 %v1129_v4, %v1126_v63 }
 0xf99   :  { %v1136_v8 = vadd.f32 %v1135_v6, %v1131_v7 }
 0xf9b   :  { %v1137_v9 = vpack.c.bf16 %v1136_v8, %v1136_v8  ;;  %v1275_v47 = vrot.slane %v1136_v8, 6 }
 0xf9d   :  { %v1139_v10 = vrot.slane %v1137_v9, 2 }
 0xf9f   :  { %1140 = vrot.lane.b32.xlu0 %v1139_v10, %s3166_s5 }
 0xfbe   :  { %v1161_v11 = vpop.permute.xlu2 %1160 }
 0xfbf   :  { %2836 = vmatmul.msk.bf16.vlgmr.msrb.gmra.mxu3 %vm171_vm7, %v1161_v11 }
0x1011   :  { %v1141_v28 = vpop.permute.xlu0 %1140 }
0x1012   :  { %2835 = vmatmul.msk.bf16.vlgmr.msrb.gmra.mxu2 %vm171_vm7, %v1141_v28  ;;  %2838 = vmatmul.msk.bf16.vlgmr.msrb.gmra.mxu0 %vm171_vm7, %v1141_v28 }
0x1042   :  { %v1174_v37 = vpop.f32.mrf.mxu3 }
0x1043   :  { %v1175_v61 = vadd.f32 %v1174_v37, %v3352_v20 }
0x1045   :  { %1199 = vrot.lane.b32.xlu1 %v1175_v61, %s3164_s4 }
0x104a   :  { %v1176_v42 = vpop.f32.mrf.mxu3 }
0x108f   :  { %v1231_v12 = vpop.f32.mrf.mxu0 }
0x1090   :  { %v1232_v15 = vadd.f32 %v1231_v12, %v3273_v32 }
0x1092   :  { %v1236_v18 = vrot.slane %v1232_v15, 2 }
0x1094   :  { %v1238_v21 = vadd.f32 %v1236_v18, %v3463_v59  ;;  %1258 = vrot.lane.b32.xlu2 %v1236_v18, %s3164_s4 }
0x1095   :  { %v1154_v22 = vpop.f32.mrf.mxu2 }
0x1096   :  { %v2839_v23 = vmul.f32 -1.442695, %v1238_v21  ;;  %v1155_v25 = vadd.f32 %v1154_v22, %v3357_v24 }
0x1097   :  { %v1233_v26 = vpop.f32.mrf.mxu0 }
0x1098   :  { %3042 = vpow2.f32 %v2839_v23  ;;  %v1178_v27 = vadd.f32 %v1175_v61, %v1155_v25 }
0x109a   :  { %v2837_v30 = vmul.f32 -1.442695, %v1178_v27 }
0x109c   :  { %3044 = vpow2.f32 %v2837_v30 }
0x109d   :  { %v1156_v31 = vpop.f32.mrf.mxu2 }
0x109e   :  { %v3043_v33 = vpop.eup %3042 }
0x109f   :  { %v1242_v35 = vadd.f32 1.0, %v3043_v33 }
0x10a1   :  { %3046 = vrcp.f32 %v1242_v35  ;;  %v1254_v43 = vand.u32 2147483648, %v1242_v35  ;;  %v1252_v39 = vand.u32 2147483647, %v1242_v35  ;;  %vm1248_vm13 = vweird.f32 %v1242_v35 }
0x10a2   :  { %v3045_v38 = vpop.eup %3044 }
0x10a3   :  { %v1182_v32 = vadd.f32 1.0, %v3045_v38  ;;  %v1255_v48 = vor.u32 1.1754944e-38, %v1254_v43  ;;  %vm1253_vm14 = vcmp.eq.f32.partialorder %v1252_v39, 8.507059e+37 }
0x10a5   :  { %3048 = vrcp.f32 %v1182_v32  ;;  %v1194_v52 = vand.u32 2147483648, %v1182_v32  ;;  %vm1188_vm15 = vweird.f32 %v1182_v32  ;;  %v1192_v55 = vand.u32 2147483647, %v1182_v32 }
0x10a7   :  { %v3047_v40 = vpop.eup %3046  ;;  %v1195_v5 = vor.u32 1.1754944e-38, %v1194_v52  ;;  %vm1193_vm0 = vcmp.eq.f32.partialorder %v1192_v55, 8.507059e+37 }
0x10a8   :  { %v1244_v41 = vmul.f32 %v3047_v40, %v1242_v35  ;;  %vm1249_vm9 = vweird.f32 %v3047_v40 }
0x10a9   :  { %vm1250_vm4 = vmor %vm1248_vm13, %vm1249_vm9 }
0x10aa   :  { %v1245_v3 = vsub.f32 1.0, %v1244_v41 }
0x10ab   :  { %v3049_v16 = vpop.eup %3048 }
0x10ac   :  { %v1184_v44 = vmul.f32 %v3049_v16, %v1182_v32  ;;  %v1246_v45 = vmul.f32 %v3047_v40, %v1245_v3  ;;  %vm1189_vm11 = vweird.f32 %v3049_v16 }
0x10ad   :  { %vm1190_vm10 = vmor %vm1188_vm15, %vm1189_vm11 }
0x10ae   :  { %v1185_v46 = vsub.f32 1.0, %v1184_v44  ;;  %v1247_v62 = vadd.f32 %v3047_v40, %v1246_v45 }
0x10b0   :  { %v1186_v49 = vmul.f32 %v3049_v16, %v1185_v46  ;;  %v1251_v50 = vsel %vm1250_vm4, %v3047_v40, %v1247_v62 }
0x10b1   :  { %v1256_v53 = vsel %vm1253_vm14, %v1255_v48, %v1251_v50 }
0x10b2   :  { %v1187_v54 = vadd.f32 %v3049_v16, %v1186_v49  ;;  %v1277_v2 = vmul.f32 %v1275_v47, %v1256_v53  ;;  %v1268_v18 = vsub.f32 1.0, %v1256_v53 }
0x10b4   :  { %v1191_v56 = vsel %vm1190_vm10, %v3049_v16, %v1187_v54 }
0x10b5   :  { %v1196_v60 = vsel %vm1193_vm0, %v1195_v5, %v1191_v56 }
0x10b6   :  { %v1209_v28 = vsub.f32 1.0, %v1196_v60  ;;  %v1215_v61 = vmul.f32 %v1196_v60, %v3533_v57 }
0x10b7   :  { %v1200_v58 = vpop.permute.xlu1 %1199 }
0x10b8   :  { %v1202_v36 = vmul.f32 %v1200_v58, %v1196_v60 }
0x10ba   :  { %1204 = vrot.lane.b32.xlu0 %v1202_v36, %s3164_s4 }
0x10ee   :  { %v1259_v63 = vpop.permute.xlu2 %1258 }
0x10ef   :  { %v1261_v4 = vmul.f32 %v1259_v63, %v1256_v53 }
0x10f1   :  { %1263 = vrot.lane.b32.xlu1 %v1261_v4, %s3164_s4 }
0x112c   :  { %v1205_v6 = vpop.permute.xlu0 %1204 }
0x112d   :  { %v1207_v7 = vadd.f32 %v1205_v6, %v1155_v25 }
0x112f   :  { %3050 = vtanh.f32 %v1207_v7  ;;  %v3617_v7 = vld [vmem:[%s3971_s1 + $0x70] sm:$0xff] }
0x1135   :  { %v3051_v8 = vpop.eup %3050 }
0x1136   :  { %1211 = vrot.lane.b32.xlu2 %v3051_v8, %s3166_s5  ;;  %v3623_v8 = vld [vmem:[%s3971_s1 + $0x68] sm:$0xff] }
0x1163   :  { %v1264_v9 = vpop.permute.xlu1 %1263 }
0x1164   :  { %v1266_v10 = vadd.f32 %v1264_v9, %v3463_v59 }
0x1166   :  { %3052 = vtanh.f32 %v1266_v10 }
0x116c   :  { %v3053_v11 = vpop.eup %3052 }
0x116d   :  { %1270 = vrot.lane.b32.xlu0 %v3053_v11, %s3166_s5 }
0x1190   :  { %v1212_v37 = vpop.permute.xlu2 %1211 }
0x1191   :  { %v1214_v42 = vmul.f32 %v1212_v37, %v1209_v28 }
0x1193   :  { %v3555_v12 = vadd.f32 %v1215_v61, %v1214_v42 }
0x1195   :  { %v1300_v15 = vpack.c.bf16 %v3555_v12, %v3555_v12 }
0x1197   :  { %1302 = vrot.lane.b32.xlu1 %v1300_v15, %s3166_s5 }
0x11df   :  { %v1271_v21 = vpop.permute.xlu0 %1270 }
0x11e0   :  { %v1273_v22 = vmul.f32 %v1271_v21, %v1268_v18 }
0x11e2   :  { %v3560_v59 = vadd.f32 %v1277_v2, %v1273_v22 }
0x11e4   :  { %v1279_v23 = vpack.c.bf16 %v3560_v59, %v3560_v59 }
0x11e6   :  { %v1281_v25 = vrot.slane %v1279_v23, 3 }
0x11e8   :  { %1282 = vrot.lane.b32.xlu2 %v1281_v25, %s3166_s5 }
0x1209   :  { %v1303_v26 = vpop.permute.xlu1 %1302 }
0x120a   :  { %2841 = vmatmul.msk.bf16.vlgmr.msra.gmra.mxu2 %vm171_vm7, %v1303_v26 }
0x1242   :  { %v3566_v27 = vpop.permute.xlu2 %1282 }
0x1243   :  { %2840 = vmatmul.msk.bf16.vlgmr.msra.gmra.mxu1 %vm171_vm7, %v3566_v27 }
0x128d   :  { %v1316_v30 = vpop.f32.mrf.mxu2 }
0x128e   :  { %v1317_v31 = vadd.f32 %v1316_v30, %v3352_v20  ;;  %v3660_v30 = vshrl.u32 %v18_v13, 7 }
0x1290   :  { %1341 = vrot.lane.b32.xlu0 %v1317_v31, %s3164_s4 }
0x1295   :  { %v1318_v33 = vpop.f32.mrf.mxu2 }
0x1296   :  { %v3664_v33 = vand.u32 1, %v3238_v14 }
0x1298   :  { %368 = vrot.lane.b32.xlu0 %v3368_v29, %s3166_s5 }
0x12a0   :  { %795 = vrot.lane.b32.xlu0 %v3471_v34, %s3166_s5 }
0x12a8   :  { %1218 = vrot.lane.b32.xlu0 %v3555_v12, %s3166_s5 }
0x12c0   :  { %v1296_v35 = vpop.f32.mrf.mxu1 }
0x12c1   :  { %v1297_v32 = vadd.f32 %v1296_v35, %v3357_v24  ;;  %v1425_v35 = vadd.s32 8, %v3660_v30 }
0x12c3   :  { %v1320_v40 = vadd.f32 %v1317_v31, %v1297_v32  ;;  %v1430_v31 = vand.u32 1, %v3660_v30 }
0x12c5   :  { %v2842_v41 = vmul.f32 -1.442695, %v1320_v40  ;;  %vm1462_vm6 = vcmp.eq.s32.totalorder %v1430_v31, %v3664_v33 }
0x12c7   :  { %3054 = vpow2.f32 %v2842_v41  ;;  %v1437_v41 = vand.u32 1, %v1425_v35 }
0x12c8   :  { %v1298_v38 = vpop.f32.mrf.mxu1 }
0x12c9   :  { %vm1463_vm9 = vcmp.eq.s32.totalorder %v1437_v41, %v3664_v33  ;;  %v1764_v41 = vrot.slane %v3560_v59, 6 }
0x12cd   :  { %v3055_v20 = vpop.eup %3054 }
0x12ce   :  { %v1324_v3 = vadd.f32 1.0, %v3055_v20 }
0x12d0   :  { %3056 = vrcp.f32 %v1324_v3  ;;  %v1336_v34 = vand.u32 2147483648, %v1324_v3  ;;  %vm1330_vm2 = vweird.f32 %v1324_v3  ;;  %v1334_v39 = vand.u32 2147483647, %v1324_v3 }
0x12d2   :  { %v1337_v62 = vor.u32 1.1754944e-38, %v1336_v34  ;;  %vm1335_vm5 = vcmp.eq.f32.partialorder %v1334_v39, 8.507059e+37 }
0x12d6   :  { %v3057_v16 = vpop.eup %3056 }
0x12d7   :  { %v1326_v43 = vmul.f32 %v3057_v16, %v1324_v3  ;;  %vm1331_vm1 = vweird.f32 %v3057_v16 }
0x12d8   :  { %vm1332_vm3 = vmor %vm1330_vm2, %vm1331_vm1 }
0x12d9   :  { %v1327_v44 = vsub.f32 1.0, %v1326_v43 }
0x12db   :  { %v1328_v29 = vmul.f32 %v3057_v16, %v1327_v44 }
0x12dd   :  { %v1329_v45 = vadd.f32 %v3057_v16, %v1328_v29 }
0x12df   :  { %v1333_v46 = vsel %vm1332_vm3, %v3057_v16, %v1329_v45 }
0x12e0   :  { %v1338_v47 = vsel %vm1335_vm5, %v1337_v62, %v1333_v46  ;;  %v2943_v46 = vld [vmem:[%s3971_s1 + $0x90] sm:$0xff] }
0x12e1   :  { %v1357_v5 = vmul.f32 %v1338_v47, %v3555_v12  ;;  %v3649_v12 = vld [vmem:[%s3972_s2] sm:$0xff] }
0x12e2   :  { %v3652_v15 = vperm.slane %v3649_v12, 6  ;;  %v3672_v14 = vperm.slane %v3649_v12, 5  ;;  %v158_v43 = vperm.slane %v3649_v12, 4 }
0x12e4   :  { %v3682_v44 = vadd.f32 %v3347_v19, %v158_v43 }
0x1302   :  { %v1342_v24 = vpop.permute.xlu0 %1341 }
0x1303   :  { %v1344_v48 = vmul.f32 %v1342_v24, %v1338_v47 }
0x1305   :  { %1346 = vrot.lane.b32.xlu1 %v1344_v48, %s3164_s4 }
0x130a   :  { %v369_v49 = vpop.permute.xlu0 %368 }
0x130b   :  { %372 = vst.msk [vmem:[#allocation2] sm:$0x3] %vm371_vm8, %v369_v49 }
0x130d   :  { %511 = vrot.lane.b32.xlu1 %v3402_v51, %s3166_s5  ;;  %v3597_v51 = vld [vmem:[%s3971_s1 + $0x78] sm:$0xff] }
0x130e   :  { %1508 = vrot.lane.b32.xlu0 %v3597_v51, %s3164_s4 }
0x1312   :  { %v796_v50 = vpop.permute.xlu0 %795 }
0x1313   :  { %798 = vst.msk [vmem:[#allocation2 + $0x6] sm:$0x3] %vm371_vm8, %v796_v50 }
0x1315   :  { %934 = vrot.lane.b32.xlu1 %v3507_v0, %s3166_s5  ;;  %v3604_v0 = vld [vmem:[%s3971_s1 + $0x80] sm:$0xff] }
0x1316   :  { %1397 = vmatpush.bf16.msra.mxu3 %v3604_v0 }
0x131a   :  { %v1219_v52 = vpop.permute.xlu0 %1218  ;;  %1398 = vmatpush.bf16.msra.mxu3 %v3597_v51 }
0x131b   :  { %1221 = vst.msk [vmem:[#allocation2 + $0xc] sm:$0x3] %vm371_vm8, %v1219_v52 }
0x1377   :  { %v1347_v53 = vpop.permute.xlu1 %1346 }
0x1378   :  { %v1349_v54 = vadd.f32 %v1347_v53, %v1297_v32  ;;  %v2942_v53 = vld [vmem:[%s3971_s1 + $0x88] sm:$0xff] }
0x137a   :  { %3058 = vtanh.f32 %v1349_v54 }
0x137f   :  { %v512_v55 = vpop.permute.xlu1 %511 }
0x1380   :  { %v3059_v2 = vpop.eup %3058  ;;  %514 = vst.msk [vmem:[#allocation2 + $0x2] sm:$0x3] %vm371_vm8, %v512_v55  ;;  %v1509_v6 = vpop.permute.xlu0 %1508 }
0x1381   :  { %1353 = vrot.lane.b32.xlu2 %v3059_v2, %s3166_s5 }
0x1387   :  { %v935_v56 = vpop.permute.xlu1 %934 }
0x1388   :  { %937 = vst.msk [vmem:[#allocation2 + $0x8] sm:$0x3] %vm371_vm8, %v935_v56 }
0x1389   :  { %653 = vrot.lane.b32.xlu2 %v3435_v17, %s3166_s5  ;;  %v1351_v17 = vsub.f32 1.0, %v1338_v47 }
0x1391   :  { %1076 = vrot.lane.b32.xlu2 %v3533_v57, %s3166_s5 }
0x1399   :  { %1510 = vrot.lane.b32.xlu2 %v3604_v0, %s3164_s4 }
0x13db   :  { %v1354_v57 = vpop.permute.xlu2 %1353 }
0x13dc   :  { %v1356_v58 = vmul.f32 %v1354_v57, %v1351_v17 }
0x13de   :  { %v1358_v60 = vadd.f32 %v1357_v5, %v1356_v58 }
0x13e0   :  { %1360 = vrot.lane.b32.xlu1 %v1358_v60, %s3166_s5 }
0x13e3   :  { %v654_v36 = vpop.permute.xlu2 %653 }
0x13e4   :  { %656 = vst.msk [vmem:[#allocation2 + $0x4] sm:$0x3] %vm371_vm8, %v654_v36 }
0x13eb   :  { %v1077_v63 = vpop.permute.xlu2 %1076  ;;  %v3627_v10 = vld [vmem:[#allocation2] sm:$0xff] }
0x13ec   :  { %1079 = vst.msk [vmem:[#allocation2 + $0xa] sm:$0x3] %vm371_vm8, %v1077_v63 }
0x13f3   :  { %v1511_v4 = vpop.permute.xlu2 %1510 }
0x13f4   :  { %1520 = vmatpush.bf16.msrb.mxu2 %v1511_v4 }
0x13f8   :  { %1521 = vmatpush.bf16.msrb.mxu2 %v1509_v6 }
0x13fc   :  { %1719 = vmatpush.bf16.msra.mxu2 %v3617_v7 }
0x1400   :  { %1720 = vmatpush.bf16.msra.mxu2 %v3623_v8 }
0x1452   :  { %v1361_v9 = vpop.permute.xlu1 %1360 }
0x1453   :  { %1363 = vst.msk [vmem:[#allocation2 + $0xe] sm:$0x3] %vm371_vm8, %v1361_v9 }
0x145a   :  { %v3629_v11 = vld [vmem:[#allocation2 + $0x8] sm:$0xff] }
0x145b   :  { %v3633_v28 = vpack.c.bf16 %v3629_v11, %v3627_v10 }
0x145d   :  { %2851 = vmatmul.msk.bf16.vlgmr.msra.gmra.mxu3 %vm171_vm7, %v3633_v28  ;;  %1500 = vmatpush.bf16.msrb.mxu1 %v3633_v28  ;;  %v1389_v37 = vsel %vm171_vm7, %v3633_v28, 0 }
0x145e   :  { %2854 = vmatmul.msk.bf16.vlgmr.msrb.gmra.mxu2 %vm171_vm7, %v3633_v28  ;;  %1416 = vmatpush.bf16.xpose.msra.mxu0 %v1389_v37 }
0x1461   :  { %1633 = vmatpush.bf16.msra.mxu1 %v2943_v46 }
0x1465   :  { %1634 = vmatpush.bf16.msra.mxu1 %v2942_v53 }
0x146e   :  { %2876 = vmatmul.msk.bf16.vlgmr.msra.gmra.mxu2 %vm171_vm7, %v3566_v27 }
0x14e0   :  { %v1400_v61 = vpop.f32.mrf.mxu3 }
0x14e1   :  { %v3644_v42 = vpop.f32.mrf.mxu2  ;;  %v1401_v21 = vadd.f32 %v1400_v61, %v3652_v15 }
0x14e8   :  { %v1402_v18 = vpop.f32.mrf.mxu3 }
0x14e9   :  { %v1403_v22 = vadd.f32 %v1402_v18, %v3652_v15  ;;  %v3656_v23 = vpop.f32.mrf.mxu2 }
0x14eb   :  { %v1405_v25 = vpack.c.bf16 %v1403_v22, %v1401_v21 }
0x14ed   :  { %2852 = vmatmul.msk.bf16.vlgmr.msra.gmra.mxu0 %vm171_vm7, %v1405_v25 }
0x14f1   :  { %v1722_v26 = vpop.f32.mrf.mxu2 }
0x14f2   :  { %v1723_v16 = vadd.f32 %v1722_v26, %v3672_v14 }
0x14f4   :  { %v1726_v29 = vadd.f32 %v1723_v16, %v3682_v44 }
0x14f6   :  { %v2877_v45 = vmul.f32 -1.442695, %v1726_v29 }
0x14f8   :  { %3060 = vpow2.f32 %v2877_v45 }
0x14f9   :  { %v1724_v27 = vpop.f32.mrf.mxu2 }
0x14fe   :  { %v3061_v24 = vpop.eup %3060 }
0x14ff   :  { %v1730_v49 = vadd.f32 1.0, %v3061_v24 }
0x1501   :  { %v1742_v5 = vand.u32 2147483648, %v1730_v49  ;;  %vm1736_vm4 = vweird.f32 %v1730_v49  ;;  %v1740_v58 = vand.u32 2147483647, %v1730_v49 }
0x1503   :  { %v1743_v36 = vor.u32 1.1754944e-38, %v1742_v5  ;;  %vm1741_vm14 = vcmp.eq.f32.partialorder %v1740_v58, 8.507059e+37 }
0x156a   :  { %v1418_v38 = vpop.f32.mrf.mxu0 }
0x156b   :  { %v1464_v32 = vsel %vm1462_vm6, %v1418_v38, -1e+30 }
0x156c   :  { %v1467_v40 = vsel %vm1466_vm12, %v1464_v32, -inf }
0x156d   :  { %1468 = vmax.xlane.f32.xlu1 %v1467_v40 }
0x1572   :  { %v1420_v13 = vpop.f32.mrf.mxu0 }
0x1573   :  { %v1465_v20 = vsel %vm1463_vm9, %v1420_v13, -1e+30  ;;  %vm3762_vm9 = vcmp.eq.s32.totalorder %v3664_v33, %v3660_v30 }
0x1574   :  { %v1470_v3 = vsel %vm1466_vm12, %v1465_v20, -inf }
0x1575   :  { %1471 = vmax.xlane.f32.xlu2 %v1470_v3 }
0x1586   :  { %1747 = vrot.lane.b32.xlu1 %v1723_v16, %s3164_s4 }
0x158e   :  { %1528 = vrot.lane.b32.xlu1 %v3597_v51, %s3166_s5 }
0x15e0   :  { %v1469_v34 = vpop.xlane.xlu1 %1468 }
0x15e1   :  { %v1473_v39 = vsub.f32 %v1464_v32, %v1469_v34 }
0x15e3   :  { %v1475_v62 = vmul.f32 1.442695, %v1473_v39 }
0x15e5   :  { %3062 = vpow2.f32 %v1475_v62 }
0x15e8   :  { %v1472_v47 = vpop.xlane.xlu2 %1471 }
0x15e9   :  { %v1474_v48 = vsub.f32 %v1465_v20, %v1472_v47 }
0x15eb   :  { %v3063_v50 = vpop.eup %3062  ;;  %v1477_v19 = vmul.f32 1.442695, %v1474_v48 }
0x15ec   :  { %v1479_v52 = vsel %vm1466_vm12, %v3063_v50, 0.0 }
0x15ed   :  { %3064 = vpow2.f32 %v1477_v19  ;;  %1480 = vadd.xlane.f32.xlu0 %v1479_v52  ;;  %v3728_v52 = vld [vmem:[%s3971_s1 + $0xa0] sm:$0xff] }
0x15ee   :  { %3066 = vrcp.f32 %v1730_v49 }
0x15f3   :  { %v3065_v54 = vpop.eup %3064 }
0x15f4   :  { %v3067_v55 = vpop.eup %3066  ;;  %v1482_v2 = vsel %vm1466_vm12, %v3065_v54, 0.0 }
0x15f5   :  { %1483 = vadd.xlane.f32.xlu2 %v1482_v2  ;;  %v1732_v56 = vmul.f32 %v3067_v55, %v1730_v49  ;;  %vm1737_vm13 = vweird.f32 %v3067_v55 }
0x15f6   :  { %vm1738_vm11 = vmor %vm1736_vm4, %vm1737_vm13  ;;  %vm1813_vm13 = vcmask 123904  }
0x15f7   :  { %v1733_v51 = vsub.f32 1.0, %v1732_v56 }
0x15f8   :  { %v1748_v63 = vpop.permute.xlu1 %1747 }
0x15f9   :  { %v1734_v17 = vmul.f32 %v3067_v55, %v1733_v51 }
0x15fb   :  { %v1735_v57 = vadd.f32 %v3067_v55, %v1734_v17 }
0x15fd   :  { %v1739_v60 = vsel %vm1738_vm11, %v3067_v55, %v1735_v57 }
0x15fe   :  { %v1744_v4 = vsel %vm1741_vm14, %v1743_v36, %v1739_v60 }
0x15ff   :  { %v1750_v6 = vmul.f32 %v1748_v63, %v1744_v4  ;;  %v1757_v13 = vsub.f32 1.0, %v1744_v4  ;;  %v1766_v3 = vmul.f32 %v1764_v41, %v1744_v4 }
0x1600   :  { %v1529_v31 = vpop.permute.xlu1 %1528 }
0x1601   :  { %1530 = vrot.lane.b32.xlu0 %v3604_v0, %s3166_s5 }
0x1609   :  { %1607 = vrot.lane.b32.xlu0 %v2943_v46, %s3166_s5 }
0x160d   :  { %1752 = vrot.lane.b32.xlu2 %v1750_v6, %s3164_s4 }
0x1611   :  { %1775 = vrot.lane.b32.xlu0 %v2943_v46, %s3164_s4 }
0x1615   :  { %1605 = vrot.lane.b32.xlu2 %v2942_v53, %s3166_s5 }
0x1619   :  { %1552 = vrot.lane.b32.xlu0 %v3652_v15, %s3166_s5 }
0x161d   :  { %1773 = vrot.lane.b32.xlu2 %v2942_v53, %s3164_s4 }
0x1625   :  { %1641 = vrot.lane.b32.xlu2 %v3652_v15, %s3164_s4 }
0x1660   :  { %v1481_v0 = vpop.xlane.xlu0 %1480 }
0x1661   :  { %3068 = vrcp.f32 %v1481_v0 }
0x1667   :  { %v3069_v37 = vpop.eup %3068 }
0x1668   :  { %v1484_v9 = vpop.xlane.xlu2 %1483  ;;  %v1487_v18 = vmul.f32 %v3069_v37, %v3063_v50 }
0x1669   :  { %3070 = vrcp.f32 %v1484_v9 }
0x166f   :  { %v3071_v61 = vpop.eup %3070 }
0x1670   :  { %v1488_v21 = vmul.f32 %v3071_v61, %v3065_v54  ;;  %v1753_v22 = vpop.permute.xlu2 %1752 }
0x1671   :  { %v1755_v25 = vadd.f32 %v1753_v22, %v3682_v44 }
0x1672   :  { %v1489_v26 = vpack.c.bf16 %v1488_v21, %v1487_v18 }
0x1673   :  { %3072 = vtanh.f32 %v1755_v25  ;;  %v1531_v27 = vpop.permute.xlu0 %1530 }
0x1674   :  { %2853 = vmatmul.msk.bf16.vlgmr.msrb.gmra.mxu1 %vm1466_vm12, %v1489_v26  ;;  %1543 = vmatpush.bf16.msrb.mxu3 %v1531_v27 }
0x1678   :  { %1544 = vmatpush.bf16.msrb.mxu3 %v1529_v31  ;;  %v1606_v38 = vpop.permute.xlu2 %1605 }
0x1679   :  { %v3073_v15 = vpop.eup %3072 }
0x167a   :  { %1759 = vrot.lane.b32.xlu1 %v3073_v15, %s3166_s5 }
0x167b   :  { %v1608_v35 = vpop.permute.xlu0 %1607 }
0x167c   :  { %1617 = vmatpush.bf16.msrb.mxu0 %v1608_v35 }
0x1680   :  { %1618 = vmatpush.bf16.msrb.mxu0 %v1606_v38  ;;  %v3712_v40 = vpop.permute.xlu2 %1773 }
0x1683   :  { %2866 = vmatmul.msk.bf16.vlgmr.msrb.gmra.mxu0 %vm171_vm7, %v3633_v28  ;;  %v3709_v32 = vpop.permute.xlu0 %1775 }
0x1684   :  { %1788 = vmatpush.bf16.msra.mxu3 %v3709_v32 }
0x1688   :  { %1789 = vmatpush.bf16.msra.mxu3 %v3712_v40  ;;  %v1642_v17 = vpop.permute.xlu2 %1641 }
0x168b   :  { %v1553_v62 = vpop.permute.xlu0 %1552 }
0x16ec   :  { %v1760_v20 = vpop.permute.xlu1 %1759 }
0x16ed   :  { %v1762_v16 = vmul.f32 %v1760_v20, %v1757_v13 }
0x16ef   :  { %v1767_v29 = vadd.f32 %v1766_v3, %v1762_v16 }
0x16f1   :  { %v1768_v45 = vpack.c.bf16 %v1767_v29, %v1767_v29  ;;  %v1502_v34 = vpop.f32.mrf.mxu1 }
0x16f3   :  { %1771 = vrot.lane.b32.xlu1 %v1768_v45, %s3166_s5 }
0x16f9   :  { %v1504_v28 = vpop.f32.mrf.mxu1 }
0x16fa   :  { %v1507_v39 = vpack.c.bf16 %v1504_v28, %v1502_v34 }
0x16fc   :  { %2855 = vmatmul.msk.bf16.vlgmr.msrb.gmra.mxu3 %vm171_vm7, %v1507_v39  ;;  %2867 = vmatmul.msk.bf16.vlgmr.msra.gmra.mxu1 %vm171_vm7, %v1507_v39 }
0x16fd   :  { %1883 = vmatpush.bf16.msrb.mxu3 %v3728_v52 }
0x1765   :  { %v3719_v46 = vpop.permute.xlu1 %1771 }
0x1766   :  { %2878 = vmatmul.msk.bf16.vlgmr.msra.gmra.mxu3 %vm171_vm7, %v3719_v46 }
0x1779   :  { %v1636_v2 = vpop.f32.mrf.mxu1 }
0x177f   :  { %v1546_v59 = vpop.f32.mrf.mxu3 }
0x1780   :  { %v1547_v24 = vadd.f32 %v1546_v59, %v3644_v42  ;;  %v3734_v42 = vld [vmem:[%s3971_s1 + $0x98] sm:$0xff] }
0x1781   :  { %1884 = vmatpush.bf16.msrb.mxu3 %v3734_v42  ;;  %v1638_v63 = vpop.f32.mrf.mxu1 }
0x1782   :  { %v1555_v47 = vadd.f32 %v1553_v62, %v1547_v24 }
0x1784   :  { %v2856_v48 = vmul.f32 -1.442695, %v1555_v47 }
0x1786   :  { %3074 = vpow2.f32 %v2856_v48 }
0x1787   :  { %v1548_v49 = vpop.f32.mrf.mxu3 }
0x1788   :  { %v1549_v50 = vadd.f32 %v1548_v49, %v3656_v23  ;;  %v1620_v23 = vpop.f32.mrf.mxu0 }
0x1789   :  { %v1637_v56 = vadd.f32 %v1636_v2, %v1620_v23 }
0x178a   :  { %v1556_v19 = vadd.f32 %v1553_v62, %v1549_v50  ;;  %v3746_v50 = vperm.slane %v3649_v12, 7 }
0x178b   :  { %v1644_v60 = vadd.f32 %v1642_v17, %v1637_v56 }
0x178c   :  { %v3075_v53 = vpop.eup %3074  ;;  %v2857_v54 = vmul.f32 -1.442695, %v1556_v19 }
0x178d   :  { %v1563_v55 = vadd.f32 1.0, %v3075_v53 }
0x178e   :  { %3076 = vpow2.f32 %v2857_v54 }
0x178f   :  { %3078 = vrcp.f32 %v1563_v55  ;;  %v1576_v4 = vand.u32 2147483648, %v1563_v55  ;;  %v1574_v9 = vand.u32 2147483647, %v1563_v55  ;;  %vm1570_vm10 = vweird.f32 %v1563_v55 }
0x1790   :  { %v1622_v6 = vpop.f32.mrf.mxu0 }
0x1791   :  { %v1639_v37 = vadd.f32 %v1638_v63, %v1622_v6  ;;  %v1577_v21 = vor.u32 1.1754944e-38, %v1576_v4  ;;  %vm1575_vm1 = vcmp.eq.f32.partialorder %v1574_v9, 8.507059e+37 }
0x1793   :  { %v1645_v26 = vadd.f32 %v1642_v17, %v1639_v37 }
0x1794   :  { %v3077_v51 = vpop.eup %3076 }
0x1795   :  { %v3079_v57 = vpop.eup %3078  ;;  %v1564_v5 = vadd.f32 1.0, %v3077_v51 }
0x1796   :  { %v1566_v58 = vmul.f32 %v3079_v57, %v1563_v55  ;;  %vm1571_vm15 = vweird.f32 %v3079_v57 }
0x1797   :  { %3080 = vrcp.f32 %v1564_v5  ;;  %vm1572_vm0 = vmor %vm1570_vm10, %vm1571_vm15  ;;  %v1589_v38 = vand.u32 2147483647, %v1564_v5  ;;  %v1591_v41 = vand.u32 2147483648, %v1564_v5  ;;  %vm1585_vm3 = vweird.f32 %v1564_v5 }
0x1798   :  { %v1567_v36 = vsub.f32 1.0, %v1566_v58  ;;  %3082 = vtanh.f32 %v1644_v60 }
0x1799   :  { %3084 = vtanh.f32 %v1645_v26  ;;  %v1592_v45 = vor.u32 1.1754944e-38, %v1591_v41  ;;  %vm1590_vm6 = vcmp.eq.f32.partialorder %v1589_v38, 8.507059e+37 }
0x179a   :  { %v1568_v0 = vmul.f32 %v3079_v57, %v1567_v36 }
0x179c   :  { %v1569_v61 = vadd.f32 %v3079_v57, %v1568_v0 }
0x179d   :  { %v3081_v18 = vpop.eup %3080 }
0x179e   :  { %v1581_v22 = vmul.f32 %v3081_v18, %v1564_v5  ;;  %v1573_v25 = vsel %vm1572_vm0, %v3079_v57, %v1569_v61  ;;  %v3083_v35 = vpop.eup %3082  ;;  %vm1586_vm2 = vweird.f32 %v3081_v18 }
0x179f   :  { %v1578_v27 = vsel %vm1575_vm1, %v1577_v21, %v1573_v25  ;;  %vm1587_vm5 = vmor %vm1585_vm3, %vm1586_vm2  ;;  %v3085_v59 = vpop.eup %3084 }
0x17a0   :  { %v1582_v31 = vsub.f32 1.0, %v1581_v22  ;;  %v1650_v15 = vsub.f32 1.0, %v1578_v27  ;;  %v1648_v20 = vmul.f32 %v3083_v35, %v1578_v27 }
0x17a2   :  { %v1583_v13 = vmul.f32 %v3081_v18, %v1582_v31  ;;  %v1652_v3 = vmul.f32 %v1650_v15, %v3627_v10 }
0x17a4   :  { %v1584_v16 = vadd.f32 %v3081_v18, %v1583_v13  ;;  %v1654_v29 = vadd.f32 %v1652_v3, %v1648_v20 }
0x17a6   :  { %v1588_v34 = vsel %vm1587_vm5, %v3081_v18, %v1584_v16  ;;  %1665 = vxpose.xlu1.b32.start [1/2] (short) (narrow) %v1654_v29, 32 }
0x17a7   :  { %v1593_v28 = vsel %vm1590_vm6, %v1592_v45, %v1588_v34 }
0x17a8   :  { %v1651_v39 = vsub.f32 1.0, %v1593_v28  ;;  %v1649_v62 = vmul.f32 %v3085_v59, %v1593_v28 }
0x17aa   :  { %v1653_v24 = vmul.f32 %v1651_v39, %v3629_v11 }
0x17ac   :  { %v1655_v47 = vadd.f32 %v1653_v24, %v1649_v62 }
0x17ae   :  { %v3739_v48 = vpack.c.bf16 %v1655_v47, %v1654_v29  ;;  %1666 = vxpose.xlu1.b32.end [2/2] (short) (narrow) %v1655_v47, 32 }
0x17b0   :  { %1836 = vmatpush.bf16.msrb.mxu1 %v3739_v48  ;;  %2021 = vmatpush.bf16.msra.mxu3 %v3739_v48 }
0x17b4   :  { %1974 = vmatpush.bf16.msra.mxu1 %v3709_v32 }
0x17b8   :  { %1975 = vmatpush.bf16.msra.mxu1 %v3712_v40 }
0x17e9   :  { %v1791_v10 = vpop.f32.mrf.mxu3 }
0x17ea   :  { %v1792_v2 = vadd.f32 %v1791_v10, %v3746_v50 }
0x17ec   :  { %v1795_v56 = vpack.c.bf16 %v1792_v2, %v1792_v2 }
0x17f1   :  { %v1793_v49 = vpop.f32.mrf.mxu3 }
0x1818   :  { %1891 = vrot.lane.b32.xlu1 %v3746_v50, %s3166_s5 }
0x184a   :  { %v1681_v11 = vpop.trf.xlu1 }
0x1852   :  { %v1682_v19 = vpop.trf.xlu1 }
0x1853   :  { %v3754_v23 = vpack.c.bf16 %v1682_v19, %v1681_v11 }
0x185a   :  { %v1683_v53 = vpop.trf.xlu1 }
0x1862   :  { %v1684_v54 = vpop.trf.xlu1 }
0x1863   :  { %v3750_v55 = vpack.c.bf16 %v1684_v54, %v1683_v53 }
0x1865   :  { %1805 = vmatpush.bf16.msra.mxu0 %v3750_v55 }
0x1869   :  { %1806 = vmatpush.bf16.msra.mxu0 %v3754_v23 }
0x186c   :  { %2879 = vmatmul.msk.bf16.vlgmr.msra.gmra.mxu0 %vm171_vm7, %v1795_v56 }
0x186d   :  { %1907 = vmatpush.bf16.msrb.mxu0 %v3617_v7 }
0x1871   :  { %1908 = vmatpush.bf16.msrb.mxu0 %v3623_v8 }
0x188a   :  { %v3794_v27 = vpop.permute.xlu1 %1891 }
0x18e9   :  { %v1808_v17 = vpop.f32.mrf.mxu0 }
0x18ea   :  { %v1812_v57 = vsel %vm3762_vm9, %v1808_v17, -1e+30 }
0x18eb   :  { %v1814_v5 = vsel %vm1813_vm13, %v1812_v57, -inf }
0x18ec   :  { %1815 = vmax.xlane.f32.xlu0 %v1814_v5 }
0x18f1   :  { %v1810_v58 = vpop.f32.mrf.mxu0 }
0x1900   :  { %1855 = vrot.lane.b32.xlu0 %v3728_v52, %s3166_s5 }
0x195f   :  { %v1816_v60 = vpop.xlane.xlu0 %1815 }
0x1960   :  { %v1817_v36 = vsub.f32 %v1812_v57, %v1816_v60 }
0x1962   :  { %v1818_v63 = vmul.f32 1.442695, %v1817_v36 }
0x1964   :  { %3086 = vpow2.f32 %v1818_v63 }
0x196a   :  { %v3087_v30 = vpop.eup %3086 }
0x196b   :  { %v1820_v33 = vsel %vm1813_vm13, %v3087_v30, 0.0 }
0x196c   :  { %1821 = vadd.xlane.f32.xlu2 %v1820_v33 }
0x1972   :  { %v3774_v4 = vpop.permute.xlu0 %1855 }
0x1973   :  { %1865 = vmatpush.bf16.msrb.mxu2 %v3774_v4  ;;  %2034 = vmatpush.bf16.msra.mxu0 %v3774_v4 }
0x1984   :  { %1853 = vrot.lane.b32.xlu2 %v3734_v42, %s3166_s5 }
0x19df   :  { %v1822_v6 = vpop.xlane.xlu2 %1821 }
0x19e0   :  { %3088 = vrcp.f32 %v1822_v6 }
0x19e6   :  { %v3089_v0 = vpop.eup %3088 }
0x19e7   :  { %v1824_v9 = vmul.f32 %v3089_v0, %v3087_v30  ;;  %v3778_v37 = vpop.permute.xlu2 %1853 }
0x19e8   :  { %1866 = vmatpush.bf16.msrb.mxu2 %v3778_v37  ;;  %2035 = vmatpush.bf16.msra.mxu0 %v3778_v37 }
0x19e9   :  { %v1825_v61 = vpack.c.bf16 %v1824_v9, %v1824_v9 }
0x19eb   :  { %2880 = vmatmul.msk.bf16.vlgmr.msrb.gmra.mxu1 %vm1466_vm12, %v1825_v61  ;;  %2889 = vmatmul.msk.bf16.vlgmr.msrb.gmra.mxu2 %vm171_vm7, %v3719_v46 }
0x19ec   :  { %1991 = vmatpush.bf16.msra.mxu2 %v3750_v55  ;;  %2050 = vmatpush.bf16.msrb.mxu1 %v3728_v52 }
0x19f0   :  { %1992 = vmatpush.bf16.msra.mxu2 %v3754_v23  ;;  %2051 = vmatpush.bf16.msrb.mxu1 %v3734_v42 }
0x19f4   :  { %2070 = vmatpush.bf16.msrb.mxu2 %v3617_v7 }
0x19f8   :  { %2071 = vmatpush.bf16.msrb.mxu2 %v3623_v8 }
0x1a68   :  { %v1838_v18 = vpop.f32.mrf.mxu1 }
0x1a69   :  { %v1842_v21 = vpack.c.bf16 %v1838_v18, %v1838_v18 }
0x1a6b   :  { %2890 = vmatmul.msk.bf16.vlgmr.msrb.gmra.mxu3 %vm171_vm7, %v1842_v21 }
0x1a6c   :  { %2137 = vmatpush.bf16.msrb.mxu3 %v3709_v32 }
0x1a6e   :  { %v1868_v22 = vpop.f32.mrf.mxu2 }
0x1a70   :  { %2138 = vmatpush.bf16.msrb.mxu3 %v3712_v40  ;;  %v1840_v46 = vpop.f32.mrf.mxu1 }
0x1a76   :  { %v1870_v25 = vpop.f32.mrf.mxu2 }
0x1aee   :  { %v1886_v26 = vpop.f32.mrf.mxu3 }
0x1aef   :  { %v1887_v31 = vadd.f32 %v1886_v26, %v1868_v22 }
0x1af1   :  { %v1894_v15 = vadd.f32 %v3794_v27, %v1887_v31 }
0x1af3   :  { %3090 = vtanh.f32 %v1894_v15 }
0x1af6   :  { %v1888_v35 = vpop.f32.mrf.mxu3 }
0x1af9   :  { %v3091_v38 = vpop.eup %3090 }
0x1afa   :  { %1896 = vst.msk [vmem:[#allocation3] sm:$0x3] %vm371_vm8, %v3091_v38  ;;  %v1897_v41 = vpack.c.bf16 %v3091_v38, %v3091_v38  ;;  %v1954_v56 = vrot.slane %v3091_v38, 6 }
0x1afc   :  { %2891 = vmatmul.msk.bf16.vlgmr.msrb.gmra.mxu0 %vm171_vm7, %v1897_v41 }
0x1afd   :  { %2154 = vmatpush.bf16.msrb.mxu0 %v3750_v55 }
0x1b01   :  { %2155 = vmatpush.bf16.msrb.mxu0 %v3754_v23 }
0x1b79   :  { %v1910_v13 = vpop.f32.mrf.mxu0 }
0x1b7a   :  { %v1911_v20 = vadd.f32 %v1910_v13, %v3672_v14 }
0x1b7c   :  { %v1915_v3 = vrot.slane %v1911_v20, 6 }
0x1b7e   :  { %1937 = vrot.lane.b32.xlu0 %v1915_v3, %s3164_s4  ;;  %v1917_v29 = vadd.f32 %v1915_v3, %v3682_v44 }
0x1b80   :  { %v2892_v45 = vmul.f32 -1.442695, %v1917_v29 }
0x1b81   :  { %v1912_v16 = vpop.f32.mrf.mxu0 }
0x1b82   :  { %3092 = vpow2.f32 %v2892_v45 }
0x1b88   :  { %v3093_v34 = vpop.eup %3092 }
0x1b89   :  { %v1921_v28 = vadd.f32 1.0, %v3093_v34 }
0x1b8b   :  { %3094 = vrcp.f32 %v1921_v28  ;;  %v1933_v10 = vand.u32 2147483648, %v1921_v28  ;;  %vm1927_vm11 = vweird.f32 %v1921_v28  ;;  %v1931_v49 = vand.u32 2147483647, %v1921_v28 }
0x1b8d   :  { %v1934_v19 = vor.u32 1.1754944e-38, %v1933_v10  ;;  %vm1932_vm15 = vcmp.eq.f32.partialorder %v1931_v49, 8.507059e+37 }
0x1b91   :  { %v3095_v39 = vpop.eup %3094 }
0x1b92   :  { %v1923_v59 = vmul.f32 %v3095_v39, %v1921_v28  ;;  %vm1928_vm4 = vweird.f32 %v3095_v39 }
0x1b93   :  { %vm1929_vm14 = vmor %vm1927_vm11, %vm1928_vm4 }
0x1b94   :  { %v1924_v62 = vsub.f32 1.0, %v1923_v59 }
0x1b96   :  { %v1925_v24 = vmul.f32 %v3095_v39, %v1924_v62 }
0x1b98   :  { %v1926_v47 = vadd.f32 %v3095_v39, %v1925_v24 }
0x1b9a   :  { %v1930_v11 = vsel %vm1929_vm14, %v3095_v39, %v1926_v47 }
0x1b9b   :  { %v1935_v54 = vsel %vm1932_vm15, %v1934_v19, %v1930_v11 }
0x1b9c   :  { %v1947_v60 = vsub.f32 1.0, %v1935_v54 }
0x1bf0   :  { %v1938_v53 = vpop.permute.xlu0 %1937 }
0x1bf1   :  { %v1940_v2 = vmul.f32 %v1938_v53, %v1935_v54 }
0x1bf3   :  { %1942 = vrot.lane.b32.xlu2 %v1940_v2, %s3164_s4 }
0x1bfb   :  { %1955 = vrot.lane.b32.xlu2 %v1954_v56, %s3167_s13 }
0x1c4d   :  { %v1943_v17 = vpop.permute.xlu2 %1942 }
0x1c4e   :  { %v1945_v57 = vadd.f32 %v1943_v17, %v3682_v44 }
0x1c50   :  { %3096 = vtanh.f32 %v1945_v57 }
0x1c55   :  { %v1956_v58 = vpop.permute.xlu2 %1955 }
0x1c56   :  { %v3097_v5 = vpop.eup %3096  ;;  %v1958_v63 = vmul.f32 %v1956_v58, %v1935_v54 }
0x1c57   :  { %1949 = vrot.lane.b32.xlu0 %v3097_v5, %s3166_s5 }
0x1cc9   :  { %v1950_v36 = vpop.permute.xlu0 %1949 }
0x1cca   :  { %v1952_v30 = vmul.f32 %v1950_v36, %v1947_v60 }
0x1ccc   :  { %v1959_v33 = vadd.f32 %v1958_v63, %v1952_v30 }
0x1cce   :  { %v1960_v6 = vpack.c.bf16 %v1959_v33, %v1959_v33 }
0x1cd0   :  { %v1962_v0 = vrot.slane %v1960_v6, 1 }
0x1cd2   :  { %1963 = vrot.lane.b32.xlu0 %v1962_v0, %s3166_s5 }
0x1d44   :  { %v1964_v9 = vpop.permute.xlu0 %1963 }
0x1d45   :  { %2893 = vmatmul.msk.bf16.vlgmr.msra.gmra.mxu1 %vm171_vm7, %v1964_v9  ;;  %2896 = vmatmul.msk.bf16.vlgmr.msra.gmra.mxu0 %vm171_vm7, %v1964_v9 }
0x1d46   :  { %2184 = vmatpush.bf16.msra.mxu1 %v3739_v48  ;;  %2233 = vmatpush.bf16.msra.mxu0 %v3617_v7 }
0x1d4a   :  { %2234 = vmatpush.bf16.msra.mxu0 %v3623_v8 }
0x1dc2   :  { %v1977_v61 = vpop.f32.mrf.mxu1  ;;  %v2037_v18 = vpop.f32.mrf.mxu0 }
0x1dc3   :  { %v1978_v21 = vadd.f32 %v1977_v61, %v3746_v50 }
0x1dc5   :  { %v1981_v22 = vpack.c.bf16 %v1978_v21, %v1978_v21 }
0x1dc7   :  { %2894 = vmatmul.msk.bf16.vlgmr.msra.gmra.mxu2 %vm171_vm7, %v1981_v22 }
0x1dc8   :  { %2197 = vmatpush.bf16.msra.mxu2 %v3774_v4 }
0x1dca   :  { %v1979_v46 = vpop.f32.mrf.mxu1  ;;  %v2039_v25 = vpop.f32.mrf.mxu0 }
0x1dcc   :  { %2198 = vmatpush.bf16.msra.mxu2 %v3778_v37 }
0x1e4a   :  { %v1994_v26 = vpop.f32.mrf.mxu2 }
0x1e4b   :  { %v1998_v31 = vsel %vm3762_vm9, %v1994_v26, -1e+30 }
0x1e4c   :  { %v1999_v15 = vsel %vm1813_vm13, %v1998_v31, -inf }
0x1e4d   :  { %2000 = vmax.xlane.f32.xlu2 %v1999_v15 }
0x1e52   :  { %v1996_v35 = vpop.f32.mrf.mxu2 }
0x1ec0   :  { %v2001_v38 = vpop.xlane.xlu2 %2000 }
0x1ec1   :  { %v2002_v41 = vsub.f32 %v1998_v31, %v2001_v38 }
0x1ec3   :  { %v2003_v13 = vmul.f32 1.442695, %v2002_v41 }
0x1ec5   :  { %3098 = vpow2.f32 %v2003_v13 }
0x1ecb   :  { %v3099_v20 = vpop.eup %3098 }
0x1ecc   :  { %v2005_v3 = vsel %vm1813_vm13, %v3099_v20, 0.0 }
0x1ecd   :  { %2006 = vadd.xlane.f32.xlu0 %v2005_v3 }
0x1f40   :  { %v2007_v16 = vpop.xlane.xlu0 %2006 }
0x1f41   :  { %3100 = vrcp.f32 %v2007_v16 }
0x1f47   :  { %v3101_v29 = vpop.eup %3100 }
0x1f48   :  { %v2009_v45 = vmul.f32 %v3101_v29, %v3099_v20 }
0x1f4a   :  { %v2010_v34 = vpack.c.bf16 %v2009_v45, %v2009_v45 }
0x1f4c   :  { %2895 = vmatmul.msk.bf16.vlgmr.msra.gmra.mxu3 %vm1466_vm12, %v2010_v34 }
0x1f4d   :  { %2213 = vmatpush.bf16.msra.mxu3 %v3728_v52 }
0x1f51   :  { %2214 = vmatpush.bf16.msra.mxu3 %v3734_v42 }
0x1fcf   :  { %v2023_v28 = vpop.f32.mrf.mxu3 }
0x1fd0   :  { %v2027_v39 = vpack.c.bf16 %v2023_v28, %v2023_v28 }
0x1fd2   :  { %2897 = vmatmul.msk.bf16.vlgmr.msrb.gmra.mxu1 %vm171_vm7, %v2027_v39 }
0x1fd3   :  { %2300 = vmatpush.bf16.msrb.mxu1 %v3709_v32 }
0x1fd7   :  { %2301 = vmatpush.bf16.msrb.mxu1 %v3712_v40  ;;  %v2025_v59 = vpop.f32.mrf.mxu3 }
0x204f   :  { %v2053_v62 = vpop.f32.mrf.mxu1 }
0x2050   :  { %v2054_v24 = vadd.f32 %v2053_v62, %v2037_v18 }
0x2052   :  { %v2057_v47 = vadd.f32 %v2054_v24, %v3794_v27 }
0x2054   :  { %3102 = vtanh.f32 %v2057_v47 }
0x2057   :  { %v2055_v10 = vpop.f32.mrf.mxu1 }
0x205a   :  { %v3103_v49 = vpop.eup %3102 }
0x205b   :  { %2059 = vst.msk [vmem:[#allocation3 + $0x2] sm:$0x3] %vm371_vm8, %v3103_v49  ;;  %v2060_v11 = vpack.c.bf16 %v3103_v49, %v3103_v49  ;;  %v2117_v56 = vrot.slane %v3103_v49, 4 }
0x205d   :  { %2898 = vmatmul.msk.bf16.vlgmr.msrb.gmra.mxu2 %vm171_vm7, %v2060_v11 }
0x205e   :  { %2317 = vmatpush.bf16.msrb.mxu2 %v3750_v55 }
0x2062   :  { %2318 = vmatpush.bf16.msrb.mxu2 %v3754_v23 }
0x20e0   :  { %v2073_v19 = vpop.f32.mrf.mxu2 }
0x20e1   :  { %v2074_v53 = vadd.f32 %v2073_v19, %v3672_v14 }
0x20e3   :  { %v2078_v54 = vrot.slane %v2074_v53, 4 }
0x20e5   :  { %2100 = vrot.lane.b32.xlu2 %v2078_v54, %s3164_s4  ;;  %v2080_v17 = vadd.f32 %v2078_v54, %v3682_v44 }
0x20e7   :  { %v2899_v57 = vmul.f32 -1.442695, %v2080_v17 }
0x20e8   :  { %v2075_v2 = vpop.f32.mrf.mxu2 }
0x20e9   :  { %3104 = vpow2.f32 %v2899_v57 }
0x20ed   :  { %2118 = vrot.lane.b32.xlu2 %v2117_v56, %s3167_s13 }
0x20ef   :  { %v3105_v5 = vpop.eup %3104 }
0x20f0   :  { %v2084_v58 = vadd.f32 1.0, %v3105_v5 }
0x20f2   :  { %3106 = vrcp.f32 %v2084_v58  ;;  %v2096_v6 = vand.u32 2147483648, %v2084_v58  ;;  %vm2090_vm0 = vweird.f32 %v2084_v58  ;;  %v2094_v0 = vand.u32 2147483647, %v2084_v58 }
0x20f4   :  { %v2097_v61 = vor.u32 1.1754944e-38, %v2096_v6  ;;  %vm2095_vm2 = vcmp.eq.f32.partialorder %v2094_v0, 8.507059e+37 }
0x20f8   :  { %v3107_v60 = vpop.eup %3106 }
0x20f9   :  { %v2086_v36 = vmul.f32 %v3107_v60, %v2084_v58  ;;  %vm2091_vm10 = vweird.f32 %v3107_v60 }
0x20fa   :  { %vm2092_vm1 = vmor %vm2090_vm0, %vm2091_vm10 }
0x20fb   :  { %v2087_v63 = vsub.f32 1.0, %v2086_v36 }
0x20fd   :  { %v2088_v30 = vmul.f32 %v3107_v60, %v2087_v63 }
0x20ff   :  { %v2089_v33 = vadd.f32 %v3107_v60, %v2088_v30 }
0x2101   :  { %v2093_v9 = vsel %vm2092_vm1, %v3107_v60, %v2089_v33 }
0x2102   :  { %v2098_v21 = vsel %vm2095_vm2, %v2097_v61, %v2093_v9 }
0x2103   :  { %v2110_v15 = vsub.f32 1.0, %v2098_v21 }
0x213f   :  { %v2101_v18 = vpop.permute.xlu2 %2100 }
0x2140   :  { %v2103_v22 = vmul.f32 %v2101_v18, %v2098_v21 }
0x2142   :  { %2105 = vrot.lane.b32.xlu0 %v2103_v22, %s3164_s4 }
0x2147   :  { %v2119_v31 = vpop.permute.xlu2 %2118 }
0x2148   :  { %v2121_v38 = vmul.f32 %v2119_v31, %v2098_v21 }
0x21b4   :  { %v2106_v46 = vpop.permute.xlu0 %2105 }
0x21b5   :  { %v2108_v25 = vadd.f32 %v2106_v46, %v3682_v44 }
0x21b7   :  { %3108 = vtanh.f32 %v2108_v25 }
0x21bd   :  { %v3109_v26 = vpop.eup %3108 }
0x21be   :  { %2112 = vrot.lane.b32.xlu0 %v3109_v26, %s3166_s5 }
0x2230   :  { %v2113_v35 = vpop.permute.xlu0 %2112 }
0x2231   :  { %v2115_v41 = vmul.f32 %v2113_v35, %v2110_v15 }
0x2233   :  { %v2122_v13 = vadd.f32 %v2121_v38, %v2115_v41 }
0x2235   :  { %v2123_v20 = vpack.c.bf16 %v2122_v13, %v2122_v13 }
0x2237   :  { %v2125_v3 = vrot.slane %v2123_v20, 2 }
0x2239   :  { %2126 = vrot.lane.b32.xlu0 %v2125_v3, %s3166_s5 }
0x22ab   :  { %v2127_v16 = vpop.permute.xlu0 %2126 }
0x22ac   :  { %2900 = vmatmul.msk.bf16.vlgmr.msrb.gmra.mxu3 %vm171_vm7, %v2127_v16  ;;  %2903 = vmatmul.msk.bf16.vlgmr.msra.gmra.mxu2 %vm171_vm7, %v2127_v16 }
0x22ad   :  { %2347 = vmatpush.bf16.msrb.mxu3 %v3739_v48  ;;  %2396 = vmatpush.bf16.msra.mxu2 %v3617_v7 }
0x22b1   :  { %2397 = vmatpush.bf16.msra.mxu2 %v3623_v8 }
0x232f   :  { %v2140_v29 = vpop.f32.mrf.mxu3  ;;  %v2200_v45 = vpop.f32.mrf.mxu2 }
0x2330   :  { %v2141_v34 = vadd.f32 %v2140_v29, %v3746_v50 }
0x2332   :  { %v2144_v28 = vpack.c.bf16 %v2141_v34, %v2141_v34 }
0x2334   :  { %2901 = vmatmul.msk.bf16.vlgmr.msrb.gmra.mxu0 %vm171_vm7, %v2144_v28 }
0x2335   :  { %2360 = vmatpush.bf16.msrb.mxu0 %v3774_v4 }
0x2337   :  { %v2142_v39 = vpop.f32.mrf.mxu3  ;;  %v2202_v59 = vpop.f32.mrf.mxu2 }
0x2339   :  { %2361 = vmatpush.bf16.msrb.mxu0 %v3778_v37 }
0x23b1   :  { %v2157_v62 = vpop.f32.mrf.mxu0 }
0x23b2   :  { %v2161_v24 = vsel %vm3762_vm9, %v2157_v62, -1e+30 }
0x23b3   :  { %v2162_v7 = vsel %vm1813_vm13, %v2161_v24, -inf }
0x23b4   :  { %2163 = vmax.xlane.f32.xlu2 %v2162_v7 }
0x23b9   :  { %v2159_v8 = vpop.f32.mrf.mxu0 }
0x2427   :  { %v2164_v47 = vpop.xlane.xlu2 %2163 }
0x2428   :  { %v2165_v10 = vsub.f32 %v2161_v24, %v2164_v47 }
0x242a   :  { %v2166_v49 = vmul.f32 1.442695, %v2165_v10 }
0x242c   :  { %3110 = vpow2.f32 %v2166_v49 }
0x2432   :  { %v3111_v11 = vpop.eup %3110 }
0x2433   :  { %v2168_v19 = vsel %vm1813_vm13, %v3111_v11, 0.0 }
0x2434   :  { %2169 = vadd.xlane.f32.xlu0 %v2168_v19  ;;  %v3156_v19 = vld [vmem:[%s3971_s1 + $0x68] sm:$0xff] }
0x24a7   :  { %v2170_v53 = vpop.xlane.xlu0 %2169 }
0x24a8   :  { %3112 = vrcp.f32 %v2170_v53 }
0x24ae   :  { %v3113_v54 = vpop.eup %3112 }
0x24af   :  { %v2172_v2 = vmul.f32 %v3113_v54, %v3111_v11 }
0x24b1   :  { %v2173_v56 = vpack.c.bf16 %v2172_v2, %v2172_v2 }
0x24b3   :  { %2902 = vmatmul.msk.bf16.vlgmr.msra.gmra.mxu1 %vm1466_vm12, %v2173_v56 }
0x24b4   :  { %2376 = vmatpush.bf16.msra.mxu1 %v3728_v52 }
0x24b8   :  { %2377 = vmatpush.bf16.msra.mxu1 %v3734_v42 }
0x2530   :  { %v2186_v17 = vpop.f32.mrf.mxu1 }
0x2531   :  { %v2190_v57 = vpack.c.bf16 %v2186_v17, %v2186_v17 }
0x2533   :  { %2904 = vmatmul.msk.bf16.vlgmr.msra.gmra.mxu3 %vm171_vm7, %v2190_v57 }
0x2534   :  { %2459 = vmatpush.bf16.msra.mxu3 %v3709_v32 }
0x2538   :  { %2460 = vmatpush.bf16.msra.mxu3 %v3712_v40  ;;  %v2188_v5 = vpop.f32.mrf.mxu1 }
0x25b6   :  { %v2216_v58 = vpop.f32.mrf.mxu3 }
0x25b7   :  { %v2217_v60 = vadd.f32 %v2216_v58, %v2200_v45 }
0x25b9   :  { %v2220_v36 = vadd.f32 %v2217_v60, %v3794_v27 }
0x25bb   :  { %3114 = vtanh.f32 %v2220_v36 }
0x25be   :  { %v2218_v63 = vpop.f32.mrf.mxu3 }
0x25c1   :  { %v3115_v30 = vpop.eup %3114 }
0x25c2   :  { %2222 = vst.msk [vmem:[#allocation3 + $0x4] sm:$0x3] %vm371_vm8, %v3115_v30  ;;  %v2223_v33 = vpack.c.bf16 %v3115_v30, %v3115_v30  ;;  %v2280_v39 = vrot.slane %v3115_v30, 2 }
0x25c4   :  { %2905 = vmatmul.msk.bf16.vlgmr.msra.gmra.mxu0 %vm171_vm7, %v2223_v33 }
0x25c5   :  { %2476 = vmatpush.bf16.msra.mxu0 %v3750_v55 }
0x25c9   :  { %2477 = vmatpush.bf16.msra.mxu0 %v3754_v23 }
0x2641   :  { %v2236_v6 = vpop.f32.mrf.mxu0 }
0x2642   :  { %v2237_v0 = vadd.f32 %v2236_v6, %v3672_v14 }
0x2644   :  { %v2241_v9 = vrot.slane %v2237_v0, 2 }
0x2646   :  { %2263 = vrot.lane.b32.xlu1 %v2241_v9, %s3164_s4  ;;  %v2243_v18 = vadd.f32 %v2241_v9, %v3682_v44 }
0x2648   :  { %v2906_v21 = vmul.f32 -1.442695, %v2243_v18 }
0x2649   :  { %v2238_v61 = vpop.f32.mrf.mxu0 }
0x264a   :  { %3116 = vpow2.f32 %v2906_v21 }
0x2650   :  { %v3117_v22 = vpop.eup %3116 }
0x2651   :  { %v2247_v46 = vadd.f32 1.0, %v3117_v22 }
0x2653   :  { %3118 = vrcp.f32 %v2247_v46  ;;  %v2259_v38 = vand.u32 2147483648, %v2247_v46  ;;  %vm2253_vm5 = vweird.f32 %v2247_v46  ;;  %v2257_v41 = vand.u32 2147483647, %v2247_v46 }
0x2655   :  { %v2260_v20 = vor.u32 1.1754944e-38, %v2259_v38  ;;  %vm2258_vm4 = vcmp.eq.f32.partialorder %v2257_v41, 8.507059e+37 }
0x2659   :  { %v3119_v25 = vpop.eup %3118 }
0x265a   :  { %v2249_v26 = vmul.f32 %v3119_v25, %v2247_v46  ;;  %vm2254_vm3 = vweird.f32 %v3119_v25 }
0x265b   :  { %vm2255_vm6 = vmor %vm2253_vm5, %vm2254_vm3 }
0x265c   :  { %v2250_v31 = vsub.f32 1.0, %v2249_v26 }
0x265e   :  { %v2251_v15 = vmul.f32 %v3119_v25, %v2250_v31 }
0x2660   :  { %v2252_v35 = vadd.f32 %v3119_v25, %v2251_v15 }
0x2662   :  { %v2256_v13 = vsel %vm2255_vm6, %v3119_v25, %v2252_v35 }
0x2663   :  { %v2261_v16 = vsel %vm2258_vm4, %v2260_v20, %v2256_v13  ;;  %v3906_v20 = vadd.f32 %v3349_v1, %v158_v43 }
0x2664   :  { %v2273_v62 = vsub.f32 1.0, %v2261_v16 }
0x26b8   :  { %v2264_v3 = vpop.permute.xlu1 %2263 }
0x26b9   :  { %v2266_v29 = vmul.f32 %v2264_v3, %v2261_v16 }
0x26bb   :  { %2268 = vrot.lane.b32.xlu1 %v2266_v29, %s3164_s4 }
0x272d   :  { %v2269_v45 = vpop.permute.xlu1 %2268 }
0x272e   :  { %v2271_v34 = vadd.f32 %v2269_v45, %v3682_v44  ;;  %v3155_v44 = vld [vmem:[%s3971_s1 + $0x70] sm:$0xff] }
0x2730   :  { %3120 = vtanh.f32 %v2271_v34 }
0x2736   :  { %v3121_v28 = vpop.eup %3120 }
0x2737   :  { %2275 = vrot.lane.b32.xlu1 %v3121_v28, %s3166_s5 }
0x273f   :  { %2281 = vrot.lane.b32.xlu1 %v2280_v39, %s3167_s13 }
0x27a9   :  { %v2276_v59 = vpop.permute.xlu1 %2275 }
0x27aa   :  { %v2278_v7 = vmul.f32 %v2276_v59, %v2273_v62 }
0x27b1   :  { %v2282_v24 = vpop.permute.xlu1 %2281 }
0x27b2   :  { %v2284_v8 = vmul.f32 %v2282_v24, %v2261_v16 }
0x27b4   :  { %v2285_v47 = vadd.f32 %v2284_v8, %v2278_v7 }
0x27b6   :  { %v2286_v10 = vpack.c.bf16 %v2285_v47, %v2285_v47 }
0x27b8   :  { %v2288_v49 = vrot.slane %v2286_v10, 3 }
0x27ba   :  { %2289 = vrot.lane.b32.xlu1 %v2288_v49, %s3166_s5 }
0x282c   :  { %v2290_v11 = vpop.permute.xlu1 %2289 }
0x282d   :  { %2907 = vmatmul.msk.bf16.vlgmr.msrb.gmra.mxu1 %vm171_vm7, %v2290_v11  ;;  %2910 = vmatmul.msk.bf16.vlgmr.msrb.gmra.mxu0 %vm171_vm7, %v2290_v11 }
0x282e   :  { %2506 = vmatpush.bf16.msrb.mxu1 %v3739_v48  ;;  %2555 = vmatpush.bf16.msrb.mxu0 %v3155_v44 }
0x2832   :  { %2556 = vmatpush.bf16.msrb.mxu0 %v3156_v19 }
0x28aa   :  { %v2303_v53 = vpop.f32.mrf.mxu1  ;;  %v2363_v54 = vpop.f32.mrf.mxu0 }
0x28ab   :  { %v2304_v2 = vadd.f32 %v2303_v53, %v3746_v50 }
0x28ad   :  { %v2307_v56 = vpack.c.bf16 %v2304_v2, %v2304_v2 }
0x28af   :  { %2908 = vmatmul.msk.bf16.vlgmr.msrb.gmra.mxu2 %vm171_vm7, %v2307_v56 }
0x28b0   :  { %2519 = vmatpush.bf16.msrb.mxu2 %v3774_v4 }
0x28b2   :  { %v2305_v17 = vpop.f32.mrf.mxu1  ;;  %v2365_v57 = vpop.f32.mrf.mxu0 }
0x28b4   :  { %2520 = vmatpush.bf16.msrb.mxu2 %v3778_v37 }
0x2932   :  { %v2320_v5 = vpop.f32.mrf.mxu2 }
0x2933   :  { %v2324_v58 = vsel %vm3762_vm9, %v2320_v5, -1e+30 }
0x2934   :  { %v2325_v60 = vsel %vm1813_vm13, %v2324_v58, -inf }
0x2935   :  { %2326 = vmax.xlane.f32.xlu2 %v2325_v60 }
0x293a   :  { %v2322_v36 = vpop.f32.mrf.mxu2 }
0x29a8   :  { %v2327_v63 = vpop.xlane.xlu2 %2326 }
0x29a9   :  { %v2328_v30 = vsub.f32 %v2324_v58, %v2327_v63 }
0x29ab   :  { %v2329_v33 = vmul.f32 1.442695, %v2328_v30 }
0x29ad   :  { %3122 = vpow2.f32 %v2329_v33 }
0x29b3   :  { %v3123_v6 = vpop.eup %3122 }
0x29b4   :  { %v2331_v0 = vsel %vm1813_vm13, %v3123_v6, 0.0 }
0x29b5   :  { %2332 = vadd.xlane.f32.xlu1 %v2331_v0 }
0x2a28   :  { %v2333_v9 = vpop.xlane.xlu1 %2332 }
0x2a29   :  { %3124 = vrcp.f32 %v2333_v9 }
0x2a2f   :  { %v3125_v61 = vpop.eup %3124 }
0x2a30   :  { %v2335_v18 = vmul.f32 %v3125_v61, %v3123_v6 }
0x2a32   :  { %v2336_v21 = vpack.c.bf16 %v2335_v18, %v2335_v18 }
0x2a34   :  { %2909 = vmatmul.msk.bf16.vlgmr.msrb.gmra.mxu3 %vm1466_vm12, %v2336_v21 }
0x2a35   :  { %2535 = vmatpush.bf16.msrb.mxu3 %v3728_v52 }
0x2a39   :  { %2536 = vmatpush.bf16.msrb.mxu3 %v3734_v42 }
0x2ab7   :  { %v2349_v22 = vpop.f32.mrf.mxu3 }
0x2ab8   :  { %v2353_v46 = vpack.c.bf16 %v2349_v22, %v2349_v22 }
0x2aba   :  { %2911 = vmatmul.msk.bf16.vlgmr.msra.gmra.mxu1 %vm171_vm7, %v2353_v46 }
0x2abb   :  { %2622 = vmatpush.bf16.msra.mxu1 %v3709_v32 }
0x2abf   :  { %2623 = vmatpush.bf16.msra.mxu1 %v3712_v40  ;;  %v2351_v25 = vpop.f32.mrf.mxu3 }
0x2b37   :  { %v2379_v26 = vpop.f32.mrf.mxu1 }
0x2b38   :  { %v2380_v31 = vadd.f32 %v2379_v26, %v2363_v54 }
0x2b3a   :  { %v2383_v15 = vadd.f32 %v2380_v31, %v3794_v27 }
0x2b3c   :  { %3126 = vtanh.f32 %v2383_v15 }
0x2b3f   :  { %v2381_v35 = vpop.f32.mrf.mxu1 }
0x2b42   :  { %v3127_v38 = vpop.eup %3126 }
0x2b43   :  { %2385 = vst.msk [vmem:[#allocation3 + $0x6] sm:$0x3] %vm371_vm8, %v3127_v38  ;;  %v2386_v41 = vpack.c.bf16 %v3127_v38, %v3127_v38 }
0x2b45   :  { %2912 = vmatmul.msk.bf16.vlgmr.msra.gmra.mxu2 %vm171_vm7, %v2386_v41 }
0x2b46   :  { %2639 = vmatpush.bf16.msra.mxu2 %v3750_v55 }
0x2b4a   :  { %2640 = vmatpush.bf16.msra.mxu2 %v3754_v23 }
0x2bc8   :  { %v2399_v32 = vpop.f32.mrf.mxu2 }
0x2bc9   :  { %v2400_v40 = vadd.f32 %v2399_v32, %v3672_v14 }
0x2bcb   :  { %2424 = vrot.lane.b32.xlu0 %v2400_v40, %s3164_s4  ;;  %v2403_v3 = vadd.f32 %v2400_v40, %v3906_v20 }
0x2bcd   :  { %v2913_v16 = vmul.f32 -1.442695, %v2403_v3 }
0x2bcf   :  { %3128 = vpow2.f32 %v2913_v16 }
0x2bd0   :  { %v2401_v13 = vpop.f32.mrf.mxu2 }
0x2bd5   :  { %v3129_v29 = vpop.eup %3128 }
0x2bd6   :  { %v2407_v45 = vadd.f32 1.0, %v3129_v29 }
0x2bd8   :  { %3130 = vrcp.f32 %v2407_v45  ;;  %v2419_v59 = vand.u32 2147483648, %v2407_v45  ;;  %vm2413_vm14 = vweird.f32 %v2407_v45  ;;  %v2417_v62 = vand.u32 2147483647, %v2407_v45 }
0x2bda   :  { %v2420_v1 = vor.u32 1.1754944e-38, %v2419_v59  ;;  %vm2418_vm10 = vcmp.eq.f32.partialorder %v2417_v62, 8.507059e+37 }
0x2bde   :  { %v3131_v55 = vpop.eup %3130 }
0x2bdf   :  { %v2409_v23 = vmul.f32 %v3131_v55, %v2407_v45  ;;  %vm2414_vm11 = vweird.f32 %v3131_v55 }
0x2be0   :  { %vm2415_vm15 = vmor %vm2413_vm14, %vm2414_vm11 }
0x2be1   :  { %v2410_v34 = vsub.f32 1.0, %v2409_v23 }
0x2be3   :  { %v2411_v28 = vmul.f32 %v3131_v55, %v2410_v34 }
0x2be5   :  { %v2412_v39 = vadd.f32 %v3131_v55, %v2411_v28 }
0x2be7   :  { %v2416_v12 = vsel %vm2415_vm15, %v3131_v55, %v2412_v39 }
0x2be8   :  { %v2421_v24 = vsel %vm2418_vm10, %v2420_v1, %v2416_v12 }
0x2be9   :  { %v2434_v11 = vsub.f32 1.0, %v2421_v24 }
0x2c3d   :  { %v2425_v43 = vpop.permute.xlu0 %2424 }
0x2c3e   :  { %v2427_v7 = vmul.f32 %v2425_v43, %v2421_v24 }
0x2c40   :  { %2429 = vrot.lane.b32.xlu2 %v2427_v7, %s3164_s4 }
0x2c48   :  { %2441 = vrot.lane.b32.xlu2 %v3127_v38, %s3167_s13 }
0x2c9a   :  { %v2430_v8 = vpop.permute.xlu2 %2429 }
0x2c9b   :  { %v2432_v47 = vadd.f32 %v2430_v8, %v3906_v20 }
0x2c9d   :  { %3132 = vtanh.f32 %v2432_v47 }
0x2ca2   :  { %v2442_v49 = vpop.permute.xlu2 %2441 }
0x2ca3   :  { %v3133_v10 = vpop.eup %3132  ;;  %v2444_v19 = vmul.f32 %v2442_v49, %v2421_v24 }
0x2ca4   :  { %2436 = vrot.lane.b32.xlu0 %v3133_v10, %s3166_s5 }
0x2d16   :  { %v2437_v44 = vpop.permute.xlu0 %2436 }
0x2d17   :  { %v2439_v53 = vmul.f32 %v2437_v44, %v2434_v11 }
0x2d19   :  { %v2445_v54 = vadd.f32 %v2444_v19, %v2439_v53 }
0x2d1b   :  { %v2446_v2 = vpack.c.bf16 %v2445_v54, %v2445_v54 }
0x2d1d   :  { %2448 = vrot.lane.b32.xlu0 %v2446_v2, %s3166_s5 }
0x2d8f   :  { %v2449_v56 = vpop.permute.xlu0 %2448 }
0x2d90   :  { %2914 = vmatmul.msk.bf16.vlgmr.msra.gmra.mxu3 %vm171_vm7, %v2449_v56  ;;  %2917 = vmatmul.msk.bf16.vlgmr.msrb.gmra.mxu2 %vm171_vm7, %v2449_v56 }
0x2d91   :  { %2669 = vmatpush.bf16.msra.mxu3 %v3739_v48 }
0x2e13   :  { %v2462_v17 = vpop.f32.mrf.mxu3  ;;  %v2522_v57 = vpop.f32.mrf.mxu2 }
0x2e14   :  { %v2463_v5 = vadd.f32 %v2462_v17, %v3746_v50  ;;  %v3157_v17 = vld [vmem:[%s3971_s1 + $0xa0] sm:$0xff] }
0x2e16   :  { %v2466_v58 = vpack.c.bf16 %v2463_v5, %v2463_v5 }
0x2e18   :  { %2915 = vmatmul.msk.bf16.vlgmr.msra.gmra.mxu0 %vm171_vm7, %v2466_v58 }
0x2e19   :  { %2682 = vmatpush.bf16.msra.mxu0 %v3774_v4 }
0x2e1b   :  { %v2464_v60 = vpop.f32.mrf.mxu3  ;;  %v2524_v36 = vpop.f32.mrf.mxu2 }
0x2e1d   :  { %2683 = vmatpush.bf16.msra.mxu0 %v3778_v37 }
0x2e95   :  { %v2479_v63 = vpop.f32.mrf.mxu0 }
0x2e96   :  { %v2483_v30 = vsel %vm3762_vm9, %v2479_v63, -1e+30 }
0x2e97   :  { %v2484_v33 = vsel %vm1813_vm13, %v2483_v30, -inf }
0x2e98   :  { %2485 = vmax.xlane.f32.xlu2 %v2484_v33 }
0x2e9d   :  { %v2481_v48 = vpop.f32.mrf.mxu0 }
0x2f0b   :  { %v2486_v6 = vpop.xlane.xlu2 %2485 }
0x2f0c   :  { %v2487_v0 = vsub.f32 %v2483_v30, %v2486_v6 }
0x2f0e   :  { %v2488_v9 = vmul.f32 1.442695, %v2487_v0 }
0x2f10   :  { %3134 = vpow2.f32 %v2488_v9 }
0x2f16   :  { %v3135_v61 = vpop.eup %3134 }
0x2f17   :  { %v2490_v18 = vsel %vm1813_vm13, %v3135_v61, 0.0 }
0x2f18   :  { %2491 = vadd.xlane.f32.xlu0 %v2490_v18 }
0x2f8b   :  { %v2492_v4 = vpop.xlane.xlu0 %2491 }
0x2f8c   :  { %3136 = vrcp.f32 %v2492_v4 }
0x2f92   :  { %v3137_v21 = vpop.eup %3136 }
0x2f93   :  { %v2494_v37 = vmul.f32 %v3137_v21, %v3135_v61 }
0x2f95   :  { %v2495_v22 = vpack.c.bf16 %v2494_v37, %v2494_v37 }
0x2f97   :  { %2916 = vmatmul.msk.bf16.vlgmr.msrb.gmra.mxu1 %vm1466_vm12, %v2495_v22 }
0x2f98   :  { %2698 = vmatpush.bf16.msrb.mxu1 %v3728_v52 }
0x2f9c   :  { %2699 = vmatpush.bf16.msrb.mxu1 %v3734_v42 }
0x3014   :  { %v2508_v46 = vpop.f32.mrf.mxu1 }
0x3015   :  { %v2512_v25 = vpack.c.bf16 %v2508_v46, %v2508_v46 }
0x3017   :  { %2918 = vmatmul.msk.bf16.vlgmr.msrb.gmra.mxu3 %vm171_vm7, %v2512_v25 }
0x301c   :  { %v2510_v26 = vpop.f32.mrf.mxu1 }
0x309a   :  { %v2538_v31 = vpop.f32.mrf.mxu3 }
0x309b   :  { %v2539_v15 = vadd.f32 %v2538_v31, %v2522_v57 }
0x309d   :  { %v2542_v35 = vadd.f32 %v2539_v15, %v3794_v27 }
0x309f   :  { %3138 = vtanh.f32 %v2542_v35 }
0x30a2   :  { %v2540_v38 = vpop.f32.mrf.mxu3 }
0x30a5   :  { %v3139_v41 = vpop.eup %3138 }
0x30a6   :  { %2544 = vst.msk [vmem:[#allocation3 + $0x8] sm:$0x3] %vm371_vm8, %v3139_v41  ;;  %v2602_v32 = vrot.slane %v3139_v41, 6  ;;  %v2545_v40 = vpack.c.bf16 %v3139_v41, %v3139_v41 }
0x30a8   :  { %2603 = vrot.lane.b32.xlu2 %v2602_v32, %s3167_s13  ;;  %2919 = vmatmul.msk.bf16.vlgmr.msrb.gmra.mxu0 %vm171_vm7, %v2545_v40 }
0x3102   :  { %v2604_v11 = vpop.permute.xlu2 %2603 }
0x3125   :  { %v2558_v52 = vpop.f32.mrf.mxu0 }
0x3126   :  { %v2559_v42 = vadd.f32 %v2558_v52, %v3672_v14  ;;  %v2708_v52 = vld [vmem:[#allocation3] sm:$0xff] }
0x3128   :  { %v2563_v13 = vrot.slane %v2559_v42, 6 }
0x312a   :  { %2585 = vrot.lane.b32.xlu1 %v2563_v13, %s3164_s4  ;;  %v2565_v16 = vadd.f32 %v2563_v13, %v3906_v20 }
0x312c   :  { %v2920_v29 = vmul.f32 -1.442695, %v2565_v16 }
0x312d   :  { %v2560_v3 = vpop.f32.mrf.mxu0 }
0x312e   :  { %3140 = vpow2.f32 %v2920_v29 }
0x3134   :  { %v3141_v45 = vpop.eup %3140 }
0x3135   :  { %v2569_v55 = vadd.f32 1.0, %v3141_v45 }
0x3137   :  { %3142 = vrcp.f32 %v2569_v55  ;;  %v2581_v62 = vand.u32 2147483648, %v2569_v55  ;;  %vm2575_vm1 = vweird.f32 %v2569_v55  ;;  %v2579_v14 = vand.u32 2147483647, %v2569_v55 }
0x3139   :  { %v2582_v1 = vor.u32 1.1754944e-38, %v2581_v62  ;;  %vm2580_vm3 = vcmp.eq.f32.partialorder %v2579_v14, 8.507059e+37 }
0x313d   :  { %v3143_v23 = vpop.eup %3142 }
0x313e   :  { %v2571_v34 = vmul.f32 %v3143_v23, %v2569_v55  ;;  %vm2576_vm0 = vweird.f32 %v3143_v23 }
0x313f   :  { %vm2577_vm2 = vmor %vm2575_vm1, %vm2576_vm0 }
0x3140   :  { %v2572_v28 = vsub.f32 1.0, %v2571_v34 }
0x3142   :  { %v2573_v39 = vmul.f32 %v3143_v23, %v2572_v28 }
0x3144   :  { %v2574_v59 = vadd.f32 %v3143_v23, %v2573_v39 }
0x3146   :  { %v2578_v12 = vsel %vm2577_vm2, %v3143_v23, %v2574_v59 }
0x3147   :  { %v2583_v24 = vsel %vm2580_vm3, %v2582_v1, %v2578_v12 }
0x3148   :  { %v2595_v49 = vsub.f32 1.0, %v2583_v24  ;;  %v2606_v19 = vmul.f32 %v2604_v11, %v2583_v24 }
0x319c   :  { %v2586_v43 = vpop.permute.xlu1 %2585 }
0x319d   :  { %v2588_v7 = vmul.f32 %v2586_v43, %v2583_v24 }
0x319f   :  { %2590 = vrot.lane.b32.xlu1 %v2588_v7, %s3164_s4 }
0x3211   :  { %v2591_v8 = vpop.permute.xlu1 %2590 }
0x3212   :  { %v2593_v47 = vadd.f32 %v2591_v8, %v3906_v20  ;;  %v3158_v20 = vld [vmem:[%s3971_s1 + $0x98] sm:$0xff] }
0x3214   :  { %3144 = vtanh.f32 %v2593_v47 }
0x321a   :  { %v3145_v10 = vpop.eup %3144 }
0x321b   :  { %2597 = vrot.lane.b32.xlu1 %v3145_v10, %s3166_s5 }
0x328d   :  { %v2598_v44 = vpop.permute.xlu1 %2597 }
0x328e   :  { %v2600_v53 = vmul.f32 %v2598_v44, %v2595_v49 }
0x3290   :  { %v2607_v54 = vadd.f32 %v2606_v19, %v2600_v53 }
0x3292   :  { %v2608_v2 = vpack.c.bf16 %v2607_v54, %v2607_v54 }
0x3294   :  { %v2610_v56 = vrot.slane %v2608_v2, 1 }
0x3296   :  { %2611 = vrot.lane.b32.xlu0 %v2610_v56, %s3166_s5 }
0x329e   :  { %2713 = vrot.lane.b32.xlu0 %v3157_v17, %s3164_s4 }
0x32a6   :  { %2711 = vrot.lane.b32.xlu0 %v3158_v20, %s3164_s4 }
0x32ae   :  { %2717 = vrot.lane.b32.xlu0 %v3746_v50, %s3164_s4 }
0x3308   :  { %v2612_v57 = vpop.permute.xlu0 %2611 }
0x3309   :  { %2921 = vmatmul.msk.bf16.vlgmr.msra.gmra.mxu1 %vm171_vm7, %v2612_v57  ;;  %2924 = vmatmul.msk.bf16.vlgmr.msra.gmra.mxu0 %vm171_vm7, %v2612_v57 }
0x3310   :  { %v2714_v31 = vpop.permute.xlu0 %2713 }
0x3311   :  { %2729 = vmatpush.bf16.msrb.mxu2 %v2714_v31 }
0x3318   :  { %v2712_v15 = vpop.permute.xlu0 %2711 }
0x3319   :  { %2730 = vmatpush.bf16.msrb.mxu2 %v2712_v15 }
0x3320   :  { %v2718_v3 = vpop.permute.xlu0 %2717 }
0x3386   :  { %v2625_v5 = vpop.f32.mrf.mxu1  ;;  %v2685_v58 = vpop.f32.mrf.mxu0 }
0x3387   :  { %v2626_v60 = vadd.f32 %v2625_v5, %v3746_v50 }
0x3389   :  { %v2629_v36 = vpack.c.bf16 %v2626_v60, %v2626_v60 }
0x338b   :  { %2922 = vmatmul.msk.bf16.vlgmr.msra.gmra.mxu2 %vm171_vm7, %v2629_v36 }
0x338e   :  { %v2627_v63 = vpop.f32.mrf.mxu1  ;;  %v2687_v30 = vpop.f32.mrf.mxu0 }
0x340e   :  { %v2642_v33 = vpop.f32.mrf.mxu2 }
0x340f   :  { %v2646_v48 = vsel %vm3762_vm9, %v2642_v33, -1e+30 }
0x3410   :  { %v2647_v6 = vsel %vm1813_vm13, %v2646_v48, -inf }
0x3411   :  { %2648 = vmax.xlane.f32.xlu1 %v2647_v6 }
0x3416   :  { %v2644_v0 = vpop.f32.mrf.mxu2 }
0x3484   :  { %v2649_v9 = vpop.xlane.xlu1 %2648 }
0x3485   :  { %v2650_v61 = vsub.f32 %v2646_v48, %v2649_v9 }
0x3487   :  { %v2651_v18 = vmul.f32 1.442695, %v2650_v61 }
0x3489   :  { %3146 = vpow2.f32 %v2651_v18 }
0x348f   :  { %v3147_v4 = vpop.eup %3146 }
0x3490   :  { %v2653_v50 = vsel %vm1813_vm13, %v3147_v4, 0.0 }
0x3491   :  { %2654 = vadd.xlane.f32.xlu2 %v2653_v50 }
0x3504   :  { %v2655_v21 = vpop.xlane.xlu2 %2654 }
0x3505   :  { %3148 = vrcp.f32 %v2655_v21 }
0x350b   :  { %v3149_v37 = vpop.eup %3148 }
0x350c   :  { %v2657_v22 = vmul.f32 %v3149_v37, %v3147_v4 }
0x350e   :  { %v2658_v46 = vpack.c.bf16 %v2657_v22, %v2657_v22 }
0x3510   :  { %2923 = vmatmul.msk.bf16.vlgmr.msra.gmra.mxu3 %vm1466_vm12, %v2658_v46  ;;  %vm2738_vm12 = vcmask 257024  }
0x3593   :  { %v2671_v51 = vpop.f32.mrf.mxu3 }
0x3594   :  { %v2675_v25 = vpack.c.bf16 %v2671_v51, %v2671_v51 }
0x3596   :  { %2925 = vmatmul.msk.bf16.vlgmr.msrb.gmra.mxu1 %vm171_vm7, %v2675_v25 }
0x359b   :  { %v2673_v26 = vpop.f32.mrf.mxu3 }
0x3613   :  { %v2701_v35 = vpop.f32.mrf.mxu1 }
0x3614   :  { %v2702_v38 = vadd.f32 %v2701_v35, %v2685_v58 }
0x3616   :  { %v2705_v41 = vadd.f32 %v2702_v38, %v3794_v27 }
0x3618   :  { %3150 = vtanh.f32 %v2705_v41 }
0x361b   :  { %v2703_v32 = vpop.f32.mrf.mxu1 }
0x361e   :  { %v3151_v40 = vpop.eup %3150 }
0x361f   :  { %2707 = vst.msk [vmem:[#allocation3 + $0xa] sm:$0x3] %vm371_vm8, %v3151_v40 }
0x3626   :  { %v2709_v42 = vld [vmem:[#allocation3 + $0x8] sm:$0xf] }
0x3627   :  { %v2710_v13 = vpack.c.bf16 %v2709_v42, %v2708_v52 }
0x3629   :  { %2926 = vmatmul.msk.bf16.vlgmr.msrb.gmra.mxu2 %vm171_vm7, %v2710_v13 }
0x36ac   :  { %v2732_v16 = vpop.f32.mrf.mxu2 }
0x36ad   :  { %v2733_v29 = vadd.f32 %v2732_v16, %v2718_v3 }
0x36af   :  { %2737 = vst.msk [vmem:[%s3973_s3] sm:$0xff] %vm171_vm7, %v2733_v29 }
0x36b4   :  { %v2734_v45 = vpop.f32.mrf.mxu2 }
0x36b5   :  { %v2735_v27 = vadd.f32 %v2734_v45, %v2718_v3 }
0x36b7   :  { %2739 = vst.msk [vmem:[%s3973_s3 + $0x8] sm:$0xf] %vm2738_vm12, %v2735_v27 }

</bundles_post_ra>
